<compile_context>
chip_gen: v7x
topology: tpu7x:2x2x1
jax: 0.10.0
libtpu: 0.0.40
codegen_flags: <defaults>
</compile_context>

<pallas_src>
import jax
import jax.numpy as jnp
from jax.experimental import pallas as pl
from jax.experimental.pallas import tpu as pltpu  # noqa: F401

H = 128          # hidden_size == input_size (dLSTM feeds x_0 = zeros(B, hidden_size))
B = 1            # batch (init_hidden is [num_layers, 1, hidden_size])
NUM_LAYERS = 2
SEQ_LEN = 8


def _permute_gate_cols(w):
    """Reorder 4H gate columns from PyTorch [i|f|g|o] to [i|f|o|g]."""
    i, f, g, o = jnp.split(w, 4, axis=-1)
    return jnp.concatenate([i, f, o, g], axis=-1)


def _cell_update(gates, c_prev):
    """LSTM cell nonlinearity; gate columns are pre-permuted to [i | f | o | g]."""
    s = jax.nn.sigmoid(gates[:, :3 * H])        # one EUP stream for i, f, o
    g = jnp.tanh(gates[:, 3 * H:])              # one EUP stream for g
    i = s[:, 0 * H:1 * H]
    f = s[:, 1 * H:2 * H]
    o = s[:, 2 * H:3 * H]
    c_new = f * c_prev + i * g
    h_new = o * jnp.tanh(c_new)
    return h_new, c_new


def dlstm_forward(seq_len, h_init, c_init, params):
    """h_init/c_init: [NUM_LAYERS, B, H]; params are pre-transposed (x @ W layout)."""
    wih0, whh0, b0, wih1, whh1, b1, wout, bout = params
    hp = jax.lax.Precision.HIGHEST

    # ---- one-time weight prep (f32 algebra), then bf16 cast for the MXU ----
    wfold = jnp.dot(wout, wih0, precision=hp)               # (H, 4H)  feedback folded into layer 0
    bfold = jnp.dot(bout, wih0, precision=hp)               # (1, 4H)
    wfused0 = jnp.concatenate([wfold, whh0], axis=0)        # (2H, 4H) for [h1_prev | h0_prev]
    bfused0 = bfold + b0                                    # (1, 4H)  valid for t >= 1 only
    wcat1 = jnp.concatenate([wih1, whh1], axis=0)           # (2H, 4H) for [h0_new | h1_prev]

    # gate-column permutation [i|f|g|o] -> [i|f|o|g]; big weights cast to bf16
    wfused0 = _permute_gate_cols(wfused0).astype(jnp.bfloat16)
    wcat1 = _permute_gate_cols(wcat1).astype(jnp.bfloat16)
    b0_p = _permute_gate_cols(b0)                            # f32 biases
    bfused0_p = _permute_gate_cols(bfused0)
    b1_p = _permute_gate_cols(b1)

    h2d = h_init.reshape(NUM_LAYERS * B, H)
    c2d = c_init.reshape(NUM_LAYERS * B, H)

    def kernel(h_ref, c_ref, wfused0_ref, wcat1_ref, b0_ref, bfused0_ref, b1_ref,
               out_ref):
        h0 = h_ref[0:B, :]
        h1 = h_ref[B:2 * B, :]
        c0 = c_ref[0:B, :]
        c1 = c_ref[B:2 * B, :]

        h1_feed = jnp.zeros((B, H), jnp.float32)   # x_0 = 0 -> no feedback at t = 0
        outs = []

        # TODO(synk): StackedLSTMCell applies dropout between layers; identity in eval mode.
        for t in range(seq_len):  # full Python unroll (seq_len = 8)
            # layer 0: feedback Linear already folded in; one fused matmul, K = 2H = 256.
            xh0 = jnp.concatenate([h1_feed, h0], axis=1).astype(jnp.bfloat16)
            bias0 = b0_ref[...] if t == 0 else bfused0_ref[...]
            g0 = jnp.dot(xh0, wfused0_ref[...],
                         preferred_element_type=jnp.float32) + bias0
            h0, c0 = _cell_update(g0, c0)

            # layer 1: one fused matmul over [h0_new | h1_prev], K = 2H = 256.
            xh1 = jnp.concatenate([h0, h1], axis=1).astype(jnp.bfloat16)
            g1 = jnp.dot(xh1, wcat1_ref[...],
                         preferred_element_type=jnp.float32) + b1_ref[...]
            h1, c1 = _cell_update(g1, c1)

            outs.append(h1)
            h1_feed = h1

        # single unmasked full-tile store: (seq_len*B, H) = (8, 128) = one f32 vreg tile
        out_ref[...] = jnp.concatenate(outs, axis=0)

    out_flat = pl.pallas_call(
        kernel,
        out_shape=jax.ShapeDtypeStruct((seq_len * B, H), jnp.float32),
    )(h2d, c2d, wfused0, wcat1, b0_p, bfused0_p, b1_p)
    return out_flat.reshape(seq_len, B, H)


def dlstm_ref(seq_len, h_init, c_init, params):
    """Pure-JAX reference replicating the PyTorch forward (original gate order)."""
    wih0, whh0, b0, wih1, whh1, b1, wout, bout = params
    hp = jax.lax.Precision.HIGHEST
    x = jnp.zeros((B, H), jnp.float32)
    h = [h_init[0], h_init[1]]
    c = [c_init[0], c_init[1]]
    outs = []
    for _ in range(seq_len):
        inp = x
        for l, (wih, whh, b) in enumerate([(wih0, whh0, b0), (wih1, whh1, b1)]):
            gates = jnp.dot(inp, wih, precision=hp) + jnp.dot(h[l], whh, precision=hp) + b
            i = jax.nn.sigmoid(gates[:, :H])
            f = jax.nn.sigmoid(gates[:, H:2 * H])
            g = jnp.tanh(gates[:, 2 * H:3 * H])
            o = jax.nn.sigmoid(gates[:, 3 * H:])
            c[l] = f * c[l] + i * g
            h[l] = o * jnp.tanh(c[l])
            inp = h[l]
        outs.append(inp)
        x = jnp.dot(inp, wout, precision=hp) + bout
    return jnp.stack(outs)


if __name__ == "__main__":
    key = jax.random.PRNGKey(0)
    ks = jax.random.split(key, 12)
    bound = 1.0 / jnp.sqrt(H)  # PyTorch default LSTMCell/Linear init range

    def u(k, shape):
        return jax.random.uniform(k, shape, jnp.float32, -bound, bound)

    # LSTMCell layer 0 (input_size=H) and layer 1 (input=hidden=H); weights pre-transposed.
    wih0 = u(ks[0], (H, 4 * H))
    whh0 = u(ks[1], (H, 4 * H))
    b0 = u(ks[2], (1, 4 * H)) + u(ks[3], (1, 4 * H))   # b_ih + b_hh
    wih1 = u(ks[4], (H, 4 * H))
    whh1 = u(ks[5], (H, 4 * H))
    b1 = u(ks[6], (1, 4 * H)) + u(ks[7], (1, 4 * H))
    # self.out = nn.Linear(hidden_size, input_size), transposed to [H, H_in].
    wout = u(ks[8], (H, H))
    bout = u(ks[9], (1, H))
    params = (wih0, whh0, b0, wih1, whh1, b1, wout, bout)

    # init_hidden: h, c each [num_layers=2, 1, hidden_size]
    h0 = jax.random.normal(ks[10], (NUM_LAYERS, B, H), jnp.float32)
    c0 = jax.random.normal(ks[11], (NUM_LAYERS, B, H), jnp.float32)

    out = dlstm_forward(SEQ_LEN, h0, c0, params)
    out = jax.block_until_ready(out)

    ref = dlstm_ref(SEQ_LEN, h0, c0, params)
    assert out.shape == (SEQ_LEN, B, H)
    # bf16 MXU operands + feedback-fold reassociation across 8 recurrent steps:
    # tolerance re-derived to ~1e-2 level per perf review.
    assert jnp.allclose(out, ref, atol=3e-2, rtol=3e-2), "mismatch vs pure-JAX reference"

    print("KERNEL_OK")
</pallas_src>

<mosaic_0001>
module attributes {stable_mosaic.version = 11 : i64} {
  func.func @kernel(%arg0: memref<2x128xf32, #tpu.memory_space<vmem>>, %arg1: memref<2x128xf32, #tpu.memory_space<vmem>>, %arg2: memref<256x512xbf16, #tpu.memory_space<vmem>>, %arg3: memref<256x512xbf16, #tpu.memory_space<vmem>>, %arg4: memref<1x512xf32, #tpu.memory_space<vmem>>, %arg5: memref<1x512xf32, #tpu.memory_space<vmem>>, %arg6: memref<1x512xf32, #tpu.memory_space<vmem>>, %arg7: memref<8x128xf32, #tpu.memory_space<vmem>>) attributes {dimension_semantics = [], scalar_prefetch = 0 : i64, scratch_operands = 0 : i64, tpu.core_type = #tpu.core_type<tc>} {
    %c0 = arith.constant 0 : index
    %c0_0 = arith.constant 0 : index
    %0 = vector.load %arg0[%c0, %c0_0] : memref<2x128xf32, #tpu.memory_space<vmem>>, vector<1x128xf32>
    %c1 = arith.constant 1 : index
    %c0_1 = arith.constant 0 : index
    %1 = vector.load %arg0[%c1, %c0_1] : memref<2x128xf32, #tpu.memory_space<vmem>>, vector<1x128xf32>
    %c0_2 = arith.constant 0 : index
    %c0_3 = arith.constant 0 : index
    %2 = vector.load %arg1[%c0_2, %c0_3] : memref<2x128xf32, #tpu.memory_space<vmem>>, vector<1x128xf32>
    %c1_4 = arith.constant 1 : index
    %c0_5 = arith.constant 0 : index
    %3 = vector.load %arg1[%c1_4, %c0_5] : memref<2x128xf32, #tpu.memory_space<vmem>>, vector<1x128xf32>
    %cst = arith.constant 0.000000e+00 : f32
    %4 = vector.broadcast %cst : f32 to vector<1x128xf32>
    %5 = tpu.concatenate %4, %0 in 1 : vector<1x128xf32>, vector<1x128xf32> -> vector<1x256xf32>
    %6 = arith.truncf %5 : vector<1x256xf32> to vector<1x256xbf16>
    %c0_6 = arith.constant 0 : index
    %c0_7 = arith.constant 0 : index
    %7 = vector.load %arg4[%c0_6, %c0_7] : memref<1x512xf32, #tpu.memory_space<vmem>>, vector<1x512xf32>
    %c0_8 = arith.constant 0 : index
    %c0_9 = arith.constant 0 : index
    %8 = vector.load %arg2[%c0_8, %c0_9] : memref<256x512xbf16, #tpu.memory_space<vmem>>, vector<256x512xbf16>
    %cst_10 = arith.constant dense<0.000000e+00> : vector<1x512xf32>
    %9 = tpu.matmul %6, %8, %cst_10 {dimension_numbers = #tpu.dot_dimension_numbers<[1], [0], [0], [1], [0, 0, 1, 1], [], []>} : vector<1x256xbf16>, vector<256x512xbf16>, vector<1x512xf32> -> vector<1x512xf32>
    %10 = arith.addf %9, %7 : vector<1x512xf32>
    %11 = vector.extract_strided_slice %10 {offsets = [0, 0], sizes = [1, 384], strides = [1, 1]} : vector<1x512xf32> to vector<1x384xf32>
    %12 = arith.negf %11 : vector<1x384xf32>
    %13 = math.exp %12 : vector<1x384xf32>
    %cst_11 = arith.constant 1.000000e+00 : f32
    %14 = vector.broadcast %cst_11 : f32 to vector<1x384xf32>
    %15 = arith.addf %14, %13 : vector<1x384xf32>
    %16 = arith.divf %14, %15 : vector<1x384xf32>
    %17 = vector.extract_strided_slice %10 {offsets = [0, 384], sizes = [1, 128], strides = [1, 1]} : vector<1x512xf32> to vector<1x128xf32>
    %18 = math.tanh %17 : vector<1x128xf32>
    %19 = vector.extract_strided_slice %16 {offsets = [0, 0], sizes = [1, 128], strides = [1, 1]} : vector<1x384xf32> to vector<1x128xf32>
    %20 = vector.extract_strided_slice %16 {offsets = [0, 128], sizes = [1, 128], strides = [1, 1]} : vector<1x384xf32> to vector<1x128xf32>
    %21 = vector.extract_strided_slice %16 {offsets = [0, 256], sizes = [1, 128], strides = [1, 1]} : vector<1x384xf32> to vector<1x128xf32>
    %22 = arith.mulf %20, %2 : vector<1x128xf32>
    %23 = arith.mulf %19, %18 : vector<1x128xf32>
    %24 = arith.addf %22, %23 : vector<1x128xf32>
    %25 = math.tanh %24 : vector<1x128xf32>
    %26 = arith.mulf %21, %25 : vector<1x128xf32>
    %27 = tpu.concatenate %26, %1 in 1 : vector<1x128xf32>, vector<1x128xf32> -> vector<1x256xf32>
    %28 = arith.truncf %27 : vector<1x256xf32> to vector<1x256xbf16>
    %c0_12 = arith.constant 0 : index
    %c0_13 = arith.constant 0 : index
    %29 = vector.load %arg3[%c0_12, %c0_13] : memref<256x512xbf16, #tpu.memory_space<vmem>>, vector<256x512xbf16>
    %cst_14 = arith.constant dense<0.000000e+00> : vector<1x512xf32>
    %30 = tpu.matmul %28, %29, %cst_14 {dimension_numbers = #tpu.dot_dimension_numbers<[1], [0], [0], [1], [0, 0, 1, 1], [], []>} : vector<1x256xbf16>, vector<256x512xbf16>, vector<1x512xf32> -> vector<1x512xf32>
    %c0_15 = arith.constant 0 : index
    %c0_16 = arith.constant 0 : index
    %31 = vector.load %arg6[%c0_15, %c0_16] : memref<1x512xf32, #tpu.memory_space<vmem>>, vector<1x512xf32>
    %32 = arith.addf %30, %31 : vector<1x512xf32>
    %33 = vector.extract_strided_slice %32 {offsets = [0, 0], sizes = [1, 384], strides = [1, 1]} : vector<1x512xf32> to vector<1x384xf32>
    %34 = arith.negf %33 : vector<1x384xf32>
    %35 = math.exp %34 : vector<1x384xf32>
    %cst_17 = arith.constant 1.000000e+00 : f32
    %36 = vector.broadcast %cst_17 : f32 to vector<1x384xf32>
    %37 = arith.addf %36, %35 : vector<1x384xf32>
    %38 = arith.divf %36, %37 : vector<1x384xf32>
    %39 = vector.extract_strided_slice %32 {offsets = [0, 384], sizes = [1, 128], strides = [1, 1]} : vector<1x512xf32> to vector<1x128xf32>
    %40 = math.tanh %39 : vector<1x128xf32>
    %41 = vector.extract_strided_slice %38 {offsets = [0, 0], sizes = [1, 128], strides = [1, 1]} : vector<1x384xf32> to vector<1x128xf32>
    %42 = vector.extract_strided_slice %38 {offsets = [0, 128], sizes = [1, 128], strides = [1, 1]} : vector<1x384xf32> to vector<1x128xf32>
    %43 = vector.extract_strided_slice %38 {offsets = [0, 256], sizes = [1, 128], strides = [1, 1]} : vector<1x384xf32> to vector<1x128xf32>
    %44 = arith.mulf %42, %3 : vector<1x128xf32>
    %45 = arith.mulf %41, %40 : vector<1x128xf32>
    %46 = arith.addf %44, %45 : vector<1x128xf32>
    %47 = math.tanh %46 : vector<1x128xf32>
    %48 = arith.mulf %43, %47 : vector<1x128xf32>
    %49 = tpu.concatenate %48, %26 in 1 : vector<1x128xf32>, vector<1x128xf32> -> vector<1x256xf32>
    %50 = arith.truncf %49 : vector<1x256xf32> to vector<1x256xbf16>
    %c0_18 = arith.constant 0 : index
    %c0_19 = arith.constant 0 : index
    %51 = vector.load %arg5[%c0_18, %c0_19] : memref<1x512xf32, #tpu.memory_space<vmem>>, vector<1x512xf32>
    %c0_20 = arith.constant 0 : index
    %c0_21 = arith.constant 0 : index
    %52 = vector.load %arg2[%c0_20, %c0_21] : memref<256x512xbf16, #tpu.memory_space<vmem>>, vector<256x512xbf16>
    %cst_22 = arith.constant dense<0.000000e+00> : vector<1x512xf32>
    %53 = tpu.matmul %50, %52, %cst_22 {dimension_numbers = #tpu.dot_dimension_numbers<[1], [0], [0], [1], [0, 0, 1, 1], [], []>} : vector<1x256xbf16>, vector<256x512xbf16>, vector<1x512xf32> -> vector<1x512xf32>
    %54 = arith.addf %53, %51 : vector<1x512xf32>
    %55 = vector.extract_strided_slice %54 {offsets = [0, 0], sizes = [1, 384], strides = [1, 1]} : vector<1x512xf32> to vector<1x384xf32>
    %56 = arith.negf %55 : vector<1x384xf32>
    %57 = math.exp %56 : vector<1x384xf32>
    %cst_23 = arith.constant 1.000000e+00 : f32
    %58 = vector.broadcast %cst_23 : f32 to vector<1x384xf32>
    %59 = arith.addf %58, %57 : vector<1x384xf32>
    %60 = arith.divf %58, %59 : vector<1x384xf32>
    %61 = vector.extract_strided_slice %54 {offsets = [0, 384], sizes = [1, 128], strides = [1, 1]} : vector<1x512xf32> to vector<1x128xf32>
    %62 = math.tanh %61 : vector<1x128xf32>
    %63 = vector.extract_strided_slice %60 {offsets = [0, 0], sizes = [1, 128], strides = [1, 1]} : vector<1x384xf32> to vector<1x128xf32>
    %64 = vector.extract_strided_slice %60 {offsets = [0, 128], sizes = [1, 128], strides = [1, 1]} : vector<1x384xf32> to vector<1x128xf32>
    %65 = vector.extract_strided_slice %60 {offsets = [0, 256], sizes = [1, 128], strides = [1, 1]} : vector<1x384xf32> to vector<1x128xf32>
    %66 = arith.mulf %64, %24 : vector<1x128xf32>
    %67 = arith.mulf %63, %62 : vector<1x128xf32>
    %68 = arith.addf %66, %67 : vector<1x128xf32>
    %69 = math.tanh %68 : vector<1x128xf32>
    %70 = arith.mulf %65, %69 : vector<1x128xf32>
    %71 = tpu.concatenate %70, %48 in 1 : vector<1x128xf32>, vector<1x128xf32> -> vector<1x256xf32>
    %72 = arith.truncf %71 : vector<1x256xf32> to vector<1x256xbf16>
    %c0_24 = arith.constant 0 : index
    %c0_25 = arith.constant 0 : index
    %73 = vector.load %arg3[%c0_24, %c0_25] : memref<256x512xbf16, #tpu.memory_space<vmem>>, vector<256x512xbf16>
    %cst_26 = arith.constant dense<0.000000e+00> : vector<1x512xf32>
    %74 = tpu.matmul %72, %73, %cst_26 {dimension_numbers = #tpu.dot_dimension_numbers<[1], [0], [0], [1], [0, 0, 1, 1], [], []>} : vector<1x256xbf16>, vector<256x512xbf16>, vector<1x512xf32> -> vector<1x512xf32>
    %c0_27 = arith.constant 0 : index
    %c0_28 = arith.constant 0 : index
    %75 = vector.load %arg6[%c0_27, %c0_28] : memref<1x512xf32, #tpu.memory_space<vmem>>, vector<1x512xf32>
    %76 = arith.addf %74, %75 : vector<1x512xf32>
    %77 = vector.extract_strided_slice %76 {offsets = [0, 0], sizes = [1, 384], strides = [1, 1]} : vector<1x512xf32> to vector<1x384xf32>
    %78 = arith.negf %77 : vector<1x384xf32>
    %79 = math.exp %78 : vector<1x384xf32>
    %cst_29 = arith.constant 1.000000e+00 : f32
    %80 = vector.broadcast %cst_29 : f32 to vector<1x384xf32>
    %81 = arith.addf %80, %79 : vector<1x384xf32>
    %82 = arith.divf %80, %81 : vector<1x384xf32>
    %83 = vector.extract_strided_slice %76 {offsets = [0, 384], sizes = [1, 128], strides = [1, 1]} : vector<1x512xf32> to vector<1x128xf32>
    %84 = math.tanh %83 : vector<1x128xf32>
    %85 = vector.extract_strided_slice %82 {offsets = [0, 0], sizes = [1, 128], strides = [1, 1]} : vector<1x384xf32> to vector<1x128xf32>
    %86 = vector.extract_strided_slice %82 {offsets = [0, 128], sizes = [1, 128], strides = [1, 1]} : vector<1x384xf32> to vector<1x128xf32>
    %87 = vector.extract_strided_slice %82 {offsets = [0, 256], sizes = [1, 128], strides = [1, 1]} : vector<1x384xf32> to vector<1x128xf32>
    %88 = arith.mulf %86, %46 : vector<1x128xf32>
    %89 = arith.mulf %85, %84 : vector<1x128xf32>
    %90 = arith.addf %88, %89 : vector<1x128xf32>
    %91 = math.tanh %90 : vector<1x128xf32>
    %92 = arith.mulf %87, %91 : vector<1x128xf32>
    %93 = tpu.concatenate %92, %70 in 1 : vector<1x128xf32>, vector<1x128xf32> -> vector<1x256xf32>
    %94 = arith.truncf %93 : vector<1x256xf32> to vector<1x256xbf16>
    %c0_30 = arith.constant 0 : index
    %c0_31 = arith.constant 0 : index
    %95 = vector.load %arg5[%c0_30, %c0_31] : memref<1x512xf32, #tpu.memory_space<vmem>>, vector<1x512xf32>
    %c0_32 = arith.constant 0 : index
    %c0_33 = arith.constant 0 : index
    %96 = vector.load %arg2[%c0_32, %c0_33] : memref<256x512xbf16, #tpu.memory_space<vmem>>, vector<256x512xbf16>
    %cst_34 = arith.constant dense<0.000000e+00> : vector<1x512xf32>
    %97 = tpu.matmul %94, %96, %cst_34 {dimension_numbers = #tpu.dot_dimension_numbers<[1], [0], [0], [1], [0, 0, 1, 1], [], []>} : vector<1x256xbf16>, vector<256x512xbf16>, vector<1x512xf32> -> vector<1x512xf32>
    %98 = arith.addf %97, %95 : vector<1x512xf32>
    %99 = vector.extract_strided_slice %98 {offsets = [0, 0], sizes = [1, 384], strides = [1, 1]} : vector<1x512xf32> to vector<1x384xf32>
    %100 = arith.negf %99 : vector<1x384xf32>
    %101 = math.exp %100 : vector<1x384xf32>
    %cst_35 = arith.constant 1.000000e+00 : f32
    %102 = vector.broadcast %cst_35 : f32 to vector<1x384xf32>
    %103 = arith.addf %102, %101 : vector<1x384xf32>
    %104 = arith.divf %102, %103 : vector<1x384xf32>
    %105 = vector.extract_strided_slice %98 {offsets = [0, 384], sizes = [1, 128], strides = [1, 1]} : vector<1x512xf32> to vector<1x128xf32>
    %106 = math.tanh %105 : vector<1x128xf32>
    %107 = vector.extract_strided_slice %104 {offsets = [0, 0], sizes = [1, 128], strides = [1, 1]} : vector<1x384xf32> to vector<1x128xf32>
    %108 = vector.extract_strided_slice %104 {offsets = [0, 128], sizes = [1, 128], strides = [1, 1]} : vector<1x384xf32> to vector<1x128xf32>
    %109 = vector.extract_strided_slice %104 {offsets = [0, 256], sizes = [1, 128], strides = [1, 1]} : vector<1x384xf32> to vector<1x128xf32>
    %110 = arith.mulf %108, %68 : vector<1x128xf32>
    %111 = arith.mulf %107, %106 : vector<1x128xf32>
    %112 = arith.addf %110, %111 : vector<1x128xf32>
    %113 = math.tanh %112 : vector<1x128xf32>
    %114 = arith.mulf %109, %113 : vector<1x128xf32>
    %115 = tpu.concatenate %114, %92 in 1 : vector<1x128xf32>, vector<1x128xf32> -> vector<1x256xf32>
    %116 = arith.truncf %115 : vector<1x256xf32> to vector<1x256xbf16>
    %c0_36 = arith.constant 0 : index
    %c0_37 = arith.constant 0 : index
    %117 = vector.load %arg3[%c0_36, %c0_37] : memref<256x512xbf16, #tpu.memory_space<vmem>>, vector<256x512xbf16>
    %cst_38 = arith.constant dense<0.000000e+00> : vector<1x512xf32>
    %118 = tpu.matmul %116, %117, %cst_38 {dimension_numbers = #tpu.dot_dimension_numbers<[1], [0], [0], [1], [0, 0, 1, 1], [], []>} : vector<1x256xbf16>, vector<256x512xbf16>, vector<1x512xf32> -> vector<1x512xf32>
    %c0_39 = arith.constant 0 : index
    %c0_40 = arith.constant 0 : index
    %119 = vector.load %arg6[%c0_39, %c0_40] : memref<1x512xf32, #tpu.memory_space<vmem>>, vector<1x512xf32>
    %120 = arith.addf %118, %119 : vector<1x512xf32>
    %121 = vector.extract_strided_slice %120 {offsets = [0, 0], sizes = [1, 384], strides = [1, 1]} : vector<1x512xf32> to vector<1x384xf32>
    %122 = arith.negf %121 : vector<1x384xf32>
    %123 = math.exp %122 : vector<1x384xf32>
    %cst_41 = arith.constant 1.000000e+00 : f32
    %124 = vector.broadcast %cst_41 : f32 to vector<1x384xf32>
    %125 = arith.addf %124, %123 : vector<1x384xf32>
    %126 = arith.divf %124, %125 : vector<1x384xf32>
    %127 = vector.extract_strided_slice %120 {offsets = [0, 384], sizes = [1, 128], strides = [1, 1]} : vector<1x512xf32> to vector<1x128xf32>
    %128 = math.tanh %127 : vector<1x128xf32>
    %129 = vector.extract_strided_slice %126 {offsets = [0, 0], sizes = [1, 128], strides = [1, 1]} : vector<1x384xf32> to vector<1x128xf32>
    %130 = vector.extract_strided_slice %126 {offsets = [0, 128], sizes = [1, 128], strides = [1, 1]} : vector<1x384xf32> to vector<1x128xf32>
    %131 = vector.extract_strided_slice %126 {offsets = [0, 256], sizes = [1, 128], strides = [1, 1]} : vector<1x384xf32> to vector<1x128xf32>
    %132 = arith.mulf %130, %90 : vector<1x128xf32>
    %133 = arith.mulf %129, %128 : vector<1x128xf32>
    %134 = arith.addf %132, %133 : vector<1x128xf32>
    %135 = math.tanh %134 : vector<1x128xf32>
    %136 = arith.mulf %131, %135 : vector<1x128xf32>
    %137 = tpu.concatenate %136, %114 in 1 : vector<1x128xf32>, vector<1x128xf32> -> vector<1x256xf32>
    %138 = arith.truncf %137 : vector<1x256xf32> to vector<1x256xbf16>
    %c0_42 = arith.constant 0 : index
    %c0_43 = arith.constant 0 : index
    %139 = vector.load %arg5[%c0_42, %c0_43] : memref<1x512xf32, #tpu.memory_space<vmem>>, vector<1x512xf32>
    %c0_44 = arith.constant 0 : index
    %c0_45 = arith.constant 0 : index
    %140 = vector.load %arg2[%c0_44, %c0_45] : memref<256x512xbf16, #tpu.memory_space<vmem>>, vector<256x512xbf16>
    %cst_46 = arith.constant dense<0.000000e+00> : vector<1x512xf32>
    %141 = tpu.matmul %138, %140, %cst_46 {dimension_numbers = #tpu.dot_dimension_numbers<[1], [0], [0], [1], [0, 0, 1, 1], [], []>} : vector<1x256xbf16>, vector<256x512xbf16>, vector<1x512xf32> -> vector<1x512xf32>
    %142 = arith.addf %141, %139 : vector<1x512xf32>
    %143 = vector.extract_strided_slice %142 {offsets = [0, 0], sizes = [1, 384], strides = [1, 1]} : vector<1x512xf32> to vector<1x384xf32>
    %144 = arith.negf %143 : vector<1x384xf32>
    %145 = math.exp %144 : vector<1x384xf32>
    %cst_47 = arith.constant 1.000000e+00 : f32
    %146 = vector.broadcast %cst_47 : f32 to vector<1x384xf32>
    %147 = arith.addf %146, %145 : vector<1x384xf32>
    %148 = arith.divf %146, %147 : vector<1x384xf32>
    %149 = vector.extract_strided_slice %142 {offsets = [0, 384], sizes = [1, 128], strides = [1, 1]} : vector<1x512xf32> to vector<1x128xf32>
    %150 = math.tanh %149 : vector<1x128xf32>
    %151 = vector.extract_strided_slice %148 {offsets = [0, 0], sizes = [1, 128], strides = [1, 1]} : vector<1x384xf32> to vector<1x128xf32>
    %152 = vector.extract_strided_slice %148 {offsets = [0, 128], sizes = [1, 128], strides = [1, 1]} : vector<1x384xf32> to vector<1x128xf32>
    %153 = vector.extract_strided_slice %148 {offsets = [0, 256], sizes = [1, 128], strides = [1, 1]} : vector<1x384xf32> to vector<1x128xf32>
    %154 = arith.mulf %152, %112 : vector<1x128xf32>
    %155 = arith.mulf %151, %150 : vector<1x128xf32>
    %156 = arith.addf %154, %155 : vector<1x128xf32>
    %157 = math.tanh %156 : vector<1x128xf32>
    %158 = arith.mulf %153, %157 : vector<1x128xf32>
    %159 = tpu.concatenate %158, %136 in 1 : vector<1x128xf32>, vector<1x128xf32> -> vector<1x256xf32>
    %160 = arith.truncf %159 : vector<1x256xf32> to vector<1x256xbf16>
    %c0_48 = arith.constant 0 : index
    %c0_49 = arith.constant 0 : index
    %161 = vector.load %arg3[%c0_48, %c0_49] : memref<256x512xbf16, #tpu.memory_space<vmem>>, vector<256x512xbf16>
    %cst_50 = arith.constant dense<0.000000e+00> : vector<1x512xf32>
    %162 = tpu.matmul %160, %161, %cst_50 {dimension_numbers = #tpu.dot_dimension_numbers<[1], [0], [0], [1], [0, 0, 1, 1], [], []>} : vector<1x256xbf16>, vector<256x512xbf16>, vector<1x512xf32> -> vector<1x512xf32>
    %c0_51 = arith.constant 0 : index
    %c0_52 = arith.constant 0 : index
    %163 = vector.load %arg6[%c0_51, %c0_52] : memref<1x512xf32, #tpu.memory_space<vmem>>, vector<1x512xf32>
    %164 = arith.addf %162, %163 : vector<1x512xf32>
    %165 = vector.extract_strided_slice %164 {offsets = [0, 0], sizes = [1, 384], strides = [1, 1]} : vector<1x512xf32> to vector<1x384xf32>
    %166 = arith.negf %165 : vector<1x384xf32>
    %167 = math.exp %166 : vector<1x384xf32>
    %cst_53 = arith.constant 1.000000e+00 : f32
    %168 = vector.broadcast %cst_53 : f32 to vector<1x384xf32>
    %169 = arith.addf %168, %167 : vector<1x384xf32>
    %170 = arith.divf %168, %169 : vector<1x384xf32>
    %171 = vector.extract_strided_slice %164 {offsets = [0, 384], sizes = [1, 128], strides = [1, 1]} : vector<1x512xf32> to vector<1x128xf32>
    %172 = math.tanh %171 : vector<1x128xf32>
    %173 = vector.extract_strided_slice %170 {offsets = [0, 0], sizes = [1, 128], strides = [1, 1]} : vector<1x384xf32> to vector<1x128xf32>
    %174 = vector.extract_strided_slice %170 {offsets = [0, 128], sizes = [1, 128], strides = [1, 1]} : vector<1x384xf32> to vector<1x128xf32>
    %175 = vector.extract_strided_slice %170 {offsets = [0, 256], sizes = [1, 128], strides = [1, 1]} : vector<1x384xf32> to vector<1x128xf32>
    %176 = arith.mulf %174, %134 : vector<1x128xf32>
    %177 = arith.mulf %173, %172 : vector<1x128xf32>
    %178 = arith.addf %176, %177 : vector<1x128xf32>
    %179 = math.tanh %178 : vector<1x128xf32>
    %180 = arith.mulf %175, %179 : vector<1x128xf32>
    %181 = tpu.concatenate %180, %158 in 1 : vector<1x128xf32>, vector<1x128xf32> -> vector<1x256xf32>
    %182 = arith.truncf %181 : vector<1x256xf32> to vector<1x256xbf16>
    %c0_54 = arith.constant 0 : index
    %c0_55 = arith.constant 0 : index
    %183 = vector.load %arg5[%c0_54, %c0_55] : memref<1x512xf32, #tpu.memory_space<vmem>>, vector<1x512xf32>
    %c0_56 = arith.constant 0 : index
    %c0_57 = arith.constant 0 : index
    %184 = vector.load %arg2[%c0_56, %c0_57] : memref<256x512xbf16, #tpu.memory_space<vmem>>, vector<256x512xbf16>
    %cst_58 = arith.constant dense<0.000000e+00> : vector<1x512xf32>
    %185 = tpu.matmul %182, %184, %cst_58 {dimension_numbers = #tpu.dot_dimension_numbers<[1], [0], [0], [1], [0, 0, 1, 1], [], []>} : vector<1x256xbf16>, vector<256x512xbf16>, vector<1x512xf32> -> vector<1x512xf32>
    %186 = arith.addf %185, %183 : vector<1x512xf32>
    %187 = vector.extract_strided_slice %186 {offsets = [0, 0], sizes = [1, 384], strides = [1, 1]} : vector<1x512xf32> to vector<1x384xf32>
    %188 = arith.negf %187 : vector<1x384xf32>
    %189 = math.exp %188 : vector<1x384xf32>
    %cst_59 = arith.constant 1.000000e+00 : f32
    %190 = vector.broadcast %cst_59 : f32 to vector<1x384xf32>
    %191 = arith.addf %190, %189 : vector<1x384xf32>
    %192 = arith.divf %190, %191 : vector<1x384xf32>
    %193 = vector.extract_strided_slice %186 {offsets = [0, 384], sizes = [1, 128], strides = [1, 1]} : vector<1x512xf32> to vector<1x128xf32>
    %194 = math.tanh %193 : vector<1x128xf32>
    %195 = vector.extract_strided_slice %192 {offsets = [0, 0], sizes = [1, 128], strides = [1, 1]} : vector<1x384xf32> to vector<1x128xf32>
    %196 = vector.extract_strided_slice %192 {offsets = [0, 128], sizes = [1, 128], strides = [1, 1]} : vector<1x384xf32> to vector<1x128xf32>
    %197 = vector.extract_strided_slice %192 {offsets = [0, 256], sizes = [1, 128], strides = [1, 1]} : vector<1x384xf32> to vector<1x128xf32>
    %198 = arith.mulf %196, %156 : vector<1x128xf32>
    %199 = arith.mulf %195, %194 : vector<1x128xf32>
    %200 = arith.addf %198, %199 : vector<1x128xf32>
    %201 = math.tanh %200 : vector<1x128xf32>
    %202 = arith.mulf %197, %201 : vector<1x128xf32>
    %203 = tpu.concatenate %202, %180 in 1 : vector<1x128xf32>, vector<1x128xf32> -> vector<1x256xf32>
    %204 = arith.truncf %203 : vector<1x256xf32> to vector<1x256xbf16>
    %c0_60 = arith.constant 0 : index
    %c0_61 = arith.constant 0 : index
    %205 = vector.load %arg3[%c0_60, %c0_61] : memref<256x512xbf16, #tpu.memory_space<vmem>>, vector<256x512xbf16>
    %cst_62 = arith.constant dense<0.000000e+00> : vector<1x512xf32>
    %206 = tpu.matmul %204, %205, %cst_62 {dimension_numbers = #tpu.dot_dimension_numbers<[1], [0], [0], [1], [0, 0, 1, 1], [], []>} : vector<1x256xbf16>, vector<256x512xbf16>, vector<1x512xf32> -> vector<1x512xf32>
    %c0_63 = arith.constant 0 : index
    %c0_64 = arith.constant 0 : index
    %207 = vector.load %arg6[%c0_63, %c0_64] : memref<1x512xf32, #tpu.memory_space<vmem>>, vector<1x512xf32>
    %208 = arith.addf %206, %207 : vector<1x512xf32>
    %209 = vector.extract_strided_slice %208 {offsets = [0, 0], sizes = [1, 384], strides = [1, 1]} : vector<1x512xf32> to vector<1x384xf32>
    %210 = arith.negf %209 : vector<1x384xf32>
    %211 = math.exp %210 : vector<1x384xf32>
    %cst_65 = arith.constant 1.000000e+00 : f32
    %212 = vector.broadcast %cst_65 : f32 to vector<1x384xf32>
    %213 = arith.addf %212, %211 : vector<1x384xf32>
    %214 = arith.divf %212, %213 : vector<1x384xf32>
    %215 = vector.extract_strided_slice %208 {offsets = [0, 384], sizes = [1, 128], strides = [1, 1]} : vector<1x512xf32> to vector<1x128xf32>
    %216 = math.tanh %215 : vector<1x128xf32>
    %217 = vector.extract_strided_slice %214 {offsets = [0, 0], sizes = [1, 128], strides = [1, 1]} : vector<1x384xf32> to vector<1x128xf32>
    %218 = vector.extract_strided_slice %214 {offsets = [0, 128], sizes = [1, 128], strides = [1, 1]} : vector<1x384xf32> to vector<1x128xf32>
    %219 = vector.extract_strided_slice %214 {offsets = [0, 256], sizes = [1, 128], strides = [1, 1]} : vector<1x384xf32> to vector<1x128xf32>
    %220 = arith.mulf %218, %178 : vector<1x128xf32>
    %221 = arith.mulf %217, %216 : vector<1x128xf32>
    %222 = arith.addf %220, %221 : vector<1x128xf32>
    %223 = math.tanh %222 : vector<1x128xf32>
    %224 = arith.mulf %219, %223 : vector<1x128xf32>
    %225 = tpu.concatenate %224, %202 in 1 : vector<1x128xf32>, vector<1x128xf32> -> vector<1x256xf32>
    %226 = arith.truncf %225 : vector<1x256xf32> to vector<1x256xbf16>
    %c0_66 = arith.constant 0 : index
    %c0_67 = arith.constant 0 : index
    %227 = vector.load %arg5[%c0_66, %c0_67] : memref<1x512xf32, #tpu.memory_space<vmem>>, vector<1x512xf32>
    %c0_68 = arith.constant 0 : index
    %c0_69 = arith.constant 0 : index
    %228 = vector.load %arg2[%c0_68, %c0_69] : memref<256x512xbf16, #tpu.memory_space<vmem>>, vector<256x512xbf16>
    %cst_70 = arith.constant dense<0.000000e+00> : vector<1x512xf32>
    %229 = tpu.matmul %226, %228, %cst_70 {dimension_numbers = #tpu.dot_dimension_numbers<[1], [0], [0], [1], [0, 0, 1, 1], [], []>} : vector<1x256xbf16>, vector<256x512xbf16>, vector<1x512xf32> -> vector<1x512xf32>
    %230 = arith.addf %229, %227 : vector<1x512xf32>
    %231 = vector.extract_strided_slice %230 {offsets = [0, 0], sizes = [1, 384], strides = [1, 1]} : vector<1x512xf32> to vector<1x384xf32>
    %232 = arith.negf %231 : vector<1x384xf32>
    %233 = math.exp %232 : vector<1x384xf32>
    %cst_71 = arith.constant 1.000000e+00 : f32
    %234 = vector.broadcast %cst_71 : f32 to vector<1x384xf32>
    %235 = arith.addf %234, %233 : vector<1x384xf32>
    %236 = arith.divf %234, %235 : vector<1x384xf32>
    %237 = vector.extract_strided_slice %230 {offsets = [0, 384], sizes = [1, 128], strides = [1, 1]} : vector<1x512xf32> to vector<1x128xf32>
    %238 = math.tanh %237 : vector<1x128xf32>
    %239 = vector.extract_strided_slice %236 {offsets = [0, 0], sizes = [1, 128], strides = [1, 1]} : vector<1x384xf32> to vector<1x128xf32>
    %240 = vector.extract_strided_slice %236 {offsets = [0, 128], sizes = [1, 128], strides = [1, 1]} : vector<1x384xf32> to vector<1x128xf32>
    %241 = vector.extract_strided_slice %236 {offsets = [0, 256], sizes = [1, 128], strides = [1, 1]} : vector<1x384xf32> to vector<1x128xf32>
    %242 = arith.mulf %240, %200 : vector<1x128xf32>
    %243 = arith.mulf %239, %238 : vector<1x128xf32>
    %244 = arith.addf %242, %243 : vector<1x128xf32>
    %245 = math.tanh %244 : vector<1x128xf32>
    %246 = arith.mulf %241, %245 : vector<1x128xf32>
    %247 = tpu.concatenate %246, %224 in 1 : vector<1x128xf32>, vector<1x128xf32> -> vector<1x256xf32>
    %248 = arith.truncf %247 : vector<1x256xf32> to vector<1x256xbf16>
    %c0_72 = arith.constant 0 : index
    %c0_73 = arith.constant 0 : index
    %249 = vector.load %arg3[%c0_72, %c0_73] : memref<256x512xbf16, #tpu.memory_space<vmem>>, vector<256x512xbf16>
    %cst_74 = arith.constant dense<0.000000e+00> : vector<1x512xf32>
    %250 = tpu.matmul %248, %249, %cst_74 {dimension_numbers = #tpu.dot_dimension_numbers<[1], [0], [0], [1], [0, 0, 1, 1], [], []>} : vector<1x256xbf16>, vector<256x512xbf16>, vector<1x512xf32> -> vector<1x512xf32>
    %c0_75 = arith.constant 0 : index
    %c0_76 = arith.constant 0 : index
    %251 = vector.load %arg6[%c0_75, %c0_76] : memref<1x512xf32, #tpu.memory_space<vmem>>, vector<1x512xf32>
    %252 = arith.addf %250, %251 : vector<1x512xf32>
    %253 = vector.extract_strided_slice %252 {offsets = [0, 0], sizes = [1, 384], strides = [1, 1]} : vector<1x512xf32> to vector<1x384xf32>
    %254 = arith.negf %253 : vector<1x384xf32>
    %255 = math.exp %254 : vector<1x384xf32>
    %cst_77 = arith.constant 1.000000e+00 : f32
    %256 = vector.broadcast %cst_77 : f32 to vector<1x384xf32>
    %257 = arith.addf %256, %255 : vector<1x384xf32>
    %258 = arith.divf %256, %257 : vector<1x384xf32>
    %259 = vector.extract_strided_slice %252 {offsets = [0, 384], sizes = [1, 128], strides = [1, 1]} : vector<1x512xf32> to vector<1x128xf32>
    %260 = math.tanh %259 : vector<1x128xf32>
    %261 = vector.extract_strided_slice %258 {offsets = [0, 0], sizes = [1, 128], strides = [1, 1]} : vector<1x384xf32> to vector<1x128xf32>
    %262 = vector.extract_strided_slice %258 {offsets = [0, 128], sizes = [1, 128], strides = [1, 1]} : vector<1x384xf32> to vector<1x128xf32>
    %263 = vector.extract_strided_slice %258 {offsets = [0, 256], sizes = [1, 128], strides = [1, 1]} : vector<1x384xf32> to vector<1x128xf32>
    %264 = arith.mulf %262, %222 : vector<1x128xf32>
    %265 = arith.mulf %261, %260 : vector<1x128xf32>
    %266 = arith.addf %264, %265 : vector<1x128xf32>
    %267 = math.tanh %266 : vector<1x128xf32>
    %268 = arith.mulf %263, %267 : vector<1x128xf32>
    %269 = tpu.concatenate %268, %246 in 1 : vector<1x128xf32>, vector<1x128xf32> -> vector<1x256xf32>
    %270 = arith.truncf %269 : vector<1x256xf32> to vector<1x256xbf16>
    %c0_78 = arith.constant 0 : index
    %c0_79 = arith.constant 0 : index
    %271 = vector.load %arg5[%c0_78, %c0_79] : memref<1x512xf32, #tpu.memory_space<vmem>>, vector<1x512xf32>
    %c0_80 = arith.constant 0 : index
    %c0_81 = arith.constant 0 : index
    %272 = vector.load %arg2[%c0_80, %c0_81] : memref<256x512xbf16, #tpu.memory_space<vmem>>, vector<256x512xbf16>
    %cst_82 = arith.constant dense<0.000000e+00> : vector<1x512xf32>
    %273 = tpu.matmul %270, %272, %cst_82 {dimension_numbers = #tpu.dot_dimension_numbers<[1], [0], [0], [1], [0, 0, 1, 1], [], []>} : vector<1x256xbf16>, vector<256x512xbf16>, vector<1x512xf32> -> vector<1x512xf32>
    %274 = arith.addf %273, %271 : vector<1x512xf32>
    %275 = vector.extract_strided_slice %274 {offsets = [0, 0], sizes = [1, 384], strides = [1, 1]} : vector<1x512xf32> to vector<1x384xf32>
    %276 = arith.negf %275 : vector<1x384xf32>
    %277 = math.exp %276 : vector<1x384xf32>
    %cst_83 = arith.constant 1.000000e+00 : f32
    %278 = vector.broadcast %cst_83 : f32 to vector<1x384xf32>
    %279 = arith.addf %278, %277 : vector<1x384xf32>
    %280 = arith.divf %278, %279 : vector<1x384xf32>
    %281 = vector.extract_strided_slice %274 {offsets = [0, 384], sizes = [1, 128], strides = [1, 1]} : vector<1x512xf32> to vector<1x128xf32>
    %282 = math.tanh %281 : vector<1x128xf32>
    %283 = vector.extract_strided_slice %280 {offsets = [0, 0], sizes = [1, 128], strides = [1, 1]} : vector<1x384xf32> to vector<1x128xf32>
    %284 = vector.extract_strided_slice %280 {offsets = [0, 128], sizes = [1, 128], strides = [1, 1]} : vector<1x384xf32> to vector<1x128xf32>
    %285 = vector.extract_strided_slice %280 {offsets = [0, 256], sizes = [1, 128], strides = [1, 1]} : vector<1x384xf32> to vector<1x128xf32>
    %286 = arith.mulf %284, %244 : vector<1x128xf32>
    %287 = arith.mulf %283, %282 : vector<1x128xf32>
    %288 = arith.addf %286, %287 : vector<1x128xf32>
    %289 = math.tanh %288 : vector<1x128xf32>
    %290 = arith.mulf %285, %289 : vector<1x128xf32>
    %291 = tpu.concatenate %290, %268 in 1 : vector<1x128xf32>, vector<1x128xf32> -> vector<1x256xf32>
    %292 = arith.truncf %291 : vector<1x256xf32> to vector<1x256xbf16>
    %c0_84 = arith.constant 0 : index
    %c0_85 = arith.constant 0 : index
    %293 = vector.load %arg3[%c0_84, %c0_85] : memref<256x512xbf16, #tpu.memory_space<vmem>>, vector<256x512xbf16>
    %cst_86 = arith.constant dense<0.000000e+00> : vector<1x512xf32>
    %294 = tpu.matmul %292, %293, %cst_86 {dimension_numbers = #tpu.dot_dimension_numbers<[1], [0], [0], [1], [0, 0, 1, 1], [], []>} : vector<1x256xbf16>, vector<256x512xbf16>, vector<1x512xf32> -> vector<1x512xf32>
    %c0_87 = arith.constant 0 : index
    %c0_88 = arith.constant 0 : index
    %295 = vector.load %arg6[%c0_87, %c0_88] : memref<1x512xf32, #tpu.memory_space<vmem>>, vector<1x512xf32>
    %296 = arith.addf %294, %295 : vector<1x512xf32>
    %297 = vector.extract_strided_slice %296 {offsets = [0, 0], sizes = [1, 384], strides = [1, 1]} : vector<1x512xf32> to vector<1x384xf32>
    %298 = arith.negf %297 : vector<1x384xf32>
    %299 = math.exp %298 : vector<1x384xf32>
    %cst_89 = arith.constant 1.000000e+00 : f32
    %300 = vector.broadcast %cst_89 : f32 to vector<1x384xf32>
    %301 = arith.addf %300, %299 : vector<1x384xf32>
    %302 = arith.divf %300, %301 : vector<1x384xf32>
    %303 = vector.extract_strided_slice %296 {offsets = [0, 384], sizes = [1, 128], strides = [1, 1]} : vector<1x512xf32> to vector<1x128xf32>
    %304 = math.tanh %303 : vector<1x128xf32>
    %305 = vector.extract_strided_slice %302 {offsets = [0, 0], sizes = [1, 128], strides = [1, 1]} : vector<1x384xf32> to vector<1x128xf32>
    %306 = vector.extract_strided_slice %302 {offsets = [0, 128], sizes = [1, 128], strides = [1, 1]} : vector<1x384xf32> to vector<1x128xf32>
    %307 = vector.extract_strided_slice %302 {offsets = [0, 256], sizes = [1, 128], strides = [1, 1]} : vector<1x384xf32> to vector<1x128xf32>
    %308 = arith.mulf %306, %266 : vector<1x128xf32>
    %309 = arith.mulf %305, %304 : vector<1x128xf32>
    %310 = arith.addf %308, %309 : vector<1x128xf32>
    %311 = math.tanh %310 : vector<1x128xf32>
    %312 = arith.mulf %307, %311 : vector<1x128xf32>
    %313 = tpu.concatenate %312, %290 in 1 : vector<1x128xf32>, vector<1x128xf32> -> vector<1x256xf32>
    %314 = arith.truncf %313 : vector<1x256xf32> to vector<1x256xbf16>
    %c0_90 = arith.constant 0 : index
    %c0_91 = arith.constant 0 : index
    %315 = vector.load %arg5[%c0_90, %c0_91] : memref<1x512xf32, #tpu.memory_space<vmem>>, vector<1x512xf32>
    %c0_92 = arith.constant 0 : index
    %c0_93 = arith.constant 0 : index
    %316 = vector.load %arg2[%c0_92, %c0_93] : memref<256x512xbf16, #tpu.memory_space<vmem>>, vector<256x512xbf16>
    %cst_94 = arith.constant dense<0.000000e+00> : vector<1x512xf32>
    %317 = tpu.matmul %314, %316, %cst_94 {dimension_numbers = #tpu.dot_dimension_numbers<[1], [0], [0], [1], [0, 0, 1, 1], [], []>} : vector<1x256xbf16>, vector<256x512xbf16>, vector<1x512xf32> -> vector<1x512xf32>
    %318 = arith.addf %317, %315 : vector<1x512xf32>
    %319 = vector.extract_strided_slice %318 {offsets = [0, 0], sizes = [1, 384], strides = [1, 1]} : vector<1x512xf32> to vector<1x384xf32>
    %320 = arith.negf %319 : vector<1x384xf32>
    %321 = math.exp %320 : vector<1x384xf32>
    %cst_95 = arith.constant 1.000000e+00 : f32
    %322 = vector.broadcast %cst_95 : f32 to vector<1x384xf32>
    %323 = arith.addf %322, %321 : vector<1x384xf32>
    %324 = arith.divf %322, %323 : vector<1x384xf32>
    %325 = vector.extract_strided_slice %318 {offsets = [0, 384], sizes = [1, 128], strides = [1, 1]} : vector<1x512xf32> to vector<1x128xf32>
    %326 = math.tanh %325 : vector<1x128xf32>
    %327 = vector.extract_strided_slice %324 {offsets = [0, 0], sizes = [1, 128], strides = [1, 1]} : vector<1x384xf32> to vector<1x128xf32>
    %328 = vector.extract_strided_slice %324 {offsets = [0, 128], sizes = [1, 128], strides = [1, 1]} : vector<1x384xf32> to vector<1x128xf32>
    %329 = vector.extract_strided_slice %324 {offsets = [0, 256], sizes = [1, 128], strides = [1, 1]} : vector<1x384xf32> to vector<1x128xf32>
    %330 = arith.mulf %328, %288 : vector<1x128xf32>
    %331 = arith.mulf %327, %326 : vector<1x128xf32>
    %332 = arith.addf %330, %331 : vector<1x128xf32>
    %333 = math.tanh %332 : vector<1x128xf32>
    %334 = arith.mulf %329, %333 : vector<1x128xf32>
    %335 = tpu.concatenate %334, %312 in 1 : vector<1x128xf32>, vector<1x128xf32> -> vector<1x256xf32>
    %336 = arith.truncf %335 : vector<1x256xf32> to vector<1x256xbf16>
    %c0_96 = arith.constant 0 : index
    %c0_97 = arith.constant 0 : index
    %337 = vector.load %arg3[%c0_96, %c0_97] : memref<256x512xbf16, #tpu.memory_space<vmem>>, vector<256x512xbf16>
    %cst_98 = arith.constant dense<0.000000e+00> : vector<1x512xf32>
    %338 = tpu.matmul %336, %337, %cst_98 {dimension_numbers = #tpu.dot_dimension_numbers<[1], [0], [0], [1], [0, 0, 1, 1], [], []>} : vector<1x256xbf16>, vector<256x512xbf16>, vector<1x512xf32> -> vector<1x512xf32>
    %c0_99 = arith.constant 0 : index
    %c0_100 = arith.constant 0 : index
    %339 = vector.load %arg6[%c0_99, %c0_100] : memref<1x512xf32, #tpu.memory_space<vmem>>, vector<1x512xf32>
    %340 = arith.addf %338, %339 : vector<1x512xf32>
    %341 = vector.extract_strided_slice %340 {offsets = [0, 0], sizes = [1, 384], strides = [1, 1]} : vector<1x512xf32> to vector<1x384xf32>
    %342 = arith.negf %341 : vector<1x384xf32>
    %343 = math.exp %342 : vector<1x384xf32>
    %cst_101 = arith.constant 1.000000e+00 : f32
    %344 = vector.broadcast %cst_101 : f32 to vector<1x384xf32>
    %345 = arith.addf %344, %343 : vector<1x384xf32>
    %346 = arith.divf %344, %345 : vector<1x384xf32>
    %347 = vector.extract_strided_slice %340 {offsets = [0, 384], sizes = [1, 128], strides = [1, 1]} : vector<1x512xf32> to vector<1x128xf32>
    %348 = math.tanh %347 : vector<1x128xf32>
    %349 = vector.extract_strided_slice %346 {offsets = [0, 0], sizes = [1, 128], strides = [1, 1]} : vector<1x384xf32> to vector<1x128xf32>
    %350 = vector.extract_strided_slice %346 {offsets = [0, 128], sizes = [1, 128], strides = [1, 1]} : vector<1x384xf32> to vector<1x128xf32>
    %351 = vector.extract_strided_slice %346 {offsets = [0, 256], sizes = [1, 128], strides = [1, 1]} : vector<1x384xf32> to vector<1x128xf32>
    %352 = arith.mulf %350, %310 : vector<1x128xf32>
    %353 = arith.mulf %349, %348 : vector<1x128xf32>
    %354 = arith.addf %352, %353 : vector<1x128xf32>
    %355 = math.tanh %354 : vector<1x128xf32>
    %356 = arith.mulf %351, %355 : vector<1x128xf32>
    %357 = tpu.concatenate %48, %92, %136, %180, %224, %268, %312, %356 in 0 : vector<1x128xf32>, vector<1x128xf32>, vector<1x128xf32>, vector<1x128xf32>, vector<1x128xf32>, vector<1x128xf32>, vector<1x128xf32>, vector<1x128xf32> -> vector<8x128xf32>
    %c0_102 = arith.constant 0 : index
    %c0_103 = arith.constant 0 : index
    %358 = vector.load %arg7[%c0_102, %c0_103] : memref<8x128xf32, #tpu.memory_space<vmem>>, vector<8x128xf32>
    tpu.vector_store %arg7[%c0_102, %c0_103], %357 {strides = array<i32>} : memref<8x128xf32, #tpu.memory_space<vmem>>, vector<8x128xf32>,
    return
  }
}

</mosaic_0001>

<bundles_post_ra>
// kernel: tpu_custom_call.1
= control target key start
LH: loop header
LB: loop body
LE: loop exit
PB: predicated region body
PF: predicated region fallthrough
CT: control target
= control target key end

     0   :  { %12 = vsyncpa [#allocation3], 0  ;;  %s5736_s0 = inlined_call_operand.hbm [shape: f32[2,128], index: 0, kind: input, shape index: {}]   ;;  %s5737_s1 = inlined_call_operand.vmem [shape: f32[2,128], index: 1, kind: input, shape index: {}]   ;;  %s5738_s2 = inlined_call_operand.hbm [shape: bf16[256,512], index: 2, kind: input, shape index: {}]   ;;  %s5739_s3 = inlined_call_operand.hbm [shape: bf16[256,512], index: 3, kind: input, shape index: {}]   ;;  %s5740_s4 = inlined_call_operand.vmem [shape: f32[1,512], index: 4, kind: input, shape index: {}]   ;;  %s5741_s5 = inlined_call_operand.vmem [shape: f32[1,512], index: 5, kind: input, shape index: {}]   ;;  %s5742_s6 = inlined_call_operand.vmem [shape: f32[1,512], index: 6, kind: input, shape index: {}]   ;;  %s5743_s7 = inlined_call_operand.hbm [shape: f32[8,128], index: 7, kind: output, shape index: {}]  }
   0x1   :  { %13 = vsyncpa [#allocation6], 0 }
   0x2   :  { %14 = vsyncpa [#allocation4], 0  ;;  %s3651_s24 = smov [#allocation5]   ;;  %s3557_s28 = scalar_lea.hbm %s5738_s2, 8192 }
   0x3   :  { %s32_s25 = sshll.u32 %s3651_s24, 4  ;;  %p3558_p0 = scmp.ne.s32.totalorder %s5738_s2, %s3557_s28  ;;  %s33_s25 = int_to_ptr.vmem [resolvable:$true] %s32_s25 }
   0x4   :  { %p3561_p1 = scmp.lt.u32.totalorder %s3557_s28, %s5738_s2 }
   0x6   :  { %p3563_p2 = pnand %p3561_p1, %p3558_p0 }
   0x8   :  { %3566 = shalt.err (!%p3563_p2)
}
   0x9   :  { %s3567_s10 = scalar_lea.vmem %s33_s25, 8192  ;;  %p3572_p4 = scmp.lt.s32.totalorder %s33_s25, %s33_s25 }
   0xa   :  { %p3568_p3 = scmp.ne.s32.totalorder %s33_s25, %s3567_s10  ;;  %p3573_p5 = scmp.lt.s32.totalorder %s3567_s10, %s3567_s10 }
   0xc   :  { %p3574_p6 = por %p3573_p5, %p3572_p4 }
   0xe   :  { %p3575_p7 = pnand %p3574_p6, %p3568_p3 }
  0x10   :  { %3578 = shalt.err (!%p3575_p7)
}
  0x11   :  { %s3652_s11 = smov 256   ;;  %s3653_s12 = smov 16  }
  0x12   :  { %38 = dma.hbm_to_vmem [thread:$0]  %s5738_s2, 8192, %s33_s25, [#allocation6], %s3652_s11, %s3652_s11, %s3653_s12  }
  0x13   :  { %s3654_s15 = smov [#allocation2]   ;;  %s3655_s17 = smov [#allocation7]  }
  0x14   :  { %s21_s16 = sshll.u32 %s3654_s15, 4  ;;  %s44_s18 = sshll.u32 %s3655_s17, 4  ;;  %s22_s16 = int_to_ptr.vmem [resolvable:$true] %s21_s16  ;;  %s45_s18 = int_to_ptr.vmem [resolvable:$true] %s44_s18 }
  0x15   :  { %s3579_s21 = scalar_lea.hbm %s5736_s0, 32 }
  0x16   :  { %p3580_p8 = scmp.ne.s32.totalorder %s5736_s0, %s3579_s21  ;;  %p3583_p9 = scmp.lt.u32.totalorder %s3579_s21, %s5736_s0 }
  0x18   :  { %p3585_p10 = pnand %p3583_p9, %p3580_p8 }
  0x1a   :  { %3588 = shalt.err (!%p3585_p10)
}
  0x1b   :  { %s3589_s2 = scalar_lea.vmem %s22_s16, 32  ;;  %p3594_p12 = scmp.lt.s32.totalorder %s22_s16, %s22_s16 }
  0x1c   :  { %p3590_p11 = scmp.ne.s32.totalorder %s22_s16, %s3589_s2  ;;  %p3595_p13 = scmp.lt.s32.totalorder %s3589_s2, %s3589_s2 }
  0x1e   :  { %p3596_p0 = por %p3595_p13, %p3594_p12 }
  0x20   :  { %p3597_p1 = pnand %p3596_p0, %p3590_p11 }
  0x22   :  { %3600 = shalt.err (!%p3597_p1)
}
  0x23   :  { %24 = dma.hbm_to_vmem [thread:$0]  %s5736_s0, 32, %s22_s16, [#allocation3]  }
  0x24   :  { %s3601_s30 = scalar_lea.hbm %s5739_s3, 8192 }
  0x25   :  { %p3602_p2 = scmp.ne.s32.totalorder %s5739_s3, %s3601_s30  ;;  %p3605_p3 = scmp.lt.u32.totalorder %s3601_s30, %s5739_s3 }
  0x27   :  { %p3607_p4 = pnand %p3605_p3, %p3602_p2 }
  0x29   :  { %3610 = shalt.err (!%p3607_p4)
}
  0x2a   :  { %s3611_s14 = scalar_lea.vmem %s45_s18, 8192  ;;  %p3616_p6 = scmp.lt.s32.totalorder %s45_s18, %s45_s18 }
  0x2b   :  { %p3612_p5 = scmp.ne.s32.totalorder %s45_s18, %s3611_s14  ;;  %p3617_p7 = scmp.lt.s32.totalorder %s3611_s14, %s3611_s14 }
  0x2d   :  { %p3618_p8 = por %p3617_p7, %p3616_p6 }
  0x2f   :  { %p3619_p9 = pnand %p3618_p8, %p3612_p5 }
  0x31   :  { %3622 = shalt.err (!%p3619_p9)
}
  0x32   :  { %50 = dma.hbm_to_vmem [thread:$0]  %s5739_s3, 8192, %s45_s18, [#allocation6], %s3652_s11, %s3652_s11, %s3653_s12  }
  0x33   :  { %3645 = dma.done.wait [#allocation3], 32  }
  0x34   :  { %3646 = vsyncadd [#allocation3], 4294967264 }
  0x35   :  { %3647 = dma.done.wait [#allocation6], 16384  }
  0x36   :  { %3648 = vsyncadd [#allocation6], 4294950912  ;;  %v3740_v0 = vld [vmem:[#allocation5 + $0x4] ss:$16 sps:$4 sm:$0xff]   ;;  %v3742_v1 = vld [vmem:[#allocation5] ss:$16 sps:$4 sm:$0xff]  }
  0x37   :  { %478 = vmatprep.subr.bf16.mxu0 %v3740_v0  ;;  %v3745_v2 = vld [vmem:[#allocation5 + $0x24] ss:$16 sps:$4 sm:$0xff]   ;;  %v3748_v3 = vld [vmem:[#allocation5 + $0x20] ss:$16 sps:$4 sm:$0xff]   ;;  %v3753_v5 = vld [vmem:[#allocation5 + $0xc] ss:$16 sps:$4 sm:$0xff]  }
  0x38   :  { %479 = vmatpush1.bf16.msra.mxu0 %v3742_v1  ;;  %v3751_v4 = vld [vmem:[#allocation5 + $0x44] ss:$16 sps:$4 sm:$0xff]   ;;  %v3755_v6 = vld [vmem:[#allocation5 + $0x8] ss:$16 sps:$4 sm:$0xff]   ;;  %v3758_v7 = vld [vmem:[#allocation5 + $0x40] ss:$16 sps:$4 sm:$0xff]   ;;  %519 = vmatprep.subr.bf16.mxu1 %v3753_v5 }
  0x39   :  { %480 = vmatprep.subr.bf16.mxu0 %v3745_v2  ;;  %v3762_v8 = vld [vmem:[#allocation5 + $0x64] ss:$16 sps:$4 sm:$0xff]   ;;  %520 = vmatpush1.bf16.msra.mxu1 %v3755_v6  ;;  %v3765_v9 = vld [vmem:[#allocation5 + $0x2c] ss:$16 sps:$4 sm:$0xff]   ;;  %v3767_v10 = vld [vmem:[#allocation5 + $0x28] ss:$16 sps:$4 sm:$0xff]  }
  0x3a   :  { %521 = vmatprep.subr.bf16.mxu1 %v3765_v9  ;;  %v3771_v11 = vld [vmem:[#allocation5 + $0x60] ss:$16 sps:$4 sm:$0xff]   ;;  %v3773_v12 = vld [vmem:[#allocation5 + $0x84] ss:$16 sps:$4 sm:$0xff]   ;;  %v3775_v13 = vld [vmem:[#allocation5 + $0x4c] ss:$16 sps:$4 sm:$0xff]  }
  0x3b   :  { %v3779_v14 = vld [vmem:[#allocation5 + $0x48] ss:$16 sps:$4 sm:$0xff]   ;;  %v3782_v15 = vld [vmem:[#allocation5 + $0x6c] ss:$16 sps:$4 sm:$0xff]   ;;  %v3785_v16 = vld [vmem:[#allocation5 + $0x80] ss:$16 sps:$4 sm:$0xff]  }
  0x3c   :  { %481 = vmatpush1.bf16.msra.mxu0 %v3748_v3  ;;  %v3788_v17 = vld [vmem:[#allocation5 + $0xa4] ss:$16 sps:$4 sm:$0xff]   ;;  %v3791_v18 = vld [vmem:[#allocation5 + $0x68] ss:$16 sps:$4 sm:$0xff]   ;;  %v3794_v19 = vld [vmem:[#allocation5 + $0x8c] ss:$16 sps:$4 sm:$0xff]  }
  0x3d   :  { %482 = vmatprep.subr.bf16.mxu0 %v3751_v4  ;;  %522 = vmatpush1.bf16.msra.mxu1 %v3767_v10  ;;  %v3797_v20 = vld [vmem:[#allocation5 + $0xa0] ss:$16 sps:$4 sm:$0xff]   ;;  %v3799_v21 = vld [vmem:[#allocation5 + $0xc4] ss:$16 sps:$4 sm:$0xff]   ;;  %v3803_v22 = vld [vmem:[#allocation5 + $0x88] ss:$16 sps:$4 sm:$0xff]  }
  0x3e   :  { %523 = vmatprep.subr.bf16.mxu1 %v3775_v13  ;;  %v3806_v23 = vld [vmem:[#allocation5 + $0xac] ss:$16 sps:$4 sm:$0xff]   ;;  %v3809_v24 = vld [vmem:[#allocation5 + $0xc0] ss:$16 sps:$4 sm:$0xff]   ;;  %v3812_v25 = vld [vmem:[#allocation5 + $0xe4] ss:$16 sps:$4 sm:$0xff]  }
  0x3f   :  { %v3815_v26 = vld [vmem:[#allocation5 + $0xa8] ss:$16 sps:$4 sm:$0xff]   ;;  %v3818_v27 = vld [vmem:[#allocation5 + $0xcc] ss:$16 sps:$4 sm:$0xff]   ;;  %v3821_v28 = vld [vmem:[#allocation5 + $0xe0] ss:$16 sps:$4 sm:$0xff]  }
  0x40   :  { %483 = vmatpush1.bf16.msra.mxu0 %v3758_v7  ;;  %v3823_v29 = vld [vmem:[#allocation5 + $0x104] ss:$16 sps:$4 sm:$0xff]   ;;  %v3827_v30 = vld [vmem:[#allocation5 + $0xc8] ss:$16 sps:$4 sm:$0xff]   ;;  %v3830_v31 = vld [vmem:[#allocation5 + $0xec] ss:$16 sps:$4 sm:$0xff]  }
  0x41   :  { %484 = vmatprep.subr.bf16.mxu0 %v3762_v8  ;;  %524 = vmatpush1.bf16.msra.mxu1 %v3779_v14  ;;  %v3833_v32 = vld [vmem:[#allocation5 + $0x100] ss:$16 sps:$4 sm:$0xff]   ;;  %v3836_v33 = vld [vmem:[#allocation5 + $0x124] ss:$16 sps:$4 sm:$0xff]   ;;  %v3839_v34 = vld [vmem:[#allocation5 + $0xe8] ss:$16 sps:$4 sm:$0xff]  }
  0x42   :  { %525 = vmatprep.subr.bf16.mxu1 %v3782_v15  ;;  %v3842_v35 = vld [vmem:[#allocation5 + $0x10c] ss:$16 sps:$4 sm:$0xff]   ;;  %v3845_v36 = vld [vmem:[#allocation5 + $0x120] ss:$16 sps:$4 sm:$0xff]   ;;  %v3847_v37 = vld [vmem:[#allocation5 + $0x144] ss:$16 sps:$4 sm:$0xff]  }
  0x43   :  { %v3851_v38 = vld [vmem:[#allocation5 + $0x108] ss:$16 sps:$4 sm:$0xff]   ;;  %v3854_v39 = vld [vmem:[#allocation5 + $0x12c] ss:$16 sps:$4 sm:$0xff]   ;;  %v3856_v40 = vld [vmem:[#allocation5 + $0x140] ss:$16 sps:$4 sm:$0xff]  }
  0x44   :  { %485 = vmatpush1.bf16.msra.mxu0 %v3771_v11  ;;  %v66_v41 = vld [vmem:[#allocation2] sm:$0x1]  ;;  %v3859_v42 = vld [vmem:[#allocation5 + $0x164] ss:$16 sps:$4 sm:$0xff]   ;;  %v3863_v44 = vld [vmem:[#allocation5 + $0x128] ss:$16 sps:$4 sm:$0xff]  }
  0x45   :  { %486 = vmatprep.subr.bf16.mxu0 %v3773_v12  ;;  %526 = vmatpush1.bf16.msra.mxu1 %v3791_v18  ;;  %v71_v43 = vpack.c.bf16 %v66_v41, %v66_v41  ;;  %v3866_v45 = vld [vmem:[#allocation5 + $0x14c] ss:$16 sps:$4 sm:$0xff]   ;;  %v3868_v46 = vld [vmem:[#allocation5 + $0x160] ss:$16 sps:$4 sm:$0xff]   ;;  %v3871_v47 = vld [vmem:[#allocation5 + $0x184] ss:$16 sps:$4 sm:$0xff]  }
  0x46   :  { %527 = vmatprep.subr.bf16.mxu1 %v3794_v19  ;;  %6295 = vst [vmem:[#allocation12_spill] sm:$0xff] %v3868_v46  ;;  %6296 = vst [vmem:[#allocation13_spill] sm:$0xff] %v3871_v47  ;;  %v3875_v48 = vld [vmem:[#allocation5 + $0x148] ss:$16 sps:$4 sm:$0xff]   ;;  %v3878_v49 = vld [vmem:[#allocation5 + $0x16c] ss:$16 sps:$4 sm:$0xff]  }
  0x47   :  { %510 = vmatprep.mubr.bf16.mxu0 %v71_v43  ;;  %551 = vmatprep.mubr.bf16.mxu1 %v71_v43  ;;  %6297 = vst [vmem:[#allocation14_spill] sm:$0xff] %v3878_v49  ;;  %v3881_v50 = vld [vmem:[#allocation5 + $0x180] ss:$16 sps:$4 sm:$0xff]   ;;  %v3883_v51 = vld [vmem:[#allocation5 + $0x1a4] ss:$16 sps:$4 sm:$0xff]   ;;  %vm2639_vm0 = vcmask 1040384  }
  0x48   :  { %487 = vmatpush1.bf16.msra.mxu0 %v3785_v16  ;;  %6298 = vst [vmem:[#allocation15_spill] sm:$0xff] %v3881_v50  ;;  %6299 = vst [vmem:[#allocation16_spill] sm:$0xff] %v3883_v51  ;;  %v3887_v52 = vld [vmem:[#allocation5 + $0x168] ss:$16 sps:$4 sm:$0xff]   ;;  %v3890_v53 = vld [vmem:[#allocation5 + $0x18c] ss:$16 sps:$4 sm:$0xff]  }
  0x49   :  { %488 = vmatprep.subr.bf16.mxu0 %v3788_v17  ;;  %528 = vmatpush1.bf16.msra.mxu1 %v3803_v22  ;;  %6300 = vst [vmem:[#allocation17_spill] sm:$0xff] %v3887_v52  ;;  %6301 = vst [vmem:[#allocation18_spill] sm:$0xff] %v3890_v53  ;;  %v3892_v54 = vld [vmem:[#allocation5 + $0x1a0] ss:$16 sps:$4 sm:$0xff]   ;;  %v3895_v55 = vld [vmem:[#allocation5 + $0x1c4] ss:$16 sps:$4 sm:$0xff]  }
  0x4a   :  { %529 = vmatprep.subr.bf16.mxu1 %v3806_v23  ;;  %6302 = vst [vmem:[#allocation19_spill] sm:$0xff] %v3892_v54  ;;  %6303 = vst [vmem:[#allocation20_spill] sm:$0xff] %v3895_v55  ;;  %v3899_v56 = vld [vmem:[#allocation5 + $0x188] ss:$16 sps:$4 sm:$0xff]   ;;  %v3901_v57 = vld [vmem:[#allocation5 + $0x1c0] ss:$16 sps:$4 sm:$0xff]  }
  0x4b   :  { %6304 = vst [vmem:[#allocation21_spill] sm:$0xff] %v3899_v56  ;;  %6305 = vst [vmem:[#allocation22_spill] sm:$0xff] %v3901_v57  ;;  %v3904_v58 = vld [vmem:[#allocation5 + $0x1ac] ss:$16 sps:$4 sm:$0xff]   ;;  %v3906_v59 = vld [vmem:[#allocation5 + $0x1e4] ss:$16 sps:$4 sm:$0xff]  }
  0x4c   :  { %489 = vmatpush1.bf16.msra.mxu0 %v3797_v20  ;;  %6306 = vst [vmem:[#allocation23_spill] sm:$0xff] %v3904_v58  ;;  %6307 = vst [vmem:[#allocation24_spill] sm:$0xff] %v3906_v59  ;;  %v3908_v60 = vld [vmem:[#allocation5 + $0x1a8] ss:$16 sps:$4 sm:$0xff]   ;;  %v3911_v61 = vld [vmem:[#allocation5 + $0x1cc] ss:$16 sps:$4 sm:$0xff]  }
  0x4d   :  { %490 = vmatprep.subr.bf16.mxu0 %v3799_v21  ;;  %530 = vmatpush1.bf16.msra.mxu1 %v3815_v26  ;;  %6308 = vst [vmem:[#allocation25_spill] sm:$0xff] %v3908_v60  ;;  %6309 = vst [vmem:[#allocation26_spill] sm:$0xff] %v3911_v61  ;;  %v3915_v62 = vld [vmem:[#allocation5 + $0x1e0] ss:$16 sps:$4 sm:$0xff]   ;;  %v3918_v63 = vld [vmem:[#allocation5 + $0x1c8] ss:$16 sps:$4 sm:$0xff]  }
  0x4e   :  { %531 = vmatprep.subr.bf16.mxu1 %v3818_v27  ;;  %6310 = vst [vmem:[#allocation27_spill] sm:$0xff] %v3915_v62  ;;  %6311 = vst [vmem:[#allocation28_spill] sm:$0xff] %v3918_v63  ;;  %v3920_v41 = vld [vmem:[#allocation7 + $0x4] ss:$16 sps:$4 sm:$0xff]   ;;  %v3923_v43 = vld [vmem:[#allocation5 + $0x1ec] ss:$16 sps:$4 sm:$0xff]  }
  0x4f   :  { %6312 = vst [vmem:[#allocation29_spill] sm:$0xff] %v3920_v41  ;;  %6313 = vst [vmem:[#allocation30_spill] sm:$0xff] %v3923_v43  ;;  %vm2641_vm1 = vcmask 1041408   ;;  %vm2643_vm2 = vcmask 1042432   ;;  %vm2645_vm3 = vcmask 1043456   ;;  %vm2647_vm4 = vcmask 1044480  }
  0x50   :  { %491 = vmatpush1.bf16.msra.mxu0 %v3809_v24  ;;  %vm2649_vm5 = vcmask 1045504   ;;  %vm2651_vm6 = vcmask 1046528  }
  0x51   :  { %492 = vmatprep.subr.bf16.mxu0 %v3812_v25  ;;  %532 = vmatpush1.bf16.msra.mxu1 %v3827_v30 }
  0x52   :  { %533 = vmatprep.subr.bf16.mxu1 %v3830_v31 }
  0x54   :  { %493 = vmatpush1.bf16.msra.mxu0 %v3821_v28 }
  0x55   :  { %494 = vmatprep.subr.bf16.mxu0 %v3823_v29  ;;  %534 = vmatpush1.bf16.msra.mxu1 %v3839_v34 }
  0x56   :  { %535 = vmatprep.subr.bf16.mxu1 %v3842_v35 }
  0x58   :  { %495 = vmatpush1.bf16.msra.mxu0 %v3833_v32 }
  0x59   :  { %496 = vmatprep.subr.bf16.mxu0 %v3836_v33  ;;  %536 = vmatpush1.bf16.msra.mxu1 %v3851_v38 }
  0x5a   :  { %537 = vmatprep.subr.bf16.mxu1 %v3854_v39 }
  0x5c   :  { %497 = vmatpush1.bf16.msra.mxu0 %v3845_v36 }
  0x5d   :  { %498 = vmatprep.subr.bf16.mxu0 %v3847_v37  ;;  %538 = vmatpush1.bf16.msra.mxu1 %v3863_v44 }
  0x5e   :  { %539 = vmatprep.subr.bf16.mxu1 %v3866_v45 }
  0x60   :  { %499 = vmatpush1.bf16.msra.mxu0 %v3856_v40 }
  0x61   :  { %500 = vmatprep.subr.bf16.mxu0 %v3859_v42  ;;  %540 = vmatpush1.bf16.msra.mxu1 %v3875_v48 }
  0x62   :  { %541 = vmatprep.subr.bf16.mxu1 %v3878_v49 }
  0x64   :  { %501 = vmatpush1.bf16.msra.mxu0 %v3868_v46 }
  0x65   :  { %502 = vmatprep.subr.bf16.mxu0 %v3871_v47  ;;  %542 = vmatpush1.bf16.msra.mxu1 %v3887_v52 }
  0x66   :  { %543 = vmatprep.subr.bf16.mxu1 %v3890_v53 }
  0x68   :  { %503 = vmatpush1.bf16.msra.mxu0 %v3881_v50 }
  0x69   :  { %504 = vmatprep.subr.bf16.mxu0 %v3883_v51  ;;  %544 = vmatpush1.bf16.msra.mxu1 %v3899_v56  ;;  %v3932_v51 = vld [vmem:[#allocation7 + $0x24] ss:$16 sps:$4 sm:$0xff]   ;;  %v3947_v56 = vld [vmem:[#allocation7 + $0x2c] ss:$16 sps:$4 sm:$0xff]  }
  0x6a   :  { %545 = vmatprep.subr.bf16.mxu1 %v3904_v58  ;;  %6316 = vst [vmem:[#allocation33_spill] sm:$0xff] %v3932_v51  ;;  %v3935_v58 = vld [vmem:[#allocation7 + $0xc] ss:$16 sps:$4 sm:$0xff]   ;;  %6321 = vst [vmem:[#allocation38_spill] sm:$0xff] %v3947_v56 }
  0x6b   :  { %6317 = vst [vmem:[#allocation34_spill] sm:$0xff] %v3935_v58 }
  0x6c   :  { %505 = vmatpush1.bf16.msra.mxu0 %v3892_v54  ;;  %v3930_v54 = vld [vmem:[#allocation5 + $0x1e8] ss:$16 sps:$4 sm:$0xff]  }
  0x6d   :  { %506 = vmatprep.subr.bf16.mxu0 %v3895_v55  ;;  %546 = vmatpush1.bf16.msra.mxu1 %v3908_v60  ;;  %v3928_v55 = vld [vmem:[#allocation7] ss:$16 sps:$4 sm:$0xff]   ;;  %6315 = vst [vmem:[#allocation32_spill] sm:$0xff] %v3930_v54  ;;  %v3944_v60 = vld [vmem:[#allocation7 + $0x44] ss:$16 sps:$4 sm:$0xff]  }
  0x6e   :  { %547 = vmatprep.subr.bf16.mxu1 %v3911_v61  ;;  %6314 = vst [vmem:[#allocation31_spill] sm:$0xff] %v3928_v55  ;;  %v3942_v61 = vld [vmem:[#allocation7 + $0x8] ss:$16 sps:$4 sm:$0xff]   ;;  %6320 = vst [vmem:[#allocation37_spill] sm:$0xff] %v3944_v60 }
  0x6f   :  { %6319 = vst [vmem:[#allocation36_spill] sm:$0xff] %v3942_v61 }
  0x70   :  { %507 = vmatpush1.bf16.msra.mxu0 %v3901_v57  ;;  %v3656_v57 = vmov 0.0|0.0  }
  0x71   :  { %508 = vmatprep.subr.bf16.mxu0 %v3906_v59  ;;  %548 = vmatpush1.bf16.msra.mxu1 %v3918_v63  ;;  %v3940_v59 = vld [vmem:[#allocation7 + $0x20] ss:$16 sps:$4 sm:$0xff]  }
  0x72   :  { %549 = vmatprep.subr.bf16.mxu1 %v3923_v43  ;;  %6318 = vst [vmem:[#allocation35_spill] sm:$0xff] %v3940_v59 }
  0x74   :  { %509 = vmatpush1.bf16.msra.mxu0 %v3915_v62  ;;  %v3956_v62 = vld [vmem:[#allocation7 + $0x28] ss:$16 sps:$4 sm:$0xff]  }
  0x75   :  { %992 = vmatprep.subr.bf16.mxu0 %v3920_v41  ;;  %550 = vmatpush1.bf16.msra.mxu1 %v3930_v54  ;;  %v3953_v41 = vld [vmem:[#allocation7 + $0x40] ss:$16 sps:$4 sm:$0xff]   ;;  %6323 = vst [vmem:[#allocation40_spill] sm:$0xff] %v3956_v62  ;;  %v3962_v54 = vld [vmem:[#allocation7 + $0x4c] ss:$16 sps:$4 sm:$0xff]  }
  0x76   :  { %1033 = vmatprep.subr.bf16.mxu1 %v3935_v58  ;;  %6322 = vst [vmem:[#allocation39_spill] sm:$0xff] %v3953_v41  ;;  %6325 = vst [vmem:[#allocation42_spill] sm:$0xff] %v3962_v54 }
  0x77   :  { %511 = vmatmul.mubr.bf16.vlgmr.msra.gmra.mrb[0].mxu0 %v3656_v57 }
  0x78   :  { %993 = vmatpush1.bf16.msra.mxu0 %v3928_v55  ;;  %552 = vmatmul.mubr.bf16.vlgmr.msra.gmra.mrb[0].mxu1 %v3656_v57  ;;  %v3959_v55 = vld [vmem:[#allocation7 + $0x64] ss:$16 sps:$4 sm:$0xff]   ;;  %v3968_v57 = vld [vmem:[#allocation7 + $0x48] ss:$16 sps:$4 sm:$0xff]  }
  0x79   :  { %994 = vmatprep.subr.bf16.mxu0 %v3932_v51  ;;  %1034 = vmatpush1.bf16.msra.mxu1 %v3942_v61  ;;  %6324 = vst [vmem:[#allocation41_spill] sm:$0xff] %v3959_v55  ;;  %v3965_v51 = vld [vmem:[#allocation7 + $0x60] ss:$16 sps:$4 sm:$0xff]   ;;  %6327 = vst [vmem:[#allocation44_spill] sm:$0xff] %v3968_v57  ;;  %v4109_v61 = vld [vmem:[#allocation7 + $0x1e4] ss:$16 sps:$4 sm:$0xff]  }
  0x7a   :  { %1035 = vmatprep.subr.bf16.mxu1 %v3947_v56  ;;  %6326 = vst [vmem:[#allocation43_spill] sm:$0xff] %v3965_v51  ;;  %v3984_v56 = vld [vmem:[#allocation7 + $0x80] ss:$16 sps:$4 sm:$0xff]   ;;  %6374 = vst [vmem:[#allocation91_spill] sm:$0xff] %v4109_v61 }
  0x7b   :  { %6332 = vst [vmem:[#allocation49_spill] sm:$0xff] %v3984_v56 }
  0x7c   :  { %995 = vmatpush1.bf16.msra.mxu0 %v3940_v59  ;;  %v3972_v59 = vld [vmem:[#allocation7 + $0x6c] ss:$16 sps:$4 sm:$0xff]  }
  0x7d   :  { %996 = vmatprep.subr.bf16.mxu0 %v3944_v60  ;;  %1036 = vmatpush1.bf16.msra.mxu1 %v3956_v62  ;;  %6328 = vst [vmem:[#allocation45_spill] sm:$0xff] %v3972_v59  ;;  %v3976_v60 = vld [vmem:[#allocation7 + $0x68] ss:$16 sps:$4 sm:$0xff]   ;;  %v3982_v62 = vld [vmem:[#allocation7 + $0x8c] ss:$16 sps:$4 sm:$0xff]  }
  0x7e   :  { %1037 = vmatprep.subr.bf16.mxu1 %v3962_v54  ;;  %6329 = vst [vmem:[#allocation46_spill] sm:$0xff] %v3976_v60  ;;  %6331 = vst [vmem:[#allocation48_spill] sm:$0xff] %v3982_v62  ;;  %v4096_v54 = vld [vmem:[#allocation7 + $0x1c4] ss:$16 sps:$4 sm:$0xff]  }
  0x7f   :  { %6370 = vst [vmem:[#allocation87_spill] sm:$0xff] %v4096_v54 }
  0x80   :  { %997 = vmatpush1.bf16.msra.mxu0 %v3953_v41  ;;  %v3980_v41 = vld [vmem:[#allocation7 + $0x84] ss:$16 sps:$4 sm:$0xff]  }
  0x81   :  { %998 = vmatprep.subr.bf16.mxu0 %v3959_v55  ;;  %1038 = vmatpush1.bf16.msra.mxu1 %v3968_v57  ;;  %6330 = vst [vmem:[#allocation47_spill] sm:$0xff] %v3980_v41  ;;  %v3986_v55 = vld [vmem:[#allocation7 + $0x88] ss:$16 sps:$4 sm:$0xff]  }
  0x82   :  { %1039 = vmatprep.subr.bf16.mxu1 %v3972_v59  ;;  %6333 = vst [vmem:[#allocation50_spill] sm:$0xff] %v3986_v55  ;;  %v3994_v59 = vld [vmem:[#allocation7 + $0xac] ss:$16 sps:$4 sm:$0xff]   ;;  %v3998_v57 = vld [vmem:[#allocation7 + $0xa8] ss:$16 sps:$4 sm:$0xff]  }
  0x83   :  { %6335 = vst [vmem:[#allocation52_spill] sm:$0xff] %v3994_v59  ;;  %6337 = vst [vmem:[#allocation54_spill] sm:$0xff] %v3998_v57 }
  0x84   :  { %999 = vmatpush1.bf16.msra.mxu0 %v3965_v51  ;;  %v3992_v51 = vld [vmem:[#allocation7 + $0xa4] ss:$16 sps:$4 sm:$0xff]  }
  0x85   :  { %1040 = vmatpush1.bf16.msra.mxu1 %v3976_v60  ;;  %1000 = vmatprep.subr.bf16.mxu0 %v3980_v41  ;;  %6334 = vst [vmem:[#allocation51_spill] sm:$0xff] %v3992_v51  ;;  %v3996_v60 = vld [vmem:[#allocation7 + $0xa0] ss:$16 sps:$4 sm:$0xff]   ;;  %v4010_v41 = vld [vmem:[#allocation7 + $0xc8] ss:$16 sps:$4 sm:$0xff]  }
  0x86   :  { %1041 = vmatprep.subr.bf16.mxu1 %v3982_v62  ;;  %6336 = vst [vmem:[#allocation53_spill] sm:$0xff] %v3996_v60  ;;  %v4004_v62 = vld [vmem:[#allocation7 + $0xc4] ss:$16 sps:$4 sm:$0xff]   ;;  %6341 = vst [vmem:[#allocation58_spill] sm:$0xff] %v4010_v41 }
  0x87   :  { %6338 = vst [vmem:[#allocation55_spill] sm:$0xff] %v4004_v62 }
  0x88   :  { %1001 = vmatpush1.bf16.msra.mxu0 %v3984_v56  ;;  %v4006_v56 = vld [vmem:[#allocation7 + $0xcc] ss:$16 sps:$4 sm:$0xff]  }
  0x89   :  { %1042 = vmatpush1.bf16.msra.mxu1 %v3986_v55  ;;  %1002 = vmatprep.subr.bf16.mxu0 %v3992_v51  ;;  %6339 = vst [vmem:[#allocation56_spill] sm:$0xff] %v4006_v56  ;;  %v4008_v55 = vld [vmem:[#allocation7 + $0xc0] ss:$16 sps:$4 sm:$0xff]   ;;  %v4022_v51 = vld [vmem:[#allocation7 + $0xe8] ss:$16 sps:$4 sm:$0xff]  }
  0x8a   :  { %1043 = vmatprep.subr.bf16.mxu1 %v3994_v59  ;;  %6340 = vst [vmem:[#allocation57_spill] sm:$0xff] %v4008_v55  ;;  %v4016_v59 = vld [vmem:[#allocation7 + $0xe4] ss:$16 sps:$4 sm:$0xff]   ;;  %6345 = vst [vmem:[#allocation62_spill] sm:$0xff] %v4022_v51 }
  0x8b   :  { %6342 = vst [vmem:[#allocation59_spill] sm:$0xff] %v4016_v59 }
  0x8c   :  { %1003 = vmatpush1.bf16.msra.mxu0 %v3996_v60  ;;  %v4018_v60 = vld [vmem:[#allocation7 + $0xec] ss:$16 sps:$4 sm:$0xff]  }
  0x8d   :  { %1044 = vmatpush1.bf16.msra.mxu1 %v3998_v57  ;;  %1004 = vmatprep.subr.bf16.mxu0 %v4004_v62  ;;  %6343 = vst [vmem:[#allocation60_spill] sm:$0xff] %v4018_v60  ;;  %v4020_v57 = vld [vmem:[#allocation7 + $0xe0] ss:$16 sps:$4 sm:$0xff]   ;;  %v4034_v62 = vld [vmem:[#allocation7 + $0x108] ss:$16 sps:$4 sm:$0xff]  }
  0x8e   :  { %1045 = vmatprep.subr.bf16.mxu1 %v4006_v56  ;;  %6344 = vst [vmem:[#allocation61_spill] sm:$0xff] %v4020_v57  ;;  %v4028_v56 = vld [vmem:[#allocation7 + $0x104] ss:$16 sps:$4 sm:$0xff]   ;;  %6349 = vst [vmem:[#allocation66_spill] sm:$0xff] %v4034_v62 }
  0x8f   :  { %6346 = vst [vmem:[#allocation63_spill] sm:$0xff] %v4028_v56 }
  0x90   :  { %1005 = vmatpush1.bf16.msra.mxu0 %v4008_v55  ;;  %v4030_v55 = vld [vmem:[#allocation7 + $0x10c] ss:$16 sps:$4 sm:$0xff]  }
  0x91   :  { %1046 = vmatpush1.bf16.msra.mxu1 %v4010_v41  ;;  %1006 = vmatprep.subr.bf16.mxu0 %v4016_v59  ;;  %6347 = vst [vmem:[#allocation64_spill] sm:$0xff] %v4030_v55  ;;  %v4032_v41 = vld [vmem:[#allocation7 + $0x100] ss:$16 sps:$4 sm:$0xff]   ;;  %v4046_v59 = vld [vmem:[#allocation7 + $0x128] ss:$16 sps:$4 sm:$0xff]  }
  0x92   :  { %1047 = vmatprep.subr.bf16.mxu1 %v4018_v60  ;;  %6348 = vst [vmem:[#allocation65_spill] sm:$0xff] %v4032_v41  ;;  %v4040_v60 = vld [vmem:[#allocation7 + $0x124] ss:$16 sps:$4 sm:$0xff]   ;;  %6353 = vst [vmem:[#allocation70_spill] sm:$0xff] %v4046_v59 }
  0x93   :  { %6350 = vst [vmem:[#allocation67_spill] sm:$0xff] %v4040_v60 }
  0x94   :  { %1007 = vmatpush1.bf16.msra.mxu0 %v4020_v57  ;;  %v4042_v57 = vld [vmem:[#allocation7 + $0x12c] ss:$16 sps:$4 sm:$0xff]  }
  0x95   :  { %1048 = vmatpush1.bf16.msra.mxu1 %v4022_v51  ;;  %1008 = vmatprep.subr.bf16.mxu0 %v4028_v56  ;;  %6351 = vst [vmem:[#allocation68_spill] sm:$0xff] %v4042_v57  ;;  %v4044_v51 = vld [vmem:[#allocation7 + $0x120] ss:$16 sps:$4 sm:$0xff]   ;;  %v4058_v56 = vld [vmem:[#allocation7 + $0x148] ss:$16 sps:$4 sm:$0xff]  }
  0x96   :  { %1049 = vmatprep.subr.bf16.mxu1 %v4030_v55  ;;  %6352 = vst [vmem:[#allocation69_spill] sm:$0xff] %v4044_v51  ;;  %v4052_v55 = vld [vmem:[#allocation7 + $0x144] ss:$16 sps:$4 sm:$0xff]   ;;  %6357 = vst [vmem:[#allocation74_spill] sm:$0xff] %v4058_v56 }
  0x97   :  { %6354 = vst [vmem:[#allocation71_spill] sm:$0xff] %v4052_v55 }
  0x98   :  { %1009 = vmatpush1.bf16.msra.mxu0 %v4032_v41  ;;  %v4054_v41 = vld [vmem:[#allocation7 + $0x14c] ss:$16 sps:$4 sm:$0xff]  }
  0x99   :  { %1050 = vmatpush1.bf16.msra.mxu1 %v4034_v62  ;;  %1010 = vmatprep.subr.bf16.mxu0 %v4040_v60  ;;  %6355 = vst [vmem:[#allocation72_spill] sm:$0xff] %v4054_v41  ;;  %v4056_v62 = vld [vmem:[#allocation7 + $0x140] ss:$16 sps:$4 sm:$0xff]   ;;  %v4070_v60 = vld [vmem:[#allocation7 + $0x168] ss:$16 sps:$4 sm:$0xff]  }
  0x9a   :  { %1051 = vmatprep.subr.bf16.mxu1 %v4042_v57  ;;  %6356 = vst [vmem:[#allocation73_spill] sm:$0xff] %v4056_v62  ;;  %v4064_v57 = vld [vmem:[#allocation7 + $0x164] ss:$16 sps:$4 sm:$0xff]   ;;  %6361 = vst [vmem:[#allocation78_spill] sm:$0xff] %v4070_v60 }
  0x9b   :  { %6358 = vst [vmem:[#allocation75_spill] sm:$0xff] %v4064_v57 }
  0x9c   :  { %1011 = vmatpush1.bf16.msra.mxu0 %v4044_v51  ;;  %v4066_v51 = vld [vmem:[#allocation7 + $0x16c] ss:$16 sps:$4 sm:$0xff]  }
  0x9d   :  { %1052 = vmatpush1.bf16.msra.mxu1 %v4046_v59  ;;  %1012 = vmatprep.subr.bf16.mxu0 %v4052_v55  ;;  %6359 = vst [vmem:[#allocation76_spill] sm:$0xff] %v4066_v51  ;;  %v4068_v59 = vld [vmem:[#allocation7 + $0x160] ss:$16 sps:$4 sm:$0xff]   ;;  %v4082_v55 = vld [vmem:[#allocation7 + $0x188] ss:$16 sps:$4 sm:$0xff]  }
  0x9e   :  { %1053 = vmatprep.subr.bf16.mxu1 %v4054_v41  ;;  %6360 = vst [vmem:[#allocation77_spill] sm:$0xff] %v4068_v59  ;;  %v4076_v41 = vld [vmem:[#allocation7 + $0x184] ss:$16 sps:$4 sm:$0xff]   ;;  %6365 = vst [vmem:[#allocation82_spill] sm:$0xff] %v4082_v55 }
  0x9f   :  { %6362 = vst [vmem:[#allocation79_spill] sm:$0xff] %v4076_v41 }
  0xa0   :  { %1013 = vmatpush1.bf16.msra.mxu0 %v4056_v62  ;;  %v4078_v62 = vld [vmem:[#allocation7 + $0x18c] ss:$16 sps:$4 sm:$0xff]  }
  0xa1   :  { %1054 = vmatpush1.bf16.msra.mxu1 %v4058_v56  ;;  %1014 = vmatprep.subr.bf16.mxu0 %v4064_v57  ;;  %6363 = vst [vmem:[#allocation80_spill] sm:$0xff] %v4078_v62  ;;  %v4080_v56 = vld [vmem:[#allocation7 + $0x180] ss:$16 sps:$4 sm:$0xff]   ;;  %v4087_v57 = vld [vmem:[#allocation7 + $0x1a4] ss:$16 sps:$4 sm:$0xff]  }
  0xa2   :  { %1055 = vmatprep.subr.bf16.mxu1 %v4066_v51  ;;  %6364 = vst [vmem:[#allocation81_spill] sm:$0xff] %v4080_v56  ;;  %6366 = vst [vmem:[#allocation83_spill] sm:$0xff] %v4087_v57  ;;  %v4089_v51 = vld [vmem:[#allocation7 + $0x1ac] ss:$16 sps:$4 sm:$0xff]  }
  0xa3   :  { %6367 = vst [vmem:[#allocation84_spill] sm:$0xff] %v4089_v51 }
  0xa4   :  { %1015 = vmatpush1.bf16.msra.mxu0 %v4068_v59  ;;  %v4091_v59 = vld [vmem:[#allocation7 + $0x1a0] ss:$16 sps:$4 sm:$0xff]  }
  0xa5   :  { %1056 = vmatpush1.bf16.msra.mxu1 %v4070_v60  ;;  %1016 = vmatprep.subr.bf16.mxu0 %v4076_v41  ;;  %6368 = vst [vmem:[#allocation85_spill] sm:$0xff] %v4091_v59  ;;  %v4094_v60 = vld [vmem:[#allocation7 + $0x1a8] ss:$16 sps:$4 sm:$0xff]   ;;  %v4100_v41 = vld [vmem:[#allocation7 + $0x1cc] ss:$16 sps:$4 sm:$0xff]  }
  0xa6   :  { %1057 = vmatprep.subr.bf16.mxu1 %v4078_v62  ;;  %6369 = vst [vmem:[#allocation86_spill] sm:$0xff] %v4094_v60  ;;  %6371 = vst [vmem:[#allocation88_spill] sm:$0xff] %v4100_v41  ;;  %v67_v62 = vld [vmem:[#allocation2 + $0x1] sm:$0x1] }
  0xa7   :  { %v585_v58 = vpack.c.bf16 %v67_v62, %v67_v62 }
  0xa8   :  { %1017 = vmatpush1.bf16.msra.mxu0 %v4080_v56  ;;  %v4103_v56 = vld [vmem:[#allocation7 + $0x1c0] ss:$16 sps:$4 sm:$0xff]  }
  0xa9   :  { %1058 = vmatpush1.bf16.msra.mxu1 %v4082_v55  ;;  %1018 = vmatprep.subr.bf16.mxu0 %v4087_v57  ;;  %6372 = vst [vmem:[#allocation89_spill] sm:$0xff] %v4103_v56  ;;  %v4107_v55 = vld [vmem:[#allocation7 + $0x1c8] ss:$16 sps:$4 sm:$0xff]   ;;  %v4112_v57 = vld [vmem:[#allocation7 + $0x1ec] ss:$16 sps:$4 sm:$0xff]  }
  0xaa   :  { %1059 = vmatprep.subr.bf16.mxu1 %v4089_v51  ;;  %6373 = vst [vmem:[#allocation90_spill] sm:$0xff] %v4107_v55  ;;  %6375 = vst [vmem:[#allocation92_spill] sm:$0xff] %v4112_v57  ;;  %1024 = vmatprep.mubr.bf16.mxu0 %v585_v58 }
  0xab   :  { %1065 = vmatprep.mubr.bf16.mxu1 %v585_v58  ;;  %v458_v58 = vlaneseq }
  0xac   :  { %1019 = vmatpush1.bf16.msra.mxu0 %v4091_v59  ;;  %v4115_v59 = vld [vmem:[#allocation7 + $0x1e0] ss:$16 sps:$4 sm:$0xff]  }
  0xad   :  { %1060 = vmatpush1.bf16.msra.mxu1 %v4094_v60  ;;  %1020 = vmatprep.subr.bf16.mxu0 %v4096_v54  ;;  %6376 = vst [vmem:[#allocation93_spill] sm:$0xff] %v4115_v59  ;;  %v4119_v54 = vld [vmem:[#allocation7 + $0x1e8] ss:$16 sps:$4 sm:$0xff]   ;;  %v459_v62 = vshrl.u32 %v458_v58, 7 }
  0xae   :  { %1061 = vmatprep.subr.bf16.mxu1 %v4100_v41  ;;  %6377 = vst [vmem:[#allocation94_spill] sm:$0xff] %v4119_v54 }
  0xaf   :  { %v4135_v41 = vsub.s32 2, %v459_v62  ;;  %v4138_v53 = vsub.s32 3, %v459_v62 }
  0xb0   :  { %1021 = vmatpush1.bf16.msra.mxu0 %v4103_v56  ;;  %v4126_v56 = vsub.s32 0, %v459_v62 }
  0xb1   :  { %1062 = vmatpush1.bf16.msra.mxu1 %v4107_v55  ;;  %1022 = vmatprep.subr.bf16.mxu0 %v4109_v61  ;;  %v72_v61 = vld [vmem:[%s5740_s4] sm:$0xf]  ;;  %v4131_v55 = vsub.s32 1, %v459_v62 }
  0xb2   :  { %1063 = vmatprep.subr.bf16.mxu1 %v4112_v57  ;;  %6378 = vst [vmem:[#allocation95_spill] sm:$0xff] %v4126_v56  ;;  %v461_v57 = vrot.slane %v72_v61, %v4126_v56  ;;  %v469_v63 = vrot.slane %v72_v61, %v4135_v41  ;;  %v473_v46 = vrot.slane %v72_v61, %v4138_v53 }
  0xb3   :  { %6379 = vst [vmem:[#allocation96_spill] sm:$0xff] %v4131_v55 }
  0xb4   :  { %1023 = vmatpush1.bf16.msra.mxu0 %v4115_v59  ;;  %v465_v59 = vrot.slane %v72_v61, %v4131_v55 }
  0xb5   :  { %1064 = vmatpush1.bf16.msra.mxu1 %v4119_v54  ;;  %1121 = vmatprep.subr.bf16.mxu0 %v3740_v0 }
  0xb6   :  { %1162 = vmatprep.subr.bf16.mxu1 %v3753_v5 }
 0x14a   :  { %v512_v54 = vpop.f32.mrb[0].mxu0 }
 0x14b   :  { %v513_v0 = vadd.f32 %v512_v54, %v461_v57  ;;  %v514_v60 = vpop.f32.mrb[1].mxu0  ;;  %v553_v47 = vpop.f32.mrb[0].mxu1 }
 0x14c   :  { %v515_v5 = vadd.f32 %v514_v60, %v465_v59  ;;  %v516_v51 = vpop.f32.mrb[2].mxu0  ;;  %v555_v56 = vpop.f32.mrb[1].mxu1  ;;  %v554_v52 = vadd.f32 %v553_v47, %v469_v63  ;;  %v68_v47 = vld [vmem:[%s5737_s1] sm:$0x1] }
 0x14d   :  { %v2734_v58 = vmul.f32 -1.442695, %v513_v0  ;;  %v517_v43 = vpop.f32.mrb[3].mxu0  ;;  %v557_v55 = vpop.f32.mrb[2].mxu1  ;;  %v556_v57 = vadd.f32 %v555_v56, %v473_v46 }
 0x14e   :  { %v2735_v50 = vmul.f32 -1.442695, %v515_v5  ;;  %v558_v49 = vpop.f32.mrb[3].mxu1  ;;  %v2736_v54 = vmul.f32 -1.442695, %v554_v52 }
 0x14f   :  { %3045 = vpow2.f32 %v2734_v58 }
 0x150   :  { %3047 = vpow2.f32 %v2735_v50 }
 0x151   :  { %3049 = vpow2.f32 %v2736_v54 }
 0x152   :  { %3051 = vtanh.f32 %v556_v57 }
 0x159   :  { %v3046_v59 = vpop.eup %3045 }
 0x15a   :  { %v3048_v51 = vpop.eup %3047  ;;  %v569_v60 = vadd.f32 1.0, %v3046_v59 }
 0x15b   :  { %v570_v43 = vadd.f32 1.0, %v3048_v51  ;;  %v3050_v62 = vpop.eup %3049 }
 0x15c   :  { %3053 = vrcp.f32 %v569_v60  ;;  %v3052_v0 = vpop.eup %3051  ;;  %v571_v55 = vadd.f32 1.0, %v3050_v62 }
 0x15d   :  { %3055 = vrcp.f32 %v570_v43 }
 0x15e   :  { %3057 = vrcp.f32 %v571_v55 }
 0x166   :  { %v3054_v50 = vpop.eup %3053 }
 0x167   :  { %v3056_v61 = vpop.eup %3055  ;;  %v580_v49 = vmul.f32 %v3054_v50, %v3052_v0  ;;  %v69_v0 = vld [vmem:[%s5737_s1 + $0x1] sm:$0x1] }
 0x168   :  { %v579_v52 = vmul.f32 %v3056_v61, %v68_v47  ;;  %v3058_v56 = vpop.eup %3057 }
 0x16a   :  { %v4144_v46 = vadd.f32 %v580_v49, %v579_v52 }
 0x16c   :  { %3059 = vtanh.f32 %v4144_v46 }
 0x176   :  { %v3060_v63 = vpop.eup %3059 }
 0x177   :  { %v583_v5 = vmul.f32 %v3060_v63, %v3058_v56 }
 0x179   :  { %v584_v58 = vpack.c.bf16 %v583_v5, %v583_v5 }
 0x17b   :  { %1025 = vmatmul.mubr.bf16.vlgmr.msra.gmra.mrb[4].mxu0 %v584_v58  ;;  %1066 = vmatmul.mubr.bf16.vlgmr.msra.gmra.mrb[4].mxu1 %v584_v58 }
 0x17c   :  { %1153 = vmatprep.mubr.bf16.mxu0 %v584_v58  ;;  %1194 = vmatprep.mubr.bf16.mxu1 %v584_v58  ;;  %v6404_v58 = vld [vmem:[#allocation31_spill] sm:$0xff] }
 0x17d   :  { %1122 = vmatpush1.bf16.msra.mxu0 %v3742_v1  ;;  %1163 = vmatpush1.bf16.msra.mxu1 %v3755_v6  ;;  %v6380_v1 = vld [vmem:[#allocation14_spill] sm:$0xff] }
 0x17e   :  { %1123 = vmatprep.subr.bf16.mxu0 %v3745_v2  ;;  %1164 = vmatprep.subr.bf16.mxu1 %v3765_v9  ;;  %v6381_v2 = vld [vmem:[#allocation12_spill] sm:$0xff]  ;;  %v6384_v6 = vld [vmem:[#allocation18_spill] sm:$0xff] }
 0x17f   :  { %v6387_v9 = vld [vmem:[#allocation16_spill] sm:$0xff] }
 0x181   :  { %1124 = vmatpush1.bf16.msra.mxu0 %v3748_v3  ;;  %1165 = vmatpush1.bf16.msra.mxu1 %v3767_v10  ;;  %v6382_v3 = vld [vmem:[#allocation17_spill] sm:$0xff]  ;;  %v6388_v10 = vld [vmem:[#allocation23_spill] sm:$0xff] }
 0x182   :  { %1125 = vmatprep.subr.bf16.mxu0 %v3751_v4  ;;  %1166 = vmatprep.subr.bf16.mxu1 %v3775_v13  ;;  %v6383_v4 = vld [vmem:[#allocation13_spill] sm:$0xff]  ;;  %v6391_v13 = vld [vmem:[#allocation20_spill] sm:$0xff] }
 0x185   :  { %1126 = vmatpush1.bf16.msra.mxu0 %v3758_v7  ;;  %1167 = vmatpush1.bf16.msra.mxu1 %v3779_v14  ;;  %v6385_v7 = vld [vmem:[#allocation15_spill] sm:$0xff]  ;;  %v6392_v14 = vld [vmem:[#allocation26_spill] sm:$0xff] }
 0x186   :  { %1127 = vmatprep.subr.bf16.mxu0 %v3762_v8  ;;  %1168 = vmatprep.subr.bf16.mxu1 %v3782_v15  ;;  %v6386_v8 = vld [vmem:[#allocation21_spill] sm:$0xff]  ;;  %v6393_v15 = vld [vmem:[#allocation22_spill] sm:$0xff] }
 0x189   :  { %1128 = vmatpush1.bf16.msra.mxu0 %v3771_v11  ;;  %1169 = vmatpush1.bf16.msra.mxu1 %v3791_v18  ;;  %v6389_v11 = vld [vmem:[#allocation19_spill] sm:$0xff]  ;;  %v6396_v18 = vld [vmem:[#allocation30_spill] sm:$0xff] }
 0x18a   :  { %1129 = vmatprep.subr.bf16.mxu0 %v3773_v12  ;;  %1170 = vmatprep.subr.bf16.mxu1 %v3794_v19  ;;  %v6390_v12 = vld [vmem:[#allocation25_spill] sm:$0xff]  ;;  %v6397_v19 = vld [vmem:[#allocation27_spill] sm:$0xff] }
 0x18d   :  { %1130 = vmatpush1.bf16.msra.mxu0 %v3785_v16  ;;  %1171 = vmatpush1.bf16.msra.mxu1 %v3803_v22  ;;  %v6394_v16 = vld [vmem:[#allocation28_spill] sm:$0xff]  ;;  %v6400_v22 = vld [vmem:[#allocation34_spill] sm:$0xff] }
 0x18e   :  { %1131 = vmatprep.subr.bf16.mxu0 %v3788_v17  ;;  %1172 = vmatprep.subr.bf16.mxu1 %v3806_v23  ;;  %v6395_v17 = vld [vmem:[#allocation24_spill] sm:$0xff] }
 0x18f   :  { %v650_v23 = vld [vmem:[%s5742_s6] sm:$0xf] }
 0x191   :  { %1132 = vmatpush1.bf16.msra.mxu0 %v3797_v20  ;;  %1173 = vmatpush1.bf16.msra.mxu1 %v3815_v26  ;;  %v6398_v20 = vld [vmem:[#allocation32_spill] sm:$0xff] }
 0x192   :  { %1133 = vmatprep.subr.bf16.mxu0 %v3799_v21  ;;  %1174 = vmatprep.subr.bf16.mxu1 %v3818_v27  ;;  %v6399_v21 = vld [vmem:[#allocation29_spill] sm:$0xff]  ;;  %v6402_v26 = vld [vmem:[#allocation96_spill] sm:$0xff] }
 0x193   :  { %v4218_v27 = vrot.slane %v650_v23, %v6402_v26 }
 0x195   :  { %1134 = vmatpush1.bf16.msra.mxu0 %v3809_v24  ;;  %1175 = vmatpush1.bf16.msra.mxu1 %v3827_v30  ;;  %v6401_v24 = vld [vmem:[#allocation95_spill] sm:$0xff] }
 0x196   :  { %1135 = vmatprep.subr.bf16.mxu0 %v3812_v25  ;;  %1176 = vmatprep.subr.bf16.mxu1 %v3830_v31  ;;  %v4215_v25 = vrot.slane %v650_v23, %v6401_v24 }
 0x199   :  { %1136 = vmatpush1.bf16.msra.mxu0 %v3821_v28  ;;  %1177 = vmatpush1.bf16.msra.mxu1 %v3839_v34 }
 0x19a   :  { %1137 = vmatprep.subr.bf16.mxu0 %v3823_v29  ;;  %1178 = vmatprep.subr.bf16.mxu1 %v3842_v35 }
 0x19d   :  { %1138 = vmatpush1.bf16.msra.mxu0 %v3833_v32  ;;  %1179 = vmatpush1.bf16.msra.mxu1 %v3851_v38 }
 0x19e   :  { %1139 = vmatprep.subr.bf16.mxu0 %v3836_v33  ;;  %1180 = vmatprep.subr.bf16.mxu1 %v3854_v39 }
 0x1a1   :  { %1140 = vmatpush1.bf16.msra.mxu0 %v3845_v36  ;;  %1181 = vmatpush1.bf16.msra.mxu1 %v3863_v44 }
 0x1a2   :  { %1141 = vmatprep.subr.bf16.mxu0 %v3847_v37  ;;  %1182 = vmatprep.subr.bf16.mxu1 %v3866_v45 }
 0x1a5   :  { %1142 = vmatpush1.bf16.msra.mxu0 %v3856_v40  ;;  %1183 = vmatpush1.bf16.msra.mxu1 %v3875_v48  ;;  %v4223_v40 = vrot.slane %v650_v23, %v4135_v41 }
 0x1a6   :  { %1143 = vmatprep.subr.bf16.mxu0 %v3859_v42  ;;  %1184 = vmatprep.subr.bf16.mxu1 %v6380_v1  ;;  %v4226_v42 = vrot.slane %v650_v23, %v4138_v53  ;;  %v6405_v1 = vld [vmem:[#allocation36_spill] sm:$0xff]  ;;  %v6424_v23 = vld [vmem:[#allocation53_spill] sm:$0xff] }
 0x1a9   :  { %1144 = vmatpush1.bf16.msra.mxu0 %v6381_v2  ;;  %1185 = vmatpush1.bf16.msra.mxu1 %v6382_v3  ;;  %v6406_v2 = vld [vmem:[#allocation33_spill] sm:$0xff]  ;;  %v6407_v3 = vld [vmem:[#allocation38_spill] sm:$0xff] }
 0x1aa   :  { %1145 = vmatprep.subr.bf16.mxu0 %v6383_v4  ;;  %1186 = vmatprep.subr.bf16.mxu1 %v6384_v6  ;;  %v6408_v4 = vld [vmem:[#allocation35_spill] sm:$0xff]  ;;  %v6409_v6 = vld [vmem:[#allocation40_spill] sm:$0xff] }
 0x1ad   :  { %1146 = vmatpush1.bf16.msra.mxu0 %v6385_v7  ;;  %1187 = vmatpush1.bf16.msra.mxu1 %v6386_v8  ;;  %v6410_v7 = vld [vmem:[#allocation37_spill] sm:$0xff]  ;;  %v6411_v8 = vld [vmem:[#allocation42_spill] sm:$0xff] }
 0x1ae   :  { %1147 = vmatprep.subr.bf16.mxu0 %v6387_v9  ;;  %1188 = vmatprep.subr.bf16.mxu1 %v6388_v10  ;;  %v6412_v9 = vld [vmem:[#allocation39_spill] sm:$0xff]  ;;  %v6413_v10 = vld [vmem:[#allocation44_spill] sm:$0xff] }
 0x1b1   :  { %1148 = vmatpush1.bf16.msra.mxu0 %v6389_v11  ;;  %1189 = vmatpush1.bf16.msra.mxu1 %v6390_v12  ;;  %v6414_v11 = vld [vmem:[#allocation41_spill] sm:$0xff] }
 0x1b2   :  { %1149 = vmatprep.subr.bf16.mxu0 %v6391_v13  ;;  %1190 = vmatprep.subr.bf16.mxu1 %v6392_v14  ;;  %v6415_v12 = vld [vmem:[#allocation45_spill] sm:$0xff]  ;;  %v6416_v13 = vld [vmem:[#allocation43_spill] sm:$0xff]  ;;  %v6417_v14 = vld [vmem:[#allocation46_spill] sm:$0xff] }
 0x1b5   :  { %1150 = vmatpush1.bf16.msra.mxu0 %v6393_v15  ;;  %1191 = vmatpush1.bf16.msra.mxu1 %v6394_v16  ;;  %v6418_v15 = vld [vmem:[#allocation47_spill] sm:$0xff]  ;;  %v6419_v16 = vld [vmem:[#allocation48_spill] sm:$0xff] }
 0x1b6   :  { %1151 = vmatprep.subr.bf16.mxu0 %v6395_v17  ;;  %1192 = vmatprep.subr.bf16.mxu1 %v6396_v18  ;;  %v6420_v17 = vld [vmem:[#allocation49_spill] sm:$0xff]  ;;  %v6421_v18 = vld [vmem:[#allocation50_spill] sm:$0xff] }
 0x1b9   :  { %1152 = vmatpush1.bf16.msra.mxu0 %v6397_v19  ;;  %1193 = vmatpush1.bf16.msra.mxu1 %v6398_v20  ;;  %v6422_v19 = vld [vmem:[#allocation51_spill] sm:$0xff] }
 0x1ba   :  { %1228 = vmatprep.subr.bf16.mxu0 %v6399_v21  ;;  %1269 = vmatprep.subr.bf16.mxu1 %v6400_v22  ;;  %v6423_v21 = vld [vmem:[#allocation52_spill] sm:$0xff] }
 0x24e   :  { %v1026_v28 = vpop.f32.mrb[4].mxu0  ;;  %v1067_v29 = vpop.f32.mrb[4].mxu1 }
 0x24f   :  { %v1027_v30 = vadd.f32 %v1026_v28, %v4215_v25  ;;  %v1028_v31 = vpop.f32.mrb[5].mxu0  ;;  %v1069_v32 = vpop.f32.mrb[5].mxu1  ;;  %v1068_v44 = vadd.f32 %v1067_v29, %v4223_v40  ;;  %v6425_v28 = vld [vmem:[#allocation54_spill] sm:$0xff]  ;;  %v6426_v29 = vld [vmem:[#allocation55_spill] sm:$0xff] }
 0x250   :  { %v1029_v33 = vadd.f32 %v1028_v31, %v4218_v27  ;;  %v1030_v34 = vpop.f32.mrb[6].mxu0  ;;  %v1071_v35 = vpop.f32.mrb[6].mxu1  ;;  %v1070_v45 = vadd.f32 %v1069_v32, %v4226_v42  ;;  %v6428_v31 = vld [vmem:[#allocation57_spill] sm:$0xff]  ;;  %v6429_v32 = vld [vmem:[#allocation58_spill] sm:$0xff] }
 0x251   :  { %v2801_v36 = vmul.f32 -1.442695, %v1027_v30  ;;  %v1031_v37 = vpop.f32.mrb[7].mxu0  ;;  %v1072_v38 = vpop.f32.mrb[7].mxu1  ;;  %v2803_v48 = vmul.f32 -1.442695, %v1068_v44 }
 0x252   :  { %v2802_v39 = vmul.f32 -1.442695, %v1029_v33  ;;  %v6427_v30 = vld [vmem:[#allocation56_spill] sm:$0xff]  ;;  %v6430_v33 = vld [vmem:[#allocation59_spill] sm:$0xff]  ;;  %v6432_v35 = vld [vmem:[#allocation61_spill] sm:$0xff] }
 0x253   :  { %3061 = vpow2.f32 %v2801_v36  ;;  %v6431_v34 = vld [vmem:[#allocation60_spill] sm:$0xff]  ;;  %v6433_v36 = vld [vmem:[#allocation62_spill] sm:$0xff]  ;;  %v6434_v37 = vld [vmem:[#allocation63_spill] sm:$0xff] }
 0x254   :  { %3063 = vpow2.f32 %v2802_v39  ;;  %v6435_v38 = vld [vmem:[#allocation64_spill] sm:$0xff]  ;;  %v6436_v39 = vld [vmem:[#allocation65_spill] sm:$0xff]  ;;  %v6437_v44 = vld [vmem:[#allocation66_spill] sm:$0xff] }
 0x255   :  { %3065 = vtanh.f32 %v1070_v45  ;;  %v6438_v45 = vld [vmem:[#allocation67_spill] sm:$0xff] }
 0x256   :  { %3067 = vpow2.f32 %v2803_v48  ;;  %v6439_v48 = vld [vmem:[#allocation68_spill] sm:$0xff] }
 0x25d   :  { %v3062_v54 = vpop.eup %3061 }
 0x25e   :  { %v1083_v57 = vadd.f32 1.0, %v3062_v54  ;;  %v3064_v59 = vpop.eup %3063  ;;  %v6440_v54 = vld [vmem:[#allocation69_spill] sm:$0xff] }
 0x25f   :  { %v1084_v51 = vadd.f32 1.0, %v3064_v59  ;;  %v3066_v60 = vpop.eup %3065  ;;  %v6442_v59 = vld [vmem:[#allocation71_spill] sm:$0xff] }
 0x260   :  { %3069 = vrcp.f32 %v1083_v57  ;;  %v3068_v43 = vpop.eup %3067  ;;  %v6441_v57 = vld [vmem:[#allocation70_spill] sm:$0xff] }
 0x261   :  { %3071 = vrcp.f32 %v1084_v51  ;;  %v1085_v55 = vadd.f32 1.0, %v3068_v43  ;;  %v6443_v51 = vld [vmem:[#allocation72_spill] sm:$0xff]  ;;  %v6445_v43 = vld [vmem:[#allocation74_spill] sm:$0xff] }
 0x263   :  { %3073 = vrcp.f32 %v1085_v55  ;;  %v6450_v55 = vld [vmem:[#allocation79_spill] sm:$0xff] }
 0x26a   :  { %v3070_v62 = vpop.eup %3069 }
 0x26b   :  { %v1094_v47 = vmul.f32 %v3070_v62, %v3066_v60  ;;  %v3072_v50 = vpop.eup %3071  ;;  %v6444_v60 = vld [vmem:[#allocation73_spill] sm:$0xff]  ;;  %v6446_v62 = vld [vmem:[#allocation75_spill] sm:$0xff] }
 0x26c   :  { %v1093_v61 = vmul.f32 %v3072_v50, %v69_v0  ;;  %v6447_v0 = vld [vmem:[#allocation76_spill] sm:$0xff]  ;;  %v6449_v50 = vld [vmem:[#allocation78_spill] sm:$0xff] }
 0x26d   :  { %v3074_v52 = vpop.eup %3073 }
 0x26e   :  { %v4233_v49 = vadd.f32 %v1094_v47, %v1093_v61  ;;  %v6448_v47 = vld [vmem:[#allocation77_spill] sm:$0xff]  ;;  %v6451_v61 = vld [vmem:[#allocation80_spill] sm:$0xff] }
 0x270   :  { %3075 = vtanh.f32 %v4233_v49 }
 0x27a   :  { %v3076_v56 = vpop.eup %3075 }
 0x27b   :  { %v4236_v63 = vmul.f32 %v3076_v56, %v3074_v52  ;;  %v6452_v52 = vld [vmem:[#allocation81_spill] sm:$0xff]  ;;  %v6453_v56 = vld [vmem:[#allocation82_spill] sm:$0xff] }
 0x27d   :  { %6403 = vst [vmem:[#allocation14_spill] sm:$0xff] %v4236_v63  ;;  %v1098_v5 = vpack.c.bf16 %v4236_v63, %v4236_v63  ;;  %v6464_v63 = vld [vmem:[#allocation93_spill] sm:$0xff] }
 0x27f   :  { %1154 = vmatmul.mubr.bf16.vlgmr.msra.gmra.mrb[8].mxu0 %v1098_v5  ;;  %1195 = vmatmul.mubr.bf16.vlgmr.msra.gmra.mrb[8].mxu1 %v1098_v5 }
 0x280   :  { %1260 = vmatprep.mubr.bf16.mxu0 %v1098_v5  ;;  %1301 = vmatprep.mubr.bf16.mxu1 %v1098_v5  ;;  %v6454_v5 = vld [vmem:[#allocation83_spill] sm:$0xff] }
 0x281   :  { %1229 = vmatpush1.bf16.msra.mxu0 %v6404_v58  ;;  %1270 = vmatpush1.bf16.msra.mxu1 %v6405_v1  ;;  %v6455_v58 = vld [vmem:[#allocation84_spill] sm:$0xff]  ;;  %v6456_v1 = vld [vmem:[#allocation85_spill] sm:$0xff] }
 0x282   :  { %1230 = vmatprep.subr.bf16.mxu0 %v6406_v2  ;;  %1271 = vmatprep.subr.bf16.mxu1 %v6407_v3  ;;  %v6457_v2 = vld [vmem:[#allocation86_spill] sm:$0xff]  ;;  %v6458_v3 = vld [vmem:[#allocation87_spill] sm:$0xff] }
 0x285   :  { %1231 = vmatpush1.bf16.msra.mxu0 %v6408_v4  ;;  %1272 = vmatpush1.bf16.msra.mxu1 %v6409_v6  ;;  %v6459_v4 = vld [vmem:[#allocation88_spill] sm:$0xff] }
 0x286   :  { %1232 = vmatprep.subr.bf16.mxu0 %v6410_v7  ;;  %1273 = vmatprep.subr.bf16.mxu1 %v6411_v8  ;;  %v6460_v7 = vld [vmem:[#allocation89_spill] sm:$0xff] }
 0x289   :  { %1233 = vmatpush1.bf16.msra.mxu0 %v6412_v9  ;;  %1274 = vmatpush1.bf16.msra.mxu1 %v6413_v10  ;;  %v6461_v9 = vld [vmem:[#allocation90_spill] sm:$0xff] }
 0x28a   :  { %1234 = vmatprep.subr.bf16.mxu0 %v6414_v11  ;;  %1275 = vmatprep.subr.bf16.mxu1 %v6415_v12  ;;  %v6462_v11 = vld [vmem:[#allocation91_spill] sm:$0xff] }
 0x28d   :  { %1235 = vmatpush1.bf16.msra.mxu0 %v6416_v13  ;;  %1276 = vmatpush1.bf16.msra.mxu1 %v6417_v14  ;;  %v6463_v13 = vld [vmem:[#allocation92_spill] sm:$0xff] }
 0x28e   :  { %1236 = vmatprep.subr.bf16.mxu0 %v6418_v15  ;;  %1277 = vmatprep.subr.bf16.mxu1 %v6419_v16 }
 0x291   :  { %1237 = vmatpush1.bf16.msra.mxu0 %v6420_v17  ;;  %1278 = vmatpush1.bf16.msra.mxu1 %v6421_v18 }
 0x292   :  { %1238 = vmatprep.subr.bf16.mxu0 %v6422_v19  ;;  %1279 = vmatprep.subr.bf16.mxu1 %v6423_v21 }
 0x295   :  { %1239 = vmatpush1.bf16.msra.mxu0 %v6424_v23  ;;  %1280 = vmatpush1.bf16.msra.mxu1 %v6425_v28 }
 0x296   :  { %1240 = vmatprep.subr.bf16.mxu0 %v6426_v29  ;;  %1281 = vmatprep.subr.bf16.mxu1 %v6427_v30 }
 0x299   :  { %1241 = vmatpush1.bf16.msra.mxu0 %v6428_v31  ;;  %1282 = vmatpush1.bf16.msra.mxu1 %v6429_v32 }
 0x29a   :  { %1242 = vmatprep.subr.bf16.mxu0 %v6430_v33  ;;  %1283 = vmatprep.subr.bf16.mxu1 %v6431_v34 }
 0x29d   :  { %1243 = vmatpush1.bf16.msra.mxu0 %v6432_v35  ;;  %1284 = vmatpush1.bf16.msra.mxu1 %v6433_v36 }
 0x29e   :  { %1244 = vmatprep.subr.bf16.mxu0 %v6434_v37  ;;  %1285 = vmatprep.subr.bf16.mxu1 %v6435_v38 }
 0x2a1   :  { %1245 = vmatpush1.bf16.msra.mxu0 %v6436_v39  ;;  %1286 = vmatpush1.bf16.msra.mxu1 %v6437_v44 }
 0x2a2   :  { %1246 = vmatprep.subr.bf16.mxu0 %v6438_v45  ;;  %1287 = vmatprep.subr.bf16.mxu1 %v6439_v48 }
 0x2a5   :  { %1247 = vmatpush1.bf16.msra.mxu0 %v6440_v54  ;;  %1288 = vmatpush1.bf16.msra.mxu1 %v6441_v57 }
 0x2a6   :  { %1248 = vmatprep.subr.bf16.mxu0 %v6442_v59  ;;  %1289 = vmatprep.subr.bf16.mxu1 %v6443_v51 }
 0x2a9   :  { %1249 = vmatpush1.bf16.msra.mxu0 %v6444_v60  ;;  %1290 = vmatpush1.bf16.msra.mxu1 %v6445_v43 }
 0x2aa   :  { %1250 = vmatprep.subr.bf16.mxu0 %v6446_v62  ;;  %1291 = vmatprep.subr.bf16.mxu1 %v6447_v0 }
 0x2ad   :  { %1251 = vmatpush1.bf16.msra.mxu0 %v6448_v47  ;;  %1292 = vmatpush1.bf16.msra.mxu1 %v6449_v50 }
 0x2ae   :  { %1252 = vmatprep.subr.bf16.mxu0 %v6450_v55  ;;  %1293 = vmatprep.subr.bf16.mxu1 %v6451_v61 }
 0x2b1   :  { %1253 = vmatpush1.bf16.msra.mxu0 %v6452_v52  ;;  %1294 = vmatpush1.bf16.msra.mxu1 %v6453_v56 }
 0x2b2   :  { %1254 = vmatprep.subr.bf16.mxu0 %v6454_v5  ;;  %1295 = vmatprep.subr.bf16.mxu1 %v6455_v58  ;;  %v6465_v5 = vld [vmem:[#allocation94_spill] sm:$0xff]  ;;  %v4302_v58 = vld [vmem:[#allocation5 + $0x4] ss:$16 sps:$4 sm:$0xff]  }
 0x2b3   :  { %6466 = vst [vmem:[#allocation12_spill] sm:$0xff] %v4302_v58 }
 0x2b5   :  { %1255 = vmatpush1.bf16.msra.mxu0 %v6456_v1  ;;  %1296 = vmatpush1.bf16.msra.mxu1 %v6457_v2  ;;  %v4305_v2 = vld [vmem:[#allocation5 + $0xc] ss:$16 sps:$4 sm:$0xff]  }
 0x2b6   :  { %1256 = vmatprep.subr.bf16.mxu0 %v6458_v3  ;;  %1297 = vmatprep.subr.bf16.mxu1 %v6459_v4  ;;  %6467 = vst [vmem:[#allocation17_spill] sm:$0xff] %v4305_v2 }
 0x2b9   :  { %1257 = vmatpush1.bf16.msra.mxu0 %v6460_v7  ;;  %1298 = vmatpush1.bf16.msra.mxu1 %v6461_v9  ;;  %v1099_v9 = vld [vmem:[%s5741_s5] sm:$0xf]  ;;  %s3657_s5 = smov [#allocation8]  }
 0x2ba   :  { %1258 = vmatprep.subr.bf16.mxu0 %v6462_v11  ;;  %1299 = vmatprep.subr.bf16.mxu1 %v6463_v13  ;;  %v4312_v11 = vrot.slane %v1099_v9, %v6401_v24  ;;  %v4315_v13 = vrot.slane %v1099_v9, %v6402_v26  ;;  %v4320_v24 = vrot.slane %v1099_v9, %v4135_v41  ;;  %s2660_s20 = sshll.u32 %s3657_s5, 4  ;;  %s2661_s20 = int_to_ptr.vmem [resolvable:$true] %s2660_s20 }
 0x2bb   :  { %v4323_v26 = vrot.slane %v1099_v9, %v4138_v53  ;;  %s3623_s21 = scalar_lea.vmem %s2661_s20, 128  ;;  %p3628_p11 = scmp.lt.s32.totalorder %s2661_s20, %s2661_s20 }
 0x2bc   :  { %6468 = vst [vmem:[#allocation13_spill] sm:$0xff] %v4312_v11  ;;  %p3624_p10 = scmp.ne.s32.totalorder %s2661_s20, %s3623_s21  ;;  %p3629_p12 = scmp.lt.s32.totalorder %s3623_s21, %s3623_s21 }
 0x2bd   :  { %1259 = vmatpush1.bf16.msra.mxu0 %v6464_v63  ;;  %1300 = vmatpush1.bf16.msra.mxu1 %v6465_v5 }
 0x2be   :  { %1335 = vmatprep.subr.bf16.mxu0 %v4302_v58  ;;  %1376 = vmatprep.subr.bf16.mxu1 %v4305_v2  ;;  %p3630_p13 = por %p3629_p12, %p3628_p11 }
 0x2c0   :  { %p3631_p0 = pnand %p3630_p13, %p3624_p10 }
 0x352   :  { %v1155_v63 = vpop.f32.mrb[8].mxu0  ;;  %v1196_v5 = vpop.f32.mrb[8].mxu1 }
 0x353   :  { %v1156_v7 = vadd.f32 %v1155_v63, %v4312_v11  ;;  %v1157_v4 = vpop.f32.mrb[9].mxu0  ;;  %v1198_v58 = vpop.f32.mrb[9].mxu1  ;;  %v1197_v63 = vadd.f32 %v1196_v5, %v4320_v24 }
 0x354   :  { %v1158_v3 = vadd.f32 %v1157_v4, %v4315_v13  ;;  %v1159_v1 = vpop.f32.mrb[10].mxu0  ;;  %v1200_v2 = vpop.f32.mrb[10].mxu1  ;;  %v1199_v11 = vadd.f32 %v1198_v58, %v4323_v26 }
 0x355   :  { %v2804_v56 = vmul.f32 -1.442695, %v1156_v7  ;;  %v1160_v52 = vpop.f32.mrb[11].mxu0  ;;  %v1201_v61 = vpop.f32.mrb[11].mxu1  ;;  %v2806_v50 = vmul.f32 -1.442695, %v1197_v63 }
 0x356   :  { %v2805_v55 = vmul.f32 -1.442695, %v1158_v3  ;;  %v4331_v63 = vld [vmem:[#allocation5] ss:$16 sps:$4 sm:$0xff]  }
 0x357   :  { %3077 = vpow2.f32 %v2804_v56 }
 0x358   :  { %3079 = vpow2.f32 %v2805_v55 }
 0x359   :  { %3081 = vtanh.f32 %v1199_v11 }
 0x35a   :  { %3083 = vpow2.f32 %v2806_v50 }
 0x361   :  { %v3078_v4 = vpop.eup %3077 }
 0x362   :  { %v1212_v1 = vadd.f32 1.0, %v3078_v4  ;;  %v3080_v2 = vpop.eup %3079  ;;  %v4334_v4 = vld [vmem:[#allocation5 + $0x8] ss:$16 sps:$4 sm:$0xff]  }
 0x363   :  { %v1213_v61 = vadd.f32 1.0, %v3080_v2  ;;  %v3082_v41 = vpop.eup %3081  ;;  %v4343_v2 = vld [vmem:[#allocation5 + $0x20] ss:$16 sps:$4 sm:$0xff]  }
 0x364   :  { %3085 = vrcp.f32 %v1212_v1  ;;  %v3084_v52 = vpop.eup %3083  ;;  %v4340_v1 = vld [vmem:[#allocation5 + $0x2c] ss:$16 sps:$4 sm:$0xff]   ;;  %6471 = vst [vmem:[#allocation21_spill] sm:$0xff] %v4343_v2 }
 0x365   :  { %3087 = vrcp.f32 %v1213_v61  ;;  %v1214_v53 = vadd.f32 1.0, %v3084_v52  ;;  %6470 = vst [vmem:[#allocation15_spill] sm:$0xff] %v4340_v1  ;;  %v4346_v61 = vld [vmem:[#allocation5 + $0x28] ss:$16 sps:$4 sm:$0xff]   ;;  %v4352_v52 = vld [vmem:[#allocation5 + $0x4c] ss:$16 sps:$4 sm:$0xff]  }
 0x366   :  { %6472 = vst [vmem:[#allocation16_spill] sm:$0xff] %v4346_v61  ;;  %6474 = vst [vmem:[#allocation19_spill] sm:$0xff] %v4352_v52 }
 0x367   :  { %3089 = vrcp.f32 %v1214_v53  ;;  %v4364_v53 = vld [vmem:[#allocation5 + $0x6c] ss:$16 sps:$4 sm:$0xff]  }
 0x368   :  { %6478 = vst [vmem:[#allocation22_spill] sm:$0xff] %v4364_v53 }
 0x36e   :  { %v3086_v56 = vpop.eup %3085 }
 0x36f   :  { %v1223_v55 = vmul.f32 %v3086_v56, %v3082_v41  ;;  %v3088_v3 = vpop.eup %3087  ;;  %v4349_v41 = vld [vmem:[#allocation5 + $0x44] ss:$16 sps:$4 sm:$0xff]   ;;  %v4355_v56 = vld [vmem:[#allocation5 + $0x40] ss:$16 sps:$4 sm:$0xff]  }
 0x370   :  { %v1222_v7 = vmul.f32 %v3088_v3, %v4144_v46  ;;  %v4337_v46 = vld [vmem:[#allocation5 + $0x24] ss:$16 sps:$4 sm:$0xff]   ;;  %6473 = vst [vmem:[#allocation23_spill] sm:$0xff] %v4349_v41  ;;  %6475 = vst [vmem:[#allocation25_spill] sm:$0xff] %v4355_v56 }
 0x371   :  { %v3090_v58 = vpop.eup %3089  ;;  %6469 = vst [vmem:[#allocation18_spill] sm:$0xff] %v4337_v46  ;;  %v4361_v3 = vld [vmem:[#allocation5 + $0x64] ss:$16 sps:$4 sm:$0xff]  }
 0x372   :  { %v4328_v5 = vadd.f32 %v1223_v55, %v1222_v7  ;;  %v4358_v55 = vld [vmem:[#allocation5 + $0x48] ss:$16 sps:$4 sm:$0xff]   ;;  %6477 = vst [vmem:[#allocation26_spill] sm:$0xff] %v4361_v3  ;;  %v4367_v7 = vld [vmem:[#allocation5 + $0x60] ss:$16 sps:$4 sm:$0xff]  }
 0x373   :  { %6476 = vst [vmem:[#allocation20_spill] sm:$0xff] %v4358_v55  ;;  %6479 = vst [vmem:[#allocation28_spill] sm:$0xff] %v4367_v7 }
 0x374   :  { %3091 = vtanh.f32 %v4328_v5 }
 0x37e   :  { %v3092_v9 = vpop.eup %3091 }
 0x37f   :  { %v1226_v11 = vmul.f32 %v3092_v9, %v3090_v58  ;;  %v4370_v58 = vld [vmem:[#allocation5 + $0x68] ss:$16 sps:$4 sm:$0xff]   ;;  %v4373_v9 = vld [vmem:[#allocation5 + $0x84] ss:$16 sps:$4 sm:$0xff]  }
 0x380   :  { %6480 = vst [vmem:[#allocation24_spill] sm:$0xff] %v4370_v58  ;;  %6481 = vst [vmem:[#allocation30_spill] sm:$0xff] %v4373_v9 }
 0x381   :  { %v1227_v50 = vpack.c.bf16 %v1226_v11, %v1226_v11  ;;  %v4376_v11 = vld [vmem:[#allocation5 + $0x8c] ss:$16 sps:$4 sm:$0xff]  }
 0x382   :  { %6482 = vst [vmem:[#allocation27_spill] sm:$0xff] %v4376_v11 }
 0x383   :  { %1261 = vmatmul.mubr.bf16.vlgmr.msra.gmra.mrb[12].mxu0 %v1227_v50  ;;  %1302 = vmatmul.mubr.bf16.vlgmr.msra.gmra.mrb[12].mxu1 %v1227_v50 }
 0x384   :  { %1367 = vmatprep.mubr.bf16.mxu0 %v1227_v50  ;;  %1408 = vmatprep.mubr.bf16.mxu1 %v1227_v50  ;;  %v4379_v50 = vld [vmem:[#allocation5 + $0x80] ss:$16 sps:$4 sm:$0xff]  }
 0x385   :  { %1336 = vmatpush1.bf16.msra.mxu0 %v4331_v63  ;;  %1377 = vmatpush1.bf16.msra.mxu1 %v4334_v4  ;;  %6483 = vst [vmem:[#allocation32_spill] sm:$0xff] %v4379_v50 }
 0x386   :  { %1337 = vmatprep.subr.bf16.mxu0 %v4337_v46  ;;  %1378 = vmatprep.subr.bf16.mxu1 %v4340_v1 }
 0x389   :  { %1338 = vmatpush1.bf16.msra.mxu0 %v4343_v2  ;;  %1379 = vmatpush1.bf16.msra.mxu1 %v4346_v61 }
 0x38a   :  { %1339 = vmatprep.subr.bf16.mxu0 %v4349_v41  ;;  %1380 = vmatprep.subr.bf16.mxu1 %v4352_v52 }
 0x38d   :  { %1340 = vmatpush1.bf16.msra.mxu0 %v4355_v56  ;;  %1381 = vmatpush1.bf16.msra.mxu1 %v4358_v55 }
 0x38e   :  { %1341 = vmatprep.subr.bf16.mxu0 %v4361_v3  ;;  %1382 = vmatprep.subr.bf16.mxu1 %v4364_v53  ;;  %v4382_v53 = vld [vmem:[#allocation5 + $0x88] ss:$16 sps:$4 sm:$0xff]  }
 0x38f   :  { %6484 = vst [vmem:[#allocation29_spill] sm:$0xff] %v4382_v53 }
 0x391   :  { %1342 = vmatpush1.bf16.msra.mxu0 %v4367_v7  ;;  %1383 = vmatpush1.bf16.msra.mxu1 %v4370_v58  ;;  %v4385_v7 = vld [vmem:[#allocation5 + $0xa4] ss:$16 sps:$4 sm:$0xff]   ;;  %v4388_v58 = vld [vmem:[#allocation5 + $0xac] ss:$16 sps:$4 sm:$0xff]  }
 0x392   :  { %1343 = vmatprep.subr.bf16.mxu0 %v4373_v9  ;;  %1384 = vmatprep.subr.bf16.mxu1 %v4376_v11  ;;  %6485 = vst [vmem:[#allocation34_spill] sm:$0xff] %v4385_v7  ;;  %6486 = vst [vmem:[#allocation95_spill] sm:$0xff] %v4388_v58  ;;  %v4391_v9 = vld [vmem:[#allocation5 + $0xa0] ss:$16 sps:$4 sm:$0xff]   ;;  %v4394_v11 = vld [vmem:[#allocation5 + $0xa8] ss:$16 sps:$4 sm:$0xff]  }
 0x393   :  { %6487 = vst [vmem:[#allocation96_spill] sm:$0xff] %v4391_v9  ;;  %6488 = vst [vmem:[#allocation31_spill] sm:$0xff] %v4394_v11 }
 0x395   :  { %1344 = vmatpush1.bf16.msra.mxu0 %v4379_v50  ;;  %1385 = vmatpush1.bf16.msra.mxu1 %v4382_v53  ;;  %v4397_v50 = vld [vmem:[#allocation5 + $0xc4] ss:$16 sps:$4 sm:$0xff]   ;;  %v4400_v53 = vld [vmem:[#allocation5 + $0xcc] ss:$16 sps:$4 sm:$0xff]  }
 0x396   :  { %1345 = vmatprep.subr.bf16.mxu0 %v4385_v7  ;;  %1386 = vmatprep.subr.bf16.mxu1 %v4388_v58  ;;  %6489 = vst [vmem:[#allocation36_spill] sm:$0xff] %v4397_v50  ;;  %6490 = vst [vmem:[#allocation33_spill] sm:$0xff] %v4400_v53  ;;  %v4403_v7 = vld [vmem:[#allocation5 + $0xc0] ss:$16 sps:$4 sm:$0xff]   ;;  %v4406_v58 = vld [vmem:[#allocation5 + $0xc8] ss:$16 sps:$4 sm:$0xff]  }
 0x397   :  { %6491 = vst [vmem:[#allocation38_spill] sm:$0xff] %v4403_v7  ;;  %6492 = vst [vmem:[#allocation35_spill] sm:$0xff] %v4406_v58 }
 0x399   :  { %1346 = vmatpush1.bf16.msra.mxu0 %v4391_v9  ;;  %1387 = vmatpush1.bf16.msra.mxu1 %v4394_v11  ;;  %v4409_v9 = vld [vmem:[#allocation5 + $0xe4] ss:$16 sps:$4 sm:$0xff]   ;;  %v4412_v11 = vld [vmem:[#allocation5 + $0xec] ss:$16 sps:$4 sm:$0xff]  }
 0x39a   :  { %1347 = vmatprep.subr.bf16.mxu0 %v4397_v50  ;;  %1388 = vmatprep.subr.bf16.mxu1 %v4400_v53  ;;  %6493 = vst [vmem:[#allocation40_spill] sm:$0xff] %v4409_v9  ;;  %6494 = vst [vmem:[#allocation37_spill] sm:$0xff] %v4412_v11  ;;  %v4415_v50 = vld [vmem:[#allocation5 + $0xe0] ss:$16 sps:$4 sm:$0xff]   ;;  %v4418_v53 = vld [vmem:[#allocation5 + $0xe8] ss:$16 sps:$4 sm:$0xff]  }
 0x39b   :  { %6495 = vst [vmem:[#allocation42_spill] sm:$0xff] %v4415_v50  ;;  %6496 = vst [vmem:[#allocation39_spill] sm:$0xff] %v4418_v53 }
 0x39d   :  { %1348 = vmatpush1.bf16.msra.mxu0 %v4403_v7  ;;  %1389 = vmatpush1.bf16.msra.mxu1 %v4406_v58  ;;  %v4421_v7 = vld [vmem:[#allocation5 + $0x104] ss:$16 sps:$4 sm:$0xff]   ;;  %v4424_v58 = vld [vmem:[#allocation5 + $0x10c] ss:$16 sps:$4 sm:$0xff]  }
 0x39e   :  { %1349 = vmatprep.subr.bf16.mxu0 %v4409_v9  ;;  %1390 = vmatprep.subr.bf16.mxu1 %v4412_v11  ;;  %6497 = vst [vmem:[#allocation44_spill] sm:$0xff] %v4421_v7  ;;  %6498 = vst [vmem:[#allocation41_spill] sm:$0xff] %v4424_v58  ;;  %v4427_v9 = vld [vmem:[#allocation5 + $0x100] ss:$16 sps:$4 sm:$0xff]   ;;  %v4430_v11 = vld [vmem:[#allocation5 + $0x108] ss:$16 sps:$4 sm:$0xff]  }
 0x39f   :  { %6499 = vst [vmem:[#allocation45_spill] sm:$0xff] %v4427_v9  ;;  %6500 = vst [vmem:[#allocation43_spill] sm:$0xff] %v4430_v11 }
 0x3a1   :  { %1350 = vmatpush1.bf16.msra.mxu0 %v4415_v50  ;;  %1391 = vmatpush1.bf16.msra.mxu1 %v4418_v53  ;;  %v4433_v50 = vld [vmem:[#allocation5 + $0x124] ss:$16 sps:$4 sm:$0xff]   ;;  %v4436_v53 = vld [vmem:[#allocation5 + $0x12c] ss:$16 sps:$4 sm:$0xff]  }
 0x3a2   :  { %1351 = vmatprep.subr.bf16.mxu0 %v4421_v7  ;;  %1392 = vmatprep.subr.bf16.mxu1 %v4424_v58  ;;  %6501 = vst [vmem:[#allocation46_spill] sm:$0xff] %v4433_v50  ;;  %6502 = vst [vmem:[#allocation47_spill] sm:$0xff] %v4436_v53  ;;  %v4439_v7 = vld [vmem:[#allocation5 + $0x120] ss:$16 sps:$4 sm:$0xff]   ;;  %v4442_v58 = vld [vmem:[#allocation5 + $0x128] ss:$16 sps:$4 sm:$0xff]  }
 0x3a3   :  { %6503 = vst [vmem:[#allocation48_spill] sm:$0xff] %v4439_v7  ;;  %6504 = vst [vmem:[#allocation49_spill] sm:$0xff] %v4442_v58 }
 0x3a5   :  { %1352 = vmatpush1.bf16.msra.mxu0 %v4427_v9  ;;  %1393 = vmatpush1.bf16.msra.mxu1 %v4430_v11  ;;  %v4445_v9 = vld [vmem:[#allocation5 + $0x144] ss:$16 sps:$4 sm:$0xff]   ;;  %v4448_v11 = vld [vmem:[#allocation5 + $0x14c] ss:$16 sps:$4 sm:$0xff]  }
 0x3a6   :  { %1353 = vmatprep.subr.bf16.mxu0 %v4433_v50  ;;  %1394 = vmatprep.subr.bf16.mxu1 %v4436_v53  ;;  %6505 = vst [vmem:[#allocation50_spill] sm:$0xff] %v4445_v9  ;;  %6506 = vst [vmem:[#allocation51_spill] sm:$0xff] %v4448_v11  ;;  %v4451_v50 = vld [vmem:[#allocation5 + $0x140] ss:$16 sps:$4 sm:$0xff]   ;;  %v4454_v53 = vld [vmem:[#allocation5 + $0x148] ss:$16 sps:$4 sm:$0xff]  }
 0x3a7   :  { %6507 = vst [vmem:[#allocation52_spill] sm:$0xff] %v4451_v50  ;;  %6508 = vst [vmem:[#allocation53_spill] sm:$0xff] %v4454_v53 }
 0x3a9   :  { %1354 = vmatpush1.bf16.msra.mxu0 %v4439_v7  ;;  %1395 = vmatpush1.bf16.msra.mxu1 %v4442_v58  ;;  %v4457_v7 = vld [vmem:[#allocation5 + $0x164] ss:$16 sps:$4 sm:$0xff]   ;;  %v4460_v58 = vld [vmem:[#allocation5 + $0x16c] ss:$16 sps:$4 sm:$0xff]  }
 0x3aa   :  { %1355 = vmatprep.subr.bf16.mxu0 %v4445_v9  ;;  %1396 = vmatprep.subr.bf16.mxu1 %v4448_v11  ;;  %6509 = vst [vmem:[#allocation54_spill] sm:$0xff] %v4457_v7  ;;  %6510 = vst [vmem:[#allocation55_spill] sm:$0xff] %v4460_v58  ;;  %v4463_v9 = vld [vmem:[#allocation5 + $0x160] ss:$16 sps:$4 sm:$0xff]   ;;  %v4466_v11 = vld [vmem:[#allocation5 + $0x168] ss:$16 sps:$4 sm:$0xff]  }
 0x3ab   :  { %6511 = vst [vmem:[#allocation56_spill] sm:$0xff] %v4463_v9  ;;  %6512 = vst [vmem:[#allocation57_spill] sm:$0xff] %v4466_v11 }
 0x3ad   :  { %1356 = vmatpush1.bf16.msra.mxu0 %v4451_v50  ;;  %1397 = vmatpush1.bf16.msra.mxu1 %v4454_v53  ;;  %v4469_v50 = vld [vmem:[#allocation5 + $0x184] ss:$16 sps:$4 sm:$0xff]   ;;  %v4472_v53 = vld [vmem:[#allocation5 + $0x18c] ss:$16 sps:$4 sm:$0xff]  }
 0x3ae   :  { %1357 = vmatprep.subr.bf16.mxu0 %v4457_v7  ;;  %1398 = vmatprep.subr.bf16.mxu1 %v4460_v58  ;;  %6513 = vst [vmem:[#allocation58_spill] sm:$0xff] %v4469_v50  ;;  %6514 = vst [vmem:[#allocation59_spill] sm:$0xff] %v4472_v53  ;;  %v4475_v7 = vld [vmem:[#allocation5 + $0x180] ss:$16 sps:$4 sm:$0xff]   ;;  %v4478_v58 = vld [vmem:[#allocation5 + $0x188] ss:$16 sps:$4 sm:$0xff]  }
 0x3af   :  { %6515 = vst [vmem:[#allocation60_spill] sm:$0xff] %v4475_v7  ;;  %6516 = vst [vmem:[#allocation61_spill] sm:$0xff] %v4478_v58 }
 0x3b1   :  { %1358 = vmatpush1.bf16.msra.mxu0 %v4463_v9  ;;  %1399 = vmatpush1.bf16.msra.mxu1 %v4466_v11  ;;  %v4481_v9 = vld [vmem:[#allocation5 + $0x1a4] ss:$16 sps:$4 sm:$0xff]   ;;  %v4484_v11 = vld [vmem:[#allocation5 + $0x1ac] ss:$16 sps:$4 sm:$0xff]  }
 0x3b2   :  { %1359 = vmatprep.subr.bf16.mxu0 %v4469_v50  ;;  %1400 = vmatprep.subr.bf16.mxu1 %v4472_v53  ;;  %6517 = vst [vmem:[#allocation62_spill] sm:$0xff] %v4481_v9  ;;  %6518 = vst [vmem:[#allocation63_spill] sm:$0xff] %v4484_v11  ;;  %v4487_v50 = vld [vmem:[#allocation5 + $0x1a0] ss:$16 sps:$4 sm:$0xff]   ;;  %v4490_v53 = vld [vmem:[#allocation5 + $0x1a8] ss:$16 sps:$4 sm:$0xff]  }
 0x3b3   :  { %6519 = vst [vmem:[#allocation64_spill] sm:$0xff] %v4487_v50  ;;  %6520 = vst [vmem:[#allocation65_spill] sm:$0xff] %v4490_v53 }
 0x3b5   :  { %1360 = vmatpush1.bf16.msra.mxu0 %v4475_v7  ;;  %1401 = vmatpush1.bf16.msra.mxu1 %v4478_v58  ;;  %v4493_v7 = vld [vmem:[#allocation5 + $0x1c4] ss:$16 sps:$4 sm:$0xff]   ;;  %v4496_v58 = vld [vmem:[#allocation5 + $0x1cc] ss:$16 sps:$4 sm:$0xff]  }
 0x3b6   :  { %1361 = vmatprep.subr.bf16.mxu0 %v4481_v9  ;;  %1402 = vmatprep.subr.bf16.mxu1 %v4484_v11  ;;  %6521 = vst [vmem:[#allocation66_spill] sm:$0xff] %v4493_v7  ;;  %6522 = vst [vmem:[#allocation67_spill] sm:$0xff] %v4496_v58  ;;  %v4499_v9 = vld [vmem:[#allocation5 + $0x1c0] ss:$16 sps:$4 sm:$0xff]   ;;  %v4502_v11 = vld [vmem:[#allocation5 + $0x1c8] ss:$16 sps:$4 sm:$0xff]  }
 0x3b7   :  { %6523 = vst [vmem:[#allocation68_spill] sm:$0xff] %v4499_v9  ;;  %6524 = vst [vmem:[#allocation69_spill] sm:$0xff] %v4502_v11 }
 0x3b9   :  { %1362 = vmatpush1.bf16.msra.mxu0 %v4487_v50  ;;  %1403 = vmatpush1.bf16.msra.mxu1 %v4490_v53  ;;  %v4505_v50 = vld [vmem:[#allocation5 + $0x1e4] ss:$16 sps:$4 sm:$0xff]   ;;  %v4508_v53 = vld [vmem:[#allocation5 + $0x1ec] ss:$16 sps:$4 sm:$0xff]  }
 0x3ba   :  { %1363 = vmatprep.subr.bf16.mxu0 %v4493_v7  ;;  %1404 = vmatprep.subr.bf16.mxu1 %v4496_v58  ;;  %6525 = vst [vmem:[#allocation70_spill] sm:$0xff] %v4505_v50  ;;  %6526 = vst [vmem:[#allocation71_spill] sm:$0xff] %v4508_v53  ;;  %v4511_v7 = vld [vmem:[#allocation5 + $0x1e0] ss:$16 sps:$4 sm:$0xff]   ;;  %v4515_v58 = vld [vmem:[#allocation7 + $0x4] ss:$16 sps:$4 sm:$0xff]  }
 0x3bb   :  { %6527 = vst [vmem:[#allocation72_spill] sm:$0xff] %v4511_v7  ;;  %6528 = vst [vmem:[#allocation73_spill] sm:$0xff] %v4515_v58 }
 0x3bd   :  { %1364 = vmatpush1.bf16.msra.mxu0 %v4499_v9  ;;  %1405 = vmatpush1.bf16.msra.mxu1 %v4502_v11 }
 0x3be   :  { %1365 = vmatprep.subr.bf16.mxu0 %v4505_v50  ;;  %1406 = vmatprep.subr.bf16.mxu1 %v4508_v53 }
 0x3c1   :  { %1366 = vmatpush1.bf16.msra.mxu0 %v4511_v7  ;;  %1407 = vmatpush1.bf16.msra.mxu1 %v6398_v20 }
 0x3c2   :  { %1442 = vmatprep.subr.bf16.mxu0 %v4515_v58  ;;  %1483 = vmatprep.subr.bf16.mxu1 %v6400_v22 }
 0x456   :  { %v1262_v11 = vpop.f32.mrb[12].mxu0  ;;  %v1303_v9 = vpop.f32.mrb[12].mxu1 }
 0x457   :  { %v1263_v50 = vadd.f32 %v1262_v11, %v4215_v25  ;;  %v1264_v3 = vpop.f32.mrb[13].mxu0  ;;  %v1305_v55 = vpop.f32.mrb[13].mxu1  ;;  %v1304_v58 = vadd.f32 %v1303_v9, %v4223_v40 }
 0x458   :  { %v1265_v53 = vadd.f32 %v1264_v3, %v4218_v27  ;;  %v1266_v56 = vpop.f32.mrb[14].mxu0  ;;  %v1307_v52 = vpop.f32.mrb[14].mxu1  ;;  %v1306_v22 = vadd.f32 %v1305_v55, %v4226_v42 }
 0x459   :  { %v2807_v41 = vmul.f32 -1.442695, %v1263_v50  ;;  %v1267_v7 = vpop.f32.mrb[15].mxu0  ;;  %v1308_v61 = vpop.f32.mrb[15].mxu1  ;;  %v2809_v2 = vmul.f32 -1.442695, %v1304_v58 }
 0x45a   :  { %v2808_v20 = vmul.f32 -1.442695, %v1265_v53 }
 0x45b   :  { %3093 = vpow2.f32 %v2807_v41 }
 0x45c   :  { %3095 = vpow2.f32 %v2808_v20  ;;  %v4537_v20 = vld [vmem:[#allocation7 + $0x24] ss:$16 sps:$4 sm:$0xff]  }
 0x45d   :  { %3097 = vtanh.f32 %v1306_v22  ;;  %v4540_v22 = vld [vmem:[#allocation7 + $0x2c] ss:$16 sps:$4 sm:$0xff]  }
 0x45e   :  { %3099 = vpow2.f32 %v2809_v2  ;;  %v4531_v2 = vld [vmem:[#allocation7] ss:$16 sps:$4 sm:$0xff]  }
 0x465   :  { %v3094_v1 = vpop.eup %3093 }
 0x466   :  { %v1319_v46 = vadd.f32 1.0, %v3094_v1  ;;  %v3096_v11 = vpop.eup %3095 }
 0x467   :  { %v1320_v3 = vadd.f32 1.0, %v3096_v11  ;;  %v3098_v52 = vpop.eup %3097  ;;  %v4543_v11 = vld [vmem:[#allocation7 + $0x20] ss:$16 sps:$4 sm:$0xff]  }
 0x468   :  { %3101 = vrcp.f32 %v1319_v46  ;;  %v3100_v56 = vpop.eup %3099 }
 0x469   :  { %3103 = vrcp.f32 %v1320_v3  ;;  %v1321_v41 = vadd.f32 1.0, %v3100_v56  ;;  %v4547_v3 = vld [vmem:[#allocation7 + $0x44] ss:$16 sps:$4 sm:$0xff]  }
 0x46a   :  { %v4555_v56 = vld [vmem:[#allocation7 + $0x64] ss:$16 sps:$4 sm:$0xff]  }
 0x46b   :  { %3105 = vrcp.f32 %v1321_v41 }
 0x472   :  { %v3102_v7 = vpop.eup %3101 }
 0x473   :  { %v1330_v61 = vmul.f32 %v3102_v7, %v3098_v52  ;;  %v3104_v53 = vpop.eup %3103  ;;  %v4551_v52 = vld [vmem:[#allocation7 + $0x40] ss:$16 sps:$4 sm:$0xff]  }
 0x474   :  { %v1329_v50 = vmul.f32 %v3104_v53, %v4233_v49  ;;  %v4534_v49 = vld [vmem:[#allocation7 + $0x8] ss:$16 sps:$4 sm:$0xff]   ;;  %v4559_v7 = vld [vmem:[#allocation7 + $0x60] ss:$16 sps:$4 sm:$0xff]  }
 0x475   :  { %v3106_v1 = vpop.eup %3105  ;;  %6529 = vst [vmem:[#allocation74_spill] sm:$0xff] %v4559_v7 }
 0x476   :  { %v4524_v9 = vadd.f32 %v1330_v61, %v1329_v50 }
 0x478   :  { %3107 = vtanh.f32 %v4524_v9 }
 0x482   :  { %v3108_v55 = vpop.eup %3107 }
 0x483   :  { %v4527_v58 = vmul.f32 %v3108_v55, %v3106_v1 }
 0x485   :  { %v1334_v46 = vpack.c.bf16 %v4527_v58, %v4527_v58 }
 0x487   :  { %1368 = vmatmul.mubr.bf16.vlgmr.msra.gmra.mrb[16].mxu0 %v1334_v46  ;;  %1409 = vmatmul.mubr.bf16.vlgmr.msra.gmra.mrb[16].mxu1 %v1334_v46 }
 0x488   :  { %1474 = vmatprep.mubr.bf16.mxu0 %v1334_v46  ;;  %1515 = vmatprep.mubr.bf16.mxu1 %v1334_v46 }
 0x489   :  { %1443 = vmatpush1.bf16.msra.mxu0 %v4531_v2  ;;  %1484 = vmatpush1.bf16.msra.mxu1 %v4534_v49 }
 0x48a   :  { %1444 = vmatprep.subr.bf16.mxu0 %v4537_v20  ;;  %1485 = vmatprep.subr.bf16.mxu1 %v4540_v22 }
 0x48d   :  { %1445 = vmatpush1.bf16.msra.mxu0 %v4543_v11  ;;  %1486 = vmatpush1.bf16.msra.mxu1 %v6409_v6  ;;  %v6530_v6 = vld [vmem:[#allocation78_spill] sm:$0xff] }
 0x48e   :  { %1446 = vmatprep.subr.bf16.mxu0 %v4547_v3  ;;  %1487 = vmatprep.subr.bf16.mxu1 %v6411_v8  ;;  %v6531_v8 = vld [vmem:[#allocation79_spill] sm:$0xff] }
 0x491   :  { %1447 = vmatpush1.bf16.msra.mxu0 %v4551_v52  ;;  %1488 = vmatpush1.bf16.msra.mxu1 %v6413_v10  ;;  %v6532_v10 = vld [vmem:[#allocation80_spill] sm:$0xff] }
 0x492   :  { %1448 = vmatprep.subr.bf16.mxu0 %v4555_v56  ;;  %1489 = vmatprep.subr.bf16.mxu1 %v6415_v12  ;;  %v6533_v12 = vld [vmem:[#allocation81_spill] sm:$0xff] }
 0x495   :  { %1449 = vmatpush1.bf16.msra.mxu0 %v4559_v7  ;;  %1490 = vmatpush1.bf16.msra.mxu1 %v6417_v14  ;;  %v6534_v14 = vld [vmem:[#allocation82_spill] sm:$0xff] }
 0x496   :  { %1450 = vmatprep.subr.bf16.mxu0 %v6418_v15  ;;  %1491 = vmatprep.subr.bf16.mxu1 %v6419_v16  ;;  %v6535_v15 = vld [vmem:[#allocation83_spill] sm:$0xff]  ;;  %v6536_v16 = vld [vmem:[#allocation84_spill] sm:$0xff] }
 0x499   :  { %1451 = vmatpush1.bf16.msra.mxu0 %v6420_v17  ;;  %1492 = vmatpush1.bf16.msra.mxu1 %v6421_v18  ;;  %v6537_v17 = vld [vmem:[#allocation85_spill] sm:$0xff]  ;;  %v6538_v18 = vld [vmem:[#allocation86_spill] sm:$0xff] }
 0x49a   :  { %1452 = vmatprep.subr.bf16.mxu0 %v6422_v19  ;;  %1493 = vmatprep.subr.bf16.mxu1 %v6423_v21  ;;  %v6539_v19 = vld [vmem:[#allocation87_spill] sm:$0xff]  ;;  %v6540_v21 = vld [vmem:[#allocation88_spill] sm:$0xff] }
 0x49d   :  { %1453 = vmatpush1.bf16.msra.mxu0 %v6424_v23  ;;  %1494 = vmatpush1.bf16.msra.mxu1 %v6425_v28  ;;  %v6541_v23 = vld [vmem:[#allocation89_spill] sm:$0xff]  ;;  %v6542_v28 = vld [vmem:[#allocation90_spill] sm:$0xff] }
 0x49e   :  { %1454 = vmatprep.subr.bf16.mxu0 %v6426_v29  ;;  %1495 = vmatprep.subr.bf16.mxu1 %v6427_v30  ;;  %v6543_v29 = vld [vmem:[#allocation91_spill] sm:$0xff]  ;;  %v6544_v30 = vld [vmem:[#allocation92_spill] sm:$0xff] }
 0x4a1   :  { %1455 = vmatpush1.bf16.msra.mxu0 %v6428_v31  ;;  %1496 = vmatpush1.bf16.msra.mxu1 %v6429_v32  ;;  %v6545_v31 = vld [vmem:[#allocation93_spill] sm:$0xff]  ;;  %v6546_v32 = vld [vmem:[#allocation94_spill] sm:$0xff] }
 0x4a2   :  { %1456 = vmatprep.subr.bf16.mxu0 %v6430_v33  ;;  %1497 = vmatprep.subr.bf16.mxu1 %v6431_v34  ;;  %v6547_v33 = vld [vmem:[#allocation12_spill] sm:$0xff]  ;;  %v6548_v34 = vld [vmem:[#allocation17_spill] sm:$0xff] }
 0x4a5   :  { %1457 = vmatpush1.bf16.msra.mxu0 %v6432_v35  ;;  %1498 = vmatpush1.bf16.msra.mxu1 %v6433_v36 }
 0x4a6   :  { %1458 = vmatprep.subr.bf16.mxu0 %v6434_v37  ;;  %1499 = vmatprep.subr.bf16.mxu1 %v6435_v38  ;;  %v6549_v37 = vld [vmem:[#allocation13_spill] sm:$0xff] }
 0x4a9   :  { %1459 = vmatpush1.bf16.msra.mxu0 %v6436_v39  ;;  %1500 = vmatpush1.bf16.msra.mxu1 %v6437_v44 }
 0x4aa   :  { %1460 = vmatprep.subr.bf16.mxu0 %v6438_v45  ;;  %1501 = vmatprep.subr.bf16.mxu1 %v6439_v48 }
 0x4ad   :  { %1461 = vmatpush1.bf16.msra.mxu0 %v6440_v54  ;;  %1502 = vmatpush1.bf16.msra.mxu1 %v6441_v57 }
 0x4ae   :  { %1462 = vmatprep.subr.bf16.mxu0 %v6442_v59  ;;  %1503 = vmatprep.subr.bf16.mxu1 %v6443_v51 }
 0x4b1   :  { %1463 = vmatpush1.bf16.msra.mxu0 %v6444_v60  ;;  %1504 = vmatpush1.bf16.msra.mxu1 %v6445_v43 }
 0x4b2   :  { %1464 = vmatprep.subr.bf16.mxu0 %v6446_v62  ;;  %1505 = vmatprep.subr.bf16.mxu1 %v6447_v0 }
 0x4b5   :  { %1465 = vmatpush1.bf16.msra.mxu0 %v6448_v47  ;;  %1506 = vmatpush1.bf16.msra.mxu1 %v6530_v6 }
 0x4b6   :  { %1466 = vmatprep.subr.bf16.mxu0 %v6531_v8  ;;  %1507 = vmatprep.subr.bf16.mxu1 %v6532_v10 }
 0x4b9   :  { %1467 = vmatpush1.bf16.msra.mxu0 %v6533_v12  ;;  %1508 = vmatpush1.bf16.msra.mxu1 %v6534_v14 }
 0x4ba   :  { %1468 = vmatprep.subr.bf16.mxu0 %v6535_v15  ;;  %1509 = vmatprep.subr.bf16.mxu1 %v6536_v16 }
 0x4bd   :  { %1469 = vmatpush1.bf16.msra.mxu0 %v6537_v17  ;;  %1510 = vmatpush1.bf16.msra.mxu1 %v6538_v18  ;;  %v6550_v18 = vld [vmem:[#allocation18_spill] sm:$0xff] }
 0x4be   :  { %1470 = vmatprep.subr.bf16.mxu0 %v6539_v19  ;;  %1511 = vmatprep.subr.bf16.mxu1 %v6540_v21  ;;  %v6552_v19 = vld [vmem:[#allocation21_spill] sm:$0xff]  ;;  %v6553_v21 = vld [vmem:[#allocation16_spill] sm:$0xff] }
 0x4c1   :  { %1471 = vmatpush1.bf16.msra.mxu0 %v6541_v23  ;;  %1512 = vmatpush1.bf16.msra.mxu1 %v6542_v28  ;;  %v6554_v23 = vld [vmem:[#allocation23_spill] sm:$0xff] }
 0x4c2   :  { %1472 = vmatprep.subr.bf16.mxu0 %v6543_v29  ;;  %1513 = vmatprep.subr.bf16.mxu1 %v6544_v30  ;;  %v6555_v28 = vld [vmem:[#allocation19_spill] sm:$0xff]  ;;  %v6556_v29 = vld [vmem:[#allocation25_spill] sm:$0xff]  ;;  %v6557_v30 = vld [vmem:[#allocation20_spill] sm:$0xff] }
 0x4c5   :  { %1473 = vmatpush1.bf16.msra.mxu0 %v6545_v31  ;;  %1514 = vmatpush1.bf16.msra.mxu1 %v6546_v32  ;;  %v6558_v31 = vld [vmem:[#allocation26_spill] sm:$0xff] }
 0x4c6   :  { %1549 = vmatprep.subr.bf16.mxu0 %v6547_v33  ;;  %1590 = vmatprep.subr.bf16.mxu1 %v6548_v34  ;;  %v6559_v32 = vld [vmem:[#allocation22_spill] sm:$0xff] }
 0x55a   :  { %v1369_v35 = vpop.f32.mrb[16].mxu0  ;;  %v1410_v36 = vpop.f32.mrb[16].mxu1 }
 0x55b   :  { %v1370_v38 = vadd.f32 %v1369_v35, %v6549_v37  ;;  %v1371_v39 = vpop.f32.mrb[17].mxu0  ;;  %v1412_v44 = vpop.f32.mrb[17].mxu1  ;;  %v1411_v43 = vadd.f32 %v1410_v36, %v4320_v24  ;;  %v6560_v35 = vld [vmem:[#allocation28_spill] sm:$0xff] }
 0x55c   :  { %v1372_v45 = vadd.f32 %v1371_v39, %v4315_v13  ;;  %v1373_v48 = vpop.f32.mrb[18].mxu0  ;;  %v1414_v54 = vpop.f32.mrb[18].mxu1  ;;  %v1413_v62 = vadd.f32 %v1412_v44, %v4323_v26  ;;  %v6561_v36 = vld [vmem:[#allocation24_spill] sm:$0xff]  ;;  %v6563_v39 = vld [vmem:[#allocation27_spill] sm:$0xff] }
 0x55d   :  { %v2810_v57 = vmul.f32 -1.442695, %v1370_v38  ;;  %v1374_v59 = vpop.f32.mrb[19].mxu0  ;;  %v1415_v51 = vpop.f32.mrb[19].mxu1  ;;  %v2812_v0 = vmul.f32 -1.442695, %v1411_v43 }
 0x55e   :  { %v2811_v60 = vmul.f32 -1.442695, %v1372_v45  ;;  %v6562_v38 = vld [vmem:[#allocation30_spill] sm:$0xff]  ;;  %v6564_v44 = vld [vmem:[#allocation32_spill] sm:$0xff]  ;;  %v6565_v45 = vld [vmem:[#allocation29_spill] sm:$0xff] }
 0x55f   :  { %3109 = vpow2.f32 %v2810_v57  ;;  %v6566_v48 = vld [vmem:[#allocation34_spill] sm:$0xff]  ;;  %v6567_v54 = vld [vmem:[#allocation95_spill] sm:$0xff]  ;;  %v6568_v57 = vld [vmem:[#allocation96_spill] sm:$0xff] }
 0x560   :  { %3111 = vpow2.f32 %v2811_v60  ;;  %v6569_v59 = vld [vmem:[#allocation31_spill] sm:$0xff]  ;;  %v6570_v51 = vld [vmem:[#allocation36_spill] sm:$0xff]  ;;  %v6571_v60 = vld [vmem:[#allocation33_spill] sm:$0xff] }
 0x561   :  { %3113 = vtanh.f32 %v1413_v62  ;;  %v6572_v43 = vld [vmem:[#allocation38_spill] sm:$0xff]  ;;  %v6573_v62 = vld [vmem:[#allocation35_spill] sm:$0xff] }
 0x562   :  { %3115 = vpow2.f32 %v2812_v0  ;;  %v6574_v0 = vld [vmem:[#allocation40_spill] sm:$0xff] }
 0x569   :  { %v3110_v47 = vpop.eup %3109 }
 0x56a   :  { %v1426_v61 = vadd.f32 1.0, %v3110_v47  ;;  %v3112_v53 = vpop.eup %3111  ;;  %v6575_v47 = vld [vmem:[#allocation37_spill] sm:$0xff] }
 0x56b   :  { %v1427_v41 = vadd.f32 1.0, %v3112_v53  ;;  %v3114_v50 = vpop.eup %3113  ;;  %v6577_v53 = vld [vmem:[#allocation39_spill] sm:$0xff] }
 0x56c   :  { %3117 = vrcp.f32 %v1426_v61  ;;  %v3116_v1 = vpop.eup %3115  ;;  %v6576_v61 = vld [vmem:[#allocation42_spill] sm:$0xff] }
 0x56d   :  { %3119 = vrcp.f32 %v1427_v41  ;;  %v1428_v8 = vadd.f32 1.0, %v3116_v1  ;;  %v6578_v41 = vld [vmem:[#allocation44_spill] sm:$0xff]  ;;  %v6580_v1 = vld [vmem:[#allocation45_spill] sm:$0xff] }
 0x56f   :  { %3121 = vrcp.f32 %v1428_v8  ;;  %v6584_v8 = vld [vmem:[#allocation48_spill] sm:$0xff] }
 0x576   :  { %v3118_v55 = vpop.eup %3117 }
 0x577   :  { %v1437_v46 = vmul.f32 %v3118_v55, %v3114_v50  ;;  %v3120_v6 = vpop.eup %3119  ;;  %v6579_v50 = vld [vmem:[#allocation41_spill] sm:$0xff]  ;;  %v6581_v55 = vld [vmem:[#allocation43_spill] sm:$0xff] }
 0x578   :  { %v1436_v10 = vmul.f32 %v3120_v6, %v4328_v5  ;;  %v6551_v5 = vld [vmem:[#allocation15_spill] sm:$0xff] }
 0x579   :  { %v3122_v14 = vpop.eup %3121  ;;  %v6583_v6 = vld [vmem:[#allocation47_spill] sm:$0xff] }
 0x57a   :  { %v4618_v12 = vadd.f32 %v1437_v46, %v1436_v10  ;;  %v6582_v46 = vld [vmem:[#allocation46_spill] sm:$0xff]  ;;  %v6585_v10 = vld [vmem:[#allocation49_spill] sm:$0xff] }
 0x57c   :  { %3123 = vtanh.f32 %v4618_v12 }
 0x586   :  { %v3124_v15 = vpop.eup %3123 }
 0x587   :  { %v1440_v16 = vmul.f32 %v3124_v15, %v3122_v14  ;;  %v6586_v14 = vld [vmem:[#allocation50_spill] sm:$0xff]  ;;  %v6587_v15 = vld [vmem:[#allocation51_spill] sm:$0xff] }
 0x589   :  { %v1441_v17 = vpack.c.bf16 %v1440_v16, %v1440_v16  ;;  %v6588_v16 = vld [vmem:[#allocation52_spill] sm:$0xff] }
 0x58b   :  { %1475 = vmatmul.mubr.bf16.vlgmr.msra.gmra.mrb[20].mxu0 %v1441_v17  ;;  %1516 = vmatmul.mubr.bf16.vlgmr.msra.gmra.mrb[20].mxu1 %v1441_v17 }
 0x58c   :  { %1581 = vmatprep.mubr.bf16.mxu0 %v1441_v17  ;;  %1622 = vmatprep.mubr.bf16.mxu1 %v1441_v17  ;;  %v6589_v17 = vld [vmem:[#allocation53_spill] sm:$0xff] }
 0x58d   :  { %1550 = vmatpush1.bf16.msra.mxu0 %v4331_v63  ;;  %1591 = vmatpush1.bf16.msra.mxu1 %v4334_v4 }
 0x58e   :  { %1551 = vmatprep.subr.bf16.mxu0 %v6550_v18  ;;  %1592 = vmatprep.subr.bf16.mxu1 %v6551_v5 }
 0x591   :  { %1552 = vmatpush1.bf16.msra.mxu0 %v6552_v19  ;;  %1593 = vmatpush1.bf16.msra.mxu1 %v6553_v21 }
 0x592   :  { %1553 = vmatprep.subr.bf16.mxu0 %v6554_v23  ;;  %1594 = vmatprep.subr.bf16.mxu1 %v6555_v28 }
 0x595   :  { %1554 = vmatpush1.bf16.msra.mxu0 %v6556_v29  ;;  %1595 = vmatpush1.bf16.msra.mxu1 %v6557_v30 }
 0x596   :  { %1555 = vmatprep.subr.bf16.mxu0 %v6558_v31  ;;  %1596 = vmatprep.subr.bf16.mxu1 %v6559_v32 }
 0x599   :  { %1556 = vmatpush1.bf16.msra.mxu0 %v6560_v35  ;;  %1597 = vmatpush1.bf16.msra.mxu1 %v6561_v36 }
 0x59a   :  { %1557 = vmatprep.subr.bf16.mxu0 %v6562_v38  ;;  %1598 = vmatprep.subr.bf16.mxu1 %v6563_v39 }
 0x59d   :  { %1558 = vmatpush1.bf16.msra.mxu0 %v6564_v44  ;;  %1599 = vmatpush1.bf16.msra.mxu1 %v6565_v45 }
 0x59e   :  { %1559 = vmatprep.subr.bf16.mxu0 %v6566_v48  ;;  %1600 = vmatprep.subr.bf16.mxu1 %v6567_v54 }
 0x5a1   :  { %1560 = vmatpush1.bf16.msra.mxu0 %v6568_v57  ;;  %1601 = vmatpush1.bf16.msra.mxu1 %v6569_v59 }
 0x5a2   :  { %1561 = vmatprep.subr.bf16.mxu0 %v6570_v51  ;;  %1602 = vmatprep.subr.bf16.mxu1 %v6571_v60 }
 0x5a5   :  { %1562 = vmatpush1.bf16.msra.mxu0 %v6572_v43  ;;  %1603 = vmatpush1.bf16.msra.mxu1 %v6573_v62 }
 0x5a6   :  { %1563 = vmatprep.subr.bf16.mxu0 %v6574_v0  ;;  %1604 = vmatprep.subr.bf16.mxu1 %v6575_v47 }
 0x5a9   :  { %1564 = vmatpush1.bf16.msra.mxu0 %v6576_v61  ;;  %1605 = vmatpush1.bf16.msra.mxu1 %v6577_v53 }
 0x5aa   :  { %1565 = vmatprep.subr.bf16.mxu0 %v6578_v41  ;;  %1606 = vmatprep.subr.bf16.mxu1 %v6579_v50  ;;  %v6590_v50 = vld [vmem:[#allocation54_spill] sm:$0xff] }
 0x5ad   :  { %1566 = vmatpush1.bf16.msra.mxu0 %v6580_v1  ;;  %1607 = vmatpush1.bf16.msra.mxu1 %v6581_v55  ;;  %v6591_v1 = vld [vmem:[#allocation55_spill] sm:$0xff]  ;;  %v6592_v55 = vld [vmem:[#allocation56_spill] sm:$0xff] }
 0x5ae   :  { %1567 = vmatprep.subr.bf16.mxu0 %v6582_v46  ;;  %1608 = vmatprep.subr.bf16.mxu1 %v6583_v6  ;;  %v6593_v46 = vld [vmem:[#allocation57_spill] sm:$0xff]  ;;  %v6594_v6 = vld [vmem:[#allocation58_spill] sm:$0xff] }
 0x5b1   :  { %1568 = vmatpush1.bf16.msra.mxu0 %v6584_v8  ;;  %1609 = vmatpush1.bf16.msra.mxu1 %v6585_v10  ;;  %v6595_v8 = vld [vmem:[#allocation59_spill] sm:$0xff]  ;;  %v6596_v10 = vld [vmem:[#allocation60_spill] sm:$0xff] }
 0x5b2   :  { %1569 = vmatprep.subr.bf16.mxu0 %v6586_v14  ;;  %1610 = vmatprep.subr.bf16.mxu1 %v6587_v15  ;;  %v6597_v14 = vld [vmem:[#allocation61_spill] sm:$0xff]  ;;  %v6598_v15 = vld [vmem:[#allocation62_spill] sm:$0xff] }
 0x5b5   :  { %1570 = vmatpush1.bf16.msra.mxu0 %v6588_v16  ;;  %1611 = vmatpush1.bf16.msra.mxu1 %v6589_v17  ;;  %v6599_v16 = vld [vmem:[#allocation63_spill] sm:$0xff]  ;;  %v6600_v17 = vld [vmem:[#allocation64_spill] sm:$0xff] }
 0x5b6   :  { %1571 = vmatprep.subr.bf16.mxu0 %v6590_v50  ;;  %1612 = vmatprep.subr.bf16.mxu1 %v6591_v1  ;;  %v6601_v50 = vld [vmem:[#allocation65_spill] sm:$0xff]  ;;  %v6602_v1 = vld [vmem:[#allocation66_spill] sm:$0xff] }
 0x5b9   :  { %1572 = vmatpush1.bf16.msra.mxu0 %v6592_v55  ;;  %1613 = vmatpush1.bf16.msra.mxu1 %v6593_v46  ;;  %v6603_v55 = vld [vmem:[#allocation67_spill] sm:$0xff]  ;;  %v6604_v46 = vld [vmem:[#allocation68_spill] sm:$0xff] }
 0x5ba   :  { %1573 = vmatprep.subr.bf16.mxu0 %v6594_v6  ;;  %1614 = vmatprep.subr.bf16.mxu1 %v6595_v8  ;;  %v6605_v6 = vld [vmem:[#allocation69_spill] sm:$0xff]  ;;  %v6606_v8 = vld [vmem:[#allocation70_spill] sm:$0xff] }
 0x5bd   :  { %1574 = vmatpush1.bf16.msra.mxu0 %v6596_v10  ;;  %1615 = vmatpush1.bf16.msra.mxu1 %v6597_v14  ;;  %v6607_v10 = vld [vmem:[#allocation71_spill] sm:$0xff]  ;;  %v6608_v14 = vld [vmem:[#allocation72_spill] sm:$0xff] }
 0x5be   :  { %1575 = vmatprep.subr.bf16.mxu0 %v6598_v15  ;;  %1616 = vmatprep.subr.bf16.mxu1 %v6599_v16  ;;  %v4682_v15 = vld [vmem:[#allocation5 + $0x1e8] ss:$16 sps:$4 sm:$0xff]  }
 0x5bf   :  { %6609 = vst [vmem:[#allocation75_spill] sm:$0xff] %v4682_v15 }
 0x5c1   :  { %1576 = vmatpush1.bf16.msra.mxu0 %v6600_v17  ;;  %1617 = vmatpush1.bf16.msra.mxu1 %v6601_v50  ;;  %v6610_v17 = vld [vmem:[#allocation73_spill] sm:$0xff]  ;;  %v4686_v50 = vld [vmem:[#allocation7 + $0xc] ss:$16 sps:$4 sm:$0xff]  }
 0x5c2   :  { %1577 = vmatprep.subr.bf16.mxu0 %v6602_v1  ;;  %1618 = vmatprep.subr.bf16.mxu1 %v6603_v55  ;;  %6611 = vst [vmem:[#allocation76_spill] sm:$0xff] %v4686_v50 }
 0x5c5   :  { %1578 = vmatpush1.bf16.msra.mxu0 %v6604_v46  ;;  %1619 = vmatpush1.bf16.msra.mxu1 %v6605_v6 }
 0x5c6   :  { %1579 = vmatprep.subr.bf16.mxu0 %v6606_v8  ;;  %1620 = vmatprep.subr.bf16.mxu1 %v6607_v10 }
 0x5c9   :  { %1580 = vmatpush1.bf16.msra.mxu0 %v6608_v14  ;;  %1621 = vmatpush1.bf16.msra.mxu1 %v4682_v15 }
 0x5ca   :  { %1656 = vmatprep.subr.bf16.mxu0 %v6610_v17  ;;  %1697 = vmatprep.subr.bf16.mxu1 %v4686_v50 }
 0x65e   :  { %v1476_v55 = vpop.f32.mrb[20].mxu0  ;;  %v1517_v46 = vpop.f32.mrb[20].mxu1 }
 0x65f   :  { %v1477_v6 = vadd.f32 %v1476_v55, %v4215_v25  ;;  %v1478_v1 = vpop.f32.mrb[21].mxu0  ;;  %v1519_v8 = vpop.f32.mrb[21].mxu1  ;;  %v1518_v17 = vadd.f32 %v1517_v46, %v4223_v40 }
 0x660   :  { %v1479_v10 = vadd.f32 %v1478_v1, %v4218_v27  ;;  %v1480_v16 = vpop.f32.mrb[22].mxu0  ;;  %v1521_v14 = vpop.f32.mrb[22].mxu1  ;;  %v1520_v50 = vadd.f32 %v1519_v8, %v4226_v42 }
 0x661   :  { %v2813_v41 = vmul.f32 -1.442695, %v1477_v6  ;;  %v1481_v53 = vpop.f32.mrb[23].mxu0  ;;  %v1522_v61 = vpop.f32.mrb[23].mxu1  ;;  %v2815_v47 = vmul.f32 -1.442695, %v1518_v17 }
 0x662   :  { %v2814_v15 = vmul.f32 -1.442695, %v1479_v10  ;;  %v6612_v17 = vld [vmem:[#allocation14_spill] sm:$0xff] }
 0x663   :  { %3125 = vpow2.f32 %v2813_v41 }
 0x664   :  { %3127 = vpow2.f32 %v2814_v15 }
 0x665   :  { %3129 = vtanh.f32 %v1520_v50 }
 0x666   :  { %3131 = vpow2.f32 %v2815_v47  ;;  %v2619_v47 = vrot.slane %v4527_v58, 7  ;;  %v4710_v58 = vld [vmem:[#allocation7 + $0x4c] ss:$16 sps:$4 sm:$0xff]  }
 0x66d   :  { %v3126_v0 = vpop.eup %3125 }
 0x66e   :  { %v1533_v62 = vadd.f32 1.0, %v3126_v0  ;;  %v3128_v55 = vpop.eup %3127 }
 0x66f   :  { %v1534_v1 = vadd.f32 1.0, %v3128_v55  ;;  %v3130_v14 = vpop.eup %3129  ;;  %v2640_v55 = vsel %vm2639_vm0, %v6612_v17, %v2619_v47  ;;  %v4743_v47 = vld [vmem:[#allocation7 + $0xa0] ss:$16 sps:$4 sm:$0xff]  }
 0x670   :  { %3133 = vrcp.f32 %v1533_v62  ;;  %v3132_v6 = vpop.eup %3131  ;;  %6621 = vst [vmem:[#allocation85_spill] sm:$0xff] %v4743_v47  ;;  %v4755_v17 = vld [vmem:[#allocation7 + $0xc0] ss:$16 sps:$4 sm:$0xff]  }
 0x671   :  { %3135 = vrcp.f32 %v1534_v1  ;;  %v1535_v41 = vadd.f32 1.0, %v3132_v6  ;;  %v4718_v6 = vld [vmem:[#allocation7 + $0x6c] ss:$16 sps:$4 sm:$0xff]   ;;  %6625 = vst [vmem:[#allocation89_spill] sm:$0xff] %v4755_v17 }
 0x672   :  { %6613 = vst [vmem:[#allocation77_spill] sm:$0xff] %v4718_v6 }
 0x673   :  { %3137 = vrcp.f32 %v1535_v41  ;;  %v4731_v41 = vld [vmem:[#allocation7 + $0x80] ss:$16 sps:$4 sm:$0xff]  }
 0x674   :  { %6617 = vst [vmem:[#allocation81_spill] sm:$0xff] %v4731_v41 }
 0x67a   :  { %v3134_v53 = vpop.eup %3133 }
 0x67b   :  { %v1544_v61 = vmul.f32 %v3134_v53, %v3130_v14  ;;  %v3136_v10 = vpop.eup %3135  ;;  %v4714_v14 = vld [vmem:[#allocation7 + $0x48] ss:$16 sps:$4 sm:$0xff]  }
 0x67c   :  { %v1543_v15 = vmul.f32 %v3136_v10, %v4524_v9  ;;  %v4706_v9 = vld [vmem:[#allocation7 + $0x28] ss:$16 sps:$4 sm:$0xff]   ;;  %v4728_v10 = vld [vmem:[#allocation7 + $0x8c] ss:$16 sps:$4 sm:$0xff]  }
 0x67d   :  { %v3138_v0 = vpop.eup %3137  ;;  %v4722_v53 = vld [vmem:[#allocation7 + $0x68] ss:$16 sps:$4 sm:$0xff]   ;;  %6616 = vst [vmem:[#allocation80_spill] sm:$0xff] %v4728_v10 }
 0x67e   :  { %v4694_v46 = vadd.f32 %v1544_v61, %v1543_v15  ;;  %6614 = vst [vmem:[#allocation78_spill] sm:$0xff] %v4722_v53  ;;  %v4725_v61 = vld [vmem:[#allocation7 + $0x84] ss:$16 sps:$4 sm:$0xff]   ;;  %v4734_v15 = vld [vmem:[#allocation7 + $0x88] ss:$16 sps:$4 sm:$0xff]  }
 0x67f   :  { %6615 = vst [vmem:[#allocation79_spill] sm:$0xff] %v4725_v61  ;;  %6618 = vst [vmem:[#allocation82_spill] sm:$0xff] %v4734_v15 }
 0x680   :  { %3139 = vtanh.f32 %v4694_v46 }
 0x68a   :  { %v3140_v50 = vpop.eup %3139 }
 0x68b   :  { %v1547_v62 = vmul.f32 %v3140_v50, %v3138_v0  ;;  %v4737_v0 = vld [vmem:[#allocation7 + $0xa4] ss:$16 sps:$4 sm:$0xff]   ;;  %v4740_v50 = vld [vmem:[#allocation7 + $0xac] ss:$16 sps:$4 sm:$0xff]  }
 0x68c   :  { %6619 = vst [vmem:[#allocation83_spill] sm:$0xff] %v4737_v0  ;;  %6620 = vst [vmem:[#allocation84_spill] sm:$0xff] %v4740_v50 }
 0x68d   :  { %v1548_v8 = vpack.c.bf16 %v1547_v62, %v1547_v62  ;;  %v2622_v16 = vrot.slane %v1547_v62, 6  ;;  %v4746_v62 = vld [vmem:[#allocation7 + $0xa8] ss:$16 sps:$4 sm:$0xff]  }
 0x68e   :  { %6622 = vst [vmem:[#allocation86_spill] sm:$0xff] %v4746_v62 }
 0x68f   :  { %1582 = vmatmul.mubr.bf16.vlgmr.msra.gmra.mrb[24].mxu0 %v1548_v8  ;;  %1623 = vmatmul.mubr.bf16.vlgmr.msra.gmra.mrb[24].mxu1 %v1548_v8  ;;  %v4699_v1 = vsel %vm2641_vm1, %v2640_v55, %v2622_v16  ;;  %v4752_v16 = vld [vmem:[#allocation7 + $0xcc] ss:$16 sps:$4 sm:$0xff]   ;;  %v4758_v55 = vld [vmem:[#allocation7 + $0xc8] ss:$16 sps:$4 sm:$0xff]  }
 0x690   :  { %1688 = vmatprep.mubr.bf16.mxu0 %v1548_v8  ;;  %1729 = vmatprep.mubr.bf16.mxu1 %v1548_v8  ;;  %v4749_v8 = vld [vmem:[#allocation7 + $0xc4] ss:$16 sps:$4 sm:$0xff]   ;;  %6624 = vst [vmem:[#allocation88_spill] sm:$0xff] %v4752_v16  ;;  %6626 = vst [vmem:[#allocation90_spill] sm:$0xff] %v4758_v55 }
 0x691   :  { %1657 = vmatpush1.bf16.msra.mxu0 %v4531_v2  ;;  %1698 = vmatpush1.bf16.msra.mxu1 %v4534_v49  ;;  %6623 = vst [vmem:[#allocation87_spill] sm:$0xff] %v4749_v8 }
 0x692   :  { %1658 = vmatprep.subr.bf16.mxu0 %v4537_v20  ;;  %1699 = vmatprep.subr.bf16.mxu1 %v4540_v22 }
 0x695   :  { %1659 = vmatpush1.bf16.msra.mxu0 %v4543_v11  ;;  %1700 = vmatpush1.bf16.msra.mxu1 %v4706_v9 }
 0x696   :  { %1660 = vmatprep.subr.bf16.mxu0 %v4547_v3  ;;  %1701 = vmatprep.subr.bf16.mxu1 %v4710_v58 }
 0x699   :  { %1661 = vmatpush1.bf16.msra.mxu0 %v4551_v52  ;;  %1702 = vmatpush1.bf16.msra.mxu1 %v4714_v14 }
 0x69a   :  { %1662 = vmatprep.subr.bf16.mxu0 %v4555_v56  ;;  %1703 = vmatprep.subr.bf16.mxu1 %v4718_v6 }
 0x69d   :  { %1663 = vmatpush1.bf16.msra.mxu0 %v4559_v7  ;;  %1704 = vmatpush1.bf16.msra.mxu1 %v4722_v53 }
 0x69e   :  { %1664 = vmatprep.subr.bf16.mxu0 %v4725_v61  ;;  %1705 = vmatprep.subr.bf16.mxu1 %v4728_v10 }
 0x6a1   :  { %1665 = vmatpush1.bf16.msra.mxu0 %v4731_v41  ;;  %1706 = vmatpush1.bf16.msra.mxu1 %v4734_v15 }
 0x6a2   :  { %1666 = vmatprep.subr.bf16.mxu0 %v4737_v0  ;;  %1707 = vmatprep.subr.bf16.mxu1 %v4740_v50 }
 0x6a5   :  { %1667 = vmatpush1.bf16.msra.mxu0 %v4743_v47  ;;  %1708 = vmatpush1.bf16.msra.mxu1 %v4746_v62  ;;  %v4761_v47 = vld [vmem:[#allocation7 + $0xe4] ss:$16 sps:$4 sm:$0xff]   ;;  %v4764_v62 = vld [vmem:[#allocation7 + $0xec] ss:$16 sps:$4 sm:$0xff]  }
 0x6a6   :  { %1668 = vmatprep.subr.bf16.mxu0 %v4749_v8  ;;  %1709 = vmatprep.subr.bf16.mxu1 %v4752_v16  ;;  %6627 = vst [vmem:[#allocation91_spill] sm:$0xff] %v4761_v47  ;;  %6628 = vst [vmem:[#allocation92_spill] sm:$0xff] %v4764_v62  ;;  %v4767_v8 = vld [vmem:[#allocation7 + $0xe0] ss:$16 sps:$4 sm:$0xff]   ;;  %v4770_v16 = vld [vmem:[#allocation7 + $0xe8] ss:$16 sps:$4 sm:$0xff]  }
 0x6a7   :  { %6629 = vst [vmem:[#allocation93_spill] sm:$0xff] %v4767_v8  ;;  %6630 = vst [vmem:[#allocation94_spill] sm:$0xff] %v4770_v16 }
 0x6a9   :  { %1669 = vmatpush1.bf16.msra.mxu0 %v4755_v17  ;;  %1710 = vmatpush1.bf16.msra.mxu1 %v4758_v55  ;;  %v4773_v17 = vld [vmem:[#allocation7 + $0x104] ss:$16 sps:$4 sm:$0xff]   ;;  %v4776_v55 = vld [vmem:[#allocation7 + $0x10c] ss:$16 sps:$4 sm:$0xff]  }
 0x6aa   :  { %1670 = vmatprep.subr.bf16.mxu0 %v4761_v47  ;;  %1711 = vmatprep.subr.bf16.mxu1 %v4764_v62  ;;  %6631 = vst [vmem:[#allocation12_spill] sm:$0xff] %v4773_v17  ;;  %6632 = vst [vmem:[#allocation17_spill] sm:$0xff] %v4776_v55  ;;  %v4779_v47 = vld [vmem:[#allocation7 + $0x100] ss:$16 sps:$4 sm:$0xff]   ;;  %v4782_v62 = vld [vmem:[#allocation7 + $0x108] ss:$16 sps:$4 sm:$0xff]  }
 0x6ab   :  { %6633 = vst [vmem:[#allocation13_spill] sm:$0xff] %v4779_v47  ;;  %6634 = vst [vmem:[#allocation18_spill] sm:$0xff] %v4782_v62 }
 0x6ad   :  { %1671 = vmatpush1.bf16.msra.mxu0 %v4767_v8  ;;  %1712 = vmatpush1.bf16.msra.mxu1 %v4770_v16  ;;  %v4785_v8 = vld [vmem:[#allocation7 + $0x124] ss:$16 sps:$4 sm:$0xff]   ;;  %v4788_v16 = vld [vmem:[#allocation7 + $0x12c] ss:$16 sps:$4 sm:$0xff]  }
 0x6ae   :  { %1672 = vmatprep.subr.bf16.mxu0 %v4773_v17  ;;  %1713 = vmatprep.subr.bf16.mxu1 %v4776_v55  ;;  %6635 = vst [vmem:[#allocation15_spill] sm:$0xff] %v4785_v8  ;;  %6636 = vst [vmem:[#allocation21_spill] sm:$0xff] %v4788_v16  ;;  %v4791_v17 = vld [vmem:[#allocation7 + $0x120] ss:$16 sps:$4 sm:$0xff]   ;;  %v4794_v55 = vld [vmem:[#allocation7 + $0x128] ss:$16 sps:$4 sm:$0xff]  }
 0x6af   :  { %6637 = vst [vmem:[#allocation16_spill] sm:$0xff] %v4791_v17  ;;  %6638 = vst [vmem:[#allocation23_spill] sm:$0xff] %v4794_v55 }
 0x6b1   :  { %1673 = vmatpush1.bf16.msra.mxu0 %v4779_v47  ;;  %1714 = vmatpush1.bf16.msra.mxu1 %v4782_v62  ;;  %v4797_v47 = vld [vmem:[#allocation7 + $0x144] ss:$16 sps:$4 sm:$0xff]   ;;  %v4800_v62 = vld [vmem:[#allocation7 + $0x14c] ss:$16 sps:$4 sm:$0xff]  }
 0x6b2   :  { %1674 = vmatprep.subr.bf16.mxu0 %v4785_v8  ;;  %1715 = vmatprep.subr.bf16.mxu1 %v4788_v16  ;;  %6639 = vst [vmem:[#allocation19_spill] sm:$0xff] %v4797_v47  ;;  %6640 = vst [vmem:[#allocation25_spill] sm:$0xff] %v4800_v62  ;;  %v4803_v8 = vld [vmem:[#allocation7 + $0x140] ss:$16 sps:$4 sm:$0xff]   ;;  %v4806_v16 = vld [vmem:[#allocation7 + $0x148] ss:$16 sps:$4 sm:$0xff]  }
 0x6b3   :  { %6641 = vst [vmem:[#allocation20_spill] sm:$0xff] %v4803_v8  ;;  %6642 = vst [vmem:[#allocation26_spill] sm:$0xff] %v4806_v16 }
 0x6b5   :  { %1675 = vmatpush1.bf16.msra.mxu0 %v4791_v17  ;;  %1716 = vmatpush1.bf16.msra.mxu1 %v4794_v55  ;;  %v4809_v17 = vld [vmem:[#allocation7 + $0x164] ss:$16 sps:$4 sm:$0xff]   ;;  %v4812_v55 = vld [vmem:[#allocation7 + $0x16c] ss:$16 sps:$4 sm:$0xff]  }
 0x6b6   :  { %1676 = vmatprep.subr.bf16.mxu0 %v4797_v47  ;;  %1717 = vmatprep.subr.bf16.mxu1 %v4800_v62  ;;  %6643 = vst [vmem:[#allocation22_spill] sm:$0xff] %v4809_v17  ;;  %6644 = vst [vmem:[#allocation28_spill] sm:$0xff] %v4812_v55  ;;  %v4815_v47 = vld [vmem:[#allocation7 + $0x160] ss:$16 sps:$4 sm:$0xff]   ;;  %v4818_v62 = vld [vmem:[#allocation7 + $0x168] ss:$16 sps:$4 sm:$0xff]  }
 0x6b7   :  { %6645 = vst [vmem:[#allocation24_spill] sm:$0xff] %v4815_v47  ;;  %6646 = vst [vmem:[#allocation30_spill] sm:$0xff] %v4818_v62 }
 0x6b9   :  { %1677 = vmatpush1.bf16.msra.mxu0 %v4803_v8  ;;  %1718 = vmatpush1.bf16.msra.mxu1 %v4806_v16  ;;  %v4821_v8 = vld [vmem:[#allocation7 + $0x184] ss:$16 sps:$4 sm:$0xff]   ;;  %v4824_v16 = vld [vmem:[#allocation7 + $0x18c] ss:$16 sps:$4 sm:$0xff]  }
 0x6ba   :  { %1678 = vmatprep.subr.bf16.mxu0 %v4809_v17  ;;  %1719 = vmatprep.subr.bf16.mxu1 %v4812_v55  ;;  %6647 = vst [vmem:[#allocation27_spill] sm:$0xff] %v4821_v8  ;;  %6648 = vst [vmem:[#allocation32_spill] sm:$0xff] %v4824_v16  ;;  %v4827_v17 = vld [vmem:[#allocation7 + $0x180] ss:$16 sps:$4 sm:$0xff]   ;;  %v4830_v55 = vld [vmem:[#allocation7 + $0x188] ss:$16 sps:$4 sm:$0xff]  }
 0x6bb   :  { %6649 = vst [vmem:[#allocation29_spill] sm:$0xff] %v4827_v17  ;;  %6650 = vst [vmem:[#allocation34_spill] sm:$0xff] %v4830_v55 }
 0x6bd   :  { %1679 = vmatpush1.bf16.msra.mxu0 %v4815_v47  ;;  %1720 = vmatpush1.bf16.msra.mxu1 %v4818_v62  ;;  %v4833_v47 = vld [vmem:[#allocation7 + $0x1a4] ss:$16 sps:$4 sm:$0xff]   ;;  %v4836_v62 = vld [vmem:[#allocation7 + $0x1ac] ss:$16 sps:$4 sm:$0xff]  }
 0x6be   :  { %1680 = vmatprep.subr.bf16.mxu0 %v4821_v8  ;;  %1721 = vmatprep.subr.bf16.mxu1 %v4824_v16  ;;  %6651 = vst [vmem:[#allocation95_spill] sm:$0xff] %v4833_v47  ;;  %6652 = vst [vmem:[#allocation96_spill] sm:$0xff] %v4836_v62  ;;  %v4839_v8 = vld [vmem:[#allocation7 + $0x1a0] ss:$16 sps:$4 sm:$0xff]   ;;  %v4842_v16 = vld [vmem:[#allocation7 + $0x1a8] ss:$16 sps:$4 sm:$0xff]  }
 0x6bf   :  { %6653 = vst [vmem:[#allocation31_spill] sm:$0xff] %v4839_v8  ;;  %6654 = vst [vmem:[#allocation36_spill] sm:$0xff] %v4842_v16 }
 0x6c1   :  { %1681 = vmatpush1.bf16.msra.mxu0 %v4827_v17  ;;  %1722 = vmatpush1.bf16.msra.mxu1 %v4830_v55  ;;  %v4845_v17 = vld [vmem:[#allocation7 + $0x1c4] ss:$16 sps:$4 sm:$0xff]   ;;  %v4848_v55 = vld [vmem:[#allocation7 + $0x1cc] ss:$16 sps:$4 sm:$0xff]  }
 0x6c2   :  { %1682 = vmatprep.subr.bf16.mxu0 %v4833_v47  ;;  %1723 = vmatprep.subr.bf16.mxu1 %v4836_v62  ;;  %6655 = vst [vmem:[#allocation33_spill] sm:$0xff] %v4845_v17  ;;  %6656 = vst [vmem:[#allocation38_spill] sm:$0xff] %v4848_v55  ;;  %v4851_v47 = vld [vmem:[#allocation7 + $0x1c0] ss:$16 sps:$4 sm:$0xff]   ;;  %v4854_v62 = vld [vmem:[#allocation7 + $0x1c8] ss:$16 sps:$4 sm:$0xff]  }
 0x6c3   :  { %6657 = vst [vmem:[#allocation14_spill] sm:$0xff] %v4851_v47  ;;  %6658 = vst [vmem:[#allocation97_spill] sm:$0xff] %v4854_v62 }
 0x6c5   :  { %1683 = vmatpush1.bf16.msra.mxu0 %v4839_v8  ;;  %1724 = vmatpush1.bf16.msra.mxu1 %v4842_v16  ;;  %v4857_v8 = vld [vmem:[#allocation7 + $0x1e4] ss:$16 sps:$4 sm:$0xff]   ;;  %v4860_v16 = vld [vmem:[#allocation7 + $0x1ec] ss:$16 sps:$4 sm:$0xff]  }
 0x6c6   :  { %1684 = vmatprep.subr.bf16.mxu0 %v4845_v17  ;;  %1725 = vmatprep.subr.bf16.mxu1 %v4848_v55  ;;  %6659 = vst [vmem:[#allocation98_spill] sm:$0xff] %v4857_v8  ;;  %6660 = vst [vmem:[#allocation99_spill] sm:$0xff] %v4860_v16  ;;  %v4863_v17 = vld [vmem:[#allocation7 + $0x1e0] ss:$16 sps:$4 sm:$0xff]   ;;  %v4866_v55 = vld [vmem:[#allocation7 + $0x1e8] ss:$16 sps:$4 sm:$0xff]  }
 0x6c7   :  { %6661 = vst [vmem:[#allocation100_spill] sm:$0xff] %v4863_v17  ;;  %6662 = vst [vmem:[#allocation101_spill] sm:$0xff] %v4866_v55 }
 0x6c9   :  { %1685 = vmatpush1.bf16.msra.mxu0 %v4851_v47  ;;  %1726 = vmatpush1.bf16.msra.mxu1 %v4854_v62 }
 0x6ca   :  { %1686 = vmatprep.subr.bf16.mxu0 %v4857_v8  ;;  %1727 = vmatprep.subr.bf16.mxu1 %v4860_v16 }
 0x6cd   :  { %1687 = vmatpush1.bf16.msra.mxu0 %v4863_v17  ;;  %1728 = vmatpush1.bf16.msra.mxu1 %v4866_v55 }
 0x6ce   :  { %1763 = vmatprep.subr.bf16.mxu0 %v6547_v33  ;;  %1804 = vmatprep.subr.bf16.mxu1 %v6548_v34 }
 0x762   :  { %v1583_v62 = vpop.f32.mrb[24].mxu0  ;;  %v1624_v47 = vpop.f32.mrb[24].mxu1 }
 0x763   :  { %v1584_v8 = vadd.f32 %v1583_v62, %v6549_v37  ;;  %v1585_v50 = vpop.f32.mrb[25].mxu0  ;;  %v1626_v0 = vpop.f32.mrb[25].mxu1  ;;  %v1625_v33 = vadd.f32 %v1624_v47, %v4320_v24 }
 0x764   :  { %v1586_v16 = vadd.f32 %v1585_v50, %v4315_v13  ;;  %v1587_v15 = vpop.f32.mrb[26].mxu0  ;;  %v1628_v41 = vpop.f32.mrb[26].mxu1  ;;  %v1627_v34 = vadd.f32 %v1626_v0, %v4323_v26 }
 0x765   :  { %v2816_v10 = vmul.f32 -1.442695, %v1584_v8  ;;  %v1588_v17 = vpop.f32.mrb[27].mxu0  ;;  %v1629_v61 = vpop.f32.mrb[27].mxu1  ;;  %v2818_v55 = vmul.f32 -1.442695, %v1625_v33 }
 0x766   :  { %v2817_v53 = vmul.f32 -1.442695, %v1586_v16  ;;  %v6690_v33 = vld [vmem:[#allocation64_spill] sm:$0xff] }
 0x767   :  { %3141 = vpow2.f32 %v2816_v10 }
 0x768   :  { %3143 = vpow2.f32 %v2817_v53 }
 0x769   :  { %3145 = vtanh.f32 %v1627_v34  ;;  %v6691_v34 = vld [vmem:[#allocation65_spill] sm:$0xff] }
 0x76a   :  { %3147 = vpow2.f32 %v2818_v55 }
 0x771   :  { %v3142_v7 = vpop.eup %3141 }
 0x772   :  { %v1640_v6 = vadd.f32 1.0, %v3142_v7  ;;  %v3144_v62 = vpop.eup %3143 }
 0x773   :  { %v1641_v50 = vadd.f32 1.0, %v3144_v62  ;;  %v3146_v41 = vpop.eup %3145  ;;  %v6692_v62 = vld [vmem:[#allocation66_spill] sm:$0xff] }
 0x774   :  { %3149 = vrcp.f32 %v1640_v6  ;;  %v3148_v15 = vpop.eup %3147  ;;  %v6689_v6 = vld [vmem:[#allocation63_spill] sm:$0xff] }
 0x775   :  { %3151 = vrcp.f32 %v1641_v50  ;;  %v1642_v10 = vadd.f32 1.0, %v3148_v15  ;;  %v6693_v50 = vld [vmem:[#allocation67_spill] sm:$0xff]  ;;  %v6695_v15 = vld [vmem:[#allocation69_spill] sm:$0xff] }
 0x777   :  { %3153 = vrcp.f32 %v1642_v10  ;;  %v6699_v10 = vld [vmem:[#allocation75_spill] sm:$0xff] }
 0x77e   :  { %v3150_v8 = vpop.eup %3149 }
 0x77f   :  { %v1651_v61 = vmul.f32 %v3150_v8, %v3146_v41  ;;  %v3152_v16 = vpop.eup %3151  ;;  %v6694_v41 = vld [vmem:[#allocation68_spill] sm:$0xff]  ;;  %v6696_v8 = vld [vmem:[#allocation70_spill] sm:$0xff] }
 0x780   :  { %v1650_v53 = vmul.f32 %v3152_v16, %v4618_v12  ;;  %v6665_v12 = vld [vmem:[#allocation37_spill] sm:$0xff]  ;;  %v6698_v16 = vld [vmem:[#allocation72_spill] sm:$0xff] }
 0x781   :  { %v3154_v7 = vpop.eup %3153 }
 0x782   :  { %v4876_v47 = vadd.f32 %v1651_v61, %v1650_v53  ;;  %v6697_v61 = vld [vmem:[#allocation71_spill] sm:$0xff]  ;;  %v6700_v53 = vld [vmem:[#allocation73_spill] sm:$0xff] }
 0x784   :  { %3155 = vtanh.f32 %v4876_v47 }
 0x78e   :  { %v3156_v0 = vpop.eup %3155 }
 0x78f   :  { %v1654_v17 = vmul.f32 %v3156_v0, %v3154_v7  ;;  %v6701_v7 = vld [vmem:[#allocation76_spill] sm:$0xff] }
 0x791   :  { %v1655_v55 = vpack.c.bf16 %v1654_v17, %v1654_v17 }
 0x793   :  { %1689 = vmatmul.mubr.bf16.vlgmr.msra.gmra.mrb[28].mxu0 %v1655_v55  ;;  %1730 = vmatmul.mubr.bf16.vlgmr.msra.gmra.mrb[28].mxu1 %v1655_v55 }
 0x794   :  { %1795 = vmatprep.mubr.bf16.mxu0 %v1655_v55  ;;  %1836 = vmatprep.mubr.bf16.mxu1 %v1655_v55 }
 0x795   :  { %1764 = vmatpush1.bf16.msra.mxu0 %v4331_v63  ;;  %1805 = vmatpush1.bf16.msra.mxu1 %v4334_v4  ;;  %v6663_v63 = vld [vmem:[#allocation35_spill] sm:$0xff]  ;;  %v6664_v4 = vld [vmem:[#allocation40_spill] sm:$0xff] }
 0x796   :  { %1765 = vmatprep.subr.bf16.mxu0 %v6550_v18  ;;  %1806 = vmatprep.subr.bf16.mxu1 %v6551_v5  ;;  %v6666_v18 = vld [vmem:[#allocation42_spill] sm:$0xff]  ;;  %v6667_v5 = vld [vmem:[#allocation39_spill] sm:$0xff] }
 0x799   :  { %1766 = vmatpush1.bf16.msra.mxu0 %v6552_v19  ;;  %1807 = vmatpush1.bf16.msra.mxu1 %v6553_v21  ;;  %v6668_v19 = vld [vmem:[#allocation44_spill] sm:$0xff]  ;;  %v6669_v21 = vld [vmem:[#allocation41_spill] sm:$0xff] }
 0x79a   :  { %1767 = vmatprep.subr.bf16.mxu0 %v6554_v23  ;;  %1808 = vmatprep.subr.bf16.mxu1 %v6555_v28  ;;  %v6670_v23 = vld [vmem:[#allocation45_spill] sm:$0xff]  ;;  %v6671_v28 = vld [vmem:[#allocation43_spill] sm:$0xff] }
 0x79d   :  { %1768 = vmatpush1.bf16.msra.mxu0 %v6556_v29  ;;  %1809 = vmatpush1.bf16.msra.mxu1 %v6557_v30  ;;  %v6672_v29 = vld [vmem:[#allocation46_spill] sm:$0xff]  ;;  %v6673_v30 = vld [vmem:[#allocation47_spill] sm:$0xff] }
 0x79e   :  { %1769 = vmatprep.subr.bf16.mxu0 %v6558_v31  ;;  %1810 = vmatprep.subr.bf16.mxu1 %v6559_v32  ;;  %v6674_v31 = vld [vmem:[#allocation48_spill] sm:$0xff]  ;;  %v6675_v32 = vld [vmem:[#allocation49_spill] sm:$0xff] }
 0x7a1   :  { %1770 = vmatpush1.bf16.msra.mxu0 %v6560_v35  ;;  %1811 = vmatpush1.bf16.msra.mxu1 %v6561_v36  ;;  %v6676_v35 = vld [vmem:[#allocation50_spill] sm:$0xff]  ;;  %v6677_v36 = vld [vmem:[#allocation51_spill] sm:$0xff] }
 0x7a2   :  { %1771 = vmatprep.subr.bf16.mxu0 %v6562_v38  ;;  %1812 = vmatprep.subr.bf16.mxu1 %v6563_v39  ;;  %v6678_v38 = vld [vmem:[#allocation52_spill] sm:$0xff]  ;;  %v6679_v39 = vld [vmem:[#allocation53_spill] sm:$0xff] }
 0x7a5   :  { %1772 = vmatpush1.bf16.msra.mxu0 %v6564_v44  ;;  %1813 = vmatpush1.bf16.msra.mxu1 %v6565_v45  ;;  %v6680_v44 = vld [vmem:[#allocation54_spill] sm:$0xff]  ;;  %v6681_v45 = vld [vmem:[#allocation55_spill] sm:$0xff] }
 0x7a6   :  { %1773 = vmatprep.subr.bf16.mxu0 %v6566_v48  ;;  %1814 = vmatprep.subr.bf16.mxu1 %v6567_v54  ;;  %v6682_v48 = vld [vmem:[#allocation56_spill] sm:$0xff]  ;;  %v6683_v54 = vld [vmem:[#allocation57_spill] sm:$0xff] }
 0x7a9   :  { %1774 = vmatpush1.bf16.msra.mxu0 %v6568_v57  ;;  %1815 = vmatpush1.bf16.msra.mxu1 %v6569_v59  ;;  %v6684_v57 = vld [vmem:[#allocation58_spill] sm:$0xff]  ;;  %v6685_v59 = vld [vmem:[#allocation59_spill] sm:$0xff] }
 0x7aa   :  { %1775 = vmatprep.subr.bf16.mxu0 %v6570_v51  ;;  %1816 = vmatprep.subr.bf16.mxu1 %v6571_v60  ;;  %v6686_v51 = vld [vmem:[#allocation60_spill] sm:$0xff]  ;;  %v6687_v60 = vld [vmem:[#allocation61_spill] sm:$0xff] }
 0x7ad   :  { %1776 = vmatpush1.bf16.msra.mxu0 %v6572_v43  ;;  %1817 = vmatpush1.bf16.msra.mxu1 %v6663_v63  ;;  %v6688_v43 = vld [vmem:[#allocation62_spill] sm:$0xff] }
 0x7ae   :  { %1777 = vmatprep.subr.bf16.mxu0 %v6664_v4  ;;  %1818 = vmatprep.subr.bf16.mxu1 %v6665_v12 }
 0x7b1   :  { %1778 = vmatpush1.bf16.msra.mxu0 %v6666_v18  ;;  %1819 = vmatpush1.bf16.msra.mxu1 %v6667_v5 }
 0x7b2   :  { %1779 = vmatprep.subr.bf16.mxu0 %v6668_v19  ;;  %1820 = vmatprep.subr.bf16.mxu1 %v6669_v21 }
 0x7b5   :  { %1780 = vmatpush1.bf16.msra.mxu0 %v6670_v23  ;;  %1821 = vmatpush1.bf16.msra.mxu1 %v6671_v28 }
 0x7b6   :  { %1781 = vmatprep.subr.bf16.mxu0 %v6672_v29  ;;  %1822 = vmatprep.subr.bf16.mxu1 %v6673_v30 }
 0x7b9   :  { %1782 = vmatpush1.bf16.msra.mxu0 %v6674_v31  ;;  %1823 = vmatpush1.bf16.msra.mxu1 %v6675_v32 }
 0x7ba   :  { %1783 = vmatprep.subr.bf16.mxu0 %v6676_v35  ;;  %1824 = vmatprep.subr.bf16.mxu1 %v6677_v36 }
 0x7bd   :  { %1784 = vmatpush1.bf16.msra.mxu0 %v6678_v38  ;;  %1825 = vmatpush1.bf16.msra.mxu1 %v6679_v39 }
 0x7be   :  { %1785 = vmatprep.subr.bf16.mxu0 %v6680_v44  ;;  %1826 = vmatprep.subr.bf16.mxu1 %v6681_v45 }
 0x7c1   :  { %1786 = vmatpush1.bf16.msra.mxu0 %v6682_v48  ;;  %1827 = vmatpush1.bf16.msra.mxu1 %v6683_v54 }
 0x7c2   :  { %1787 = vmatprep.subr.bf16.mxu0 %v6684_v57  ;;  %1828 = vmatprep.subr.bf16.mxu1 %v6685_v59 }
 0x7c5   :  { %1788 = vmatpush1.bf16.msra.mxu0 %v6686_v51  ;;  %1829 = vmatpush1.bf16.msra.mxu1 %v6687_v60 }
 0x7c6   :  { %1789 = vmatprep.subr.bf16.mxu0 %v6688_v43  ;;  %1830 = vmatprep.subr.bf16.mxu1 %v6689_v6 }
 0x7c9   :  { %1790 = vmatpush1.bf16.msra.mxu0 %v6690_v33  ;;  %1831 = vmatpush1.bf16.msra.mxu1 %v6691_v34 }
 0x7ca   :  { %1791 = vmatprep.subr.bf16.mxu0 %v6692_v62  ;;  %1832 = vmatprep.subr.bf16.mxu1 %v6693_v50  ;;  %v6711_v50 = vld [vmem:[#allocation85_spill] sm:$0xff] }
 0x7cd   :  { %1792 = vmatpush1.bf16.msra.mxu0 %v6694_v41  ;;  %1833 = vmatpush1.bf16.msra.mxu1 %v6695_v15  ;;  %v6713_v41 = vld [vmem:[#allocation87_spill] sm:$0xff]  ;;  %v6714_v15 = vld [vmem:[#allocation88_spill] sm:$0xff] }
 0x7ce   :  { %1793 = vmatprep.subr.bf16.mxu0 %v6696_v8  ;;  %1834 = vmatprep.subr.bf16.mxu1 %v6697_v61  ;;  %v6715_v8 = vld [vmem:[#allocation89_spill] sm:$0xff]  ;;  %v6716_v61 = vld [vmem:[#allocation90_spill] sm:$0xff] }
 0x7d1   :  { %1794 = vmatpush1.bf16.msra.mxu0 %v6698_v16  ;;  %1835 = vmatpush1.bf16.msra.mxu1 %v6699_v10  ;;  %v6717_v16 = vld [vmem:[#allocation91_spill] sm:$0xff] }
 0x7d2   :  { %1870 = vmatprep.subr.bf16.mxu0 %v6700_v53  ;;  %1911 = vmatprep.subr.bf16.mxu1 %v6701_v7  ;;  %v6718_v53 = vld [vmem:[#allocation92_spill] sm:$0xff] }
 0x866   :  { %v1690_v0 = vpop.f32.mrb[28].mxu0  ;;  %v1731_v17 = vpop.f32.mrb[28].mxu1 }
 0x867   :  { %v1691_v55 = vadd.f32 %v1690_v0, %v4215_v25  ;;  %v1692_v63 = vpop.f32.mrb[29].mxu0  ;;  %v1733_v4 = vpop.f32.mrb[29].mxu1  ;;  %v1732_v29 = vadd.f32 %v1731_v17, %v4223_v40  ;;  %v6719_v0 = vld [vmem:[#allocation93_spill] sm:$0xff]  ;;  %v6720_v17 = vld [vmem:[#allocation94_spill] sm:$0xff] }
 0x868   :  { %v1693_v12 = vadd.f32 %v1692_v63, %v4218_v27  ;;  %v1694_v18 = vpop.f32.mrb[30].mxu0  ;;  %v1735_v5 = vpop.f32.mrb[30].mxu1  ;;  %v1734_v30 = vadd.f32 %v1733_v4, %v4226_v42  ;;  %v6722_v63 = vld [vmem:[#allocation17_spill] sm:$0xff] }
 0x869   :  { %v2819_v19 = vmul.f32 -1.442695, %v1691_v55  ;;  %v1695_v21 = vpop.f32.mrb[31].mxu0  ;;  %v1736_v23 = vpop.f32.mrb[31].mxu1  ;;  %v2821_v31 = vmul.f32 -1.442695, %v1732_v29 }
 0x86a   :  { %v2820_v28 = vmul.f32 -1.442695, %v1693_v12  ;;  %v6721_v55 = vld [vmem:[#allocation12_spill] sm:$0xff]  ;;  %v6723_v4 = vld [vmem:[#allocation13_spill] sm:$0xff]  ;;  %v6724_v12 = vld [vmem:[#allocation18_spill] sm:$0xff] }
 0x86b   :  { %3157 = vpow2.f32 %v2819_v19  ;;  %v6725_v18 = vld [vmem:[#allocation15_spill] sm:$0xff]  ;;  %v6726_v5 = vld [vmem:[#allocation21_spill] sm:$0xff]  ;;  %v6727_v19 = vld [vmem:[#allocation16_spill] sm:$0xff] }
 0x86c   :  { %3159 = vpow2.f32 %v2820_v28  ;;  %v6728_v21 = vld [vmem:[#allocation23_spill] sm:$0xff]  ;;  %v6730_v28 = vld [vmem:[#allocation25_spill] sm:$0xff]  ;;  %v6731_v29 = vld [vmem:[#allocation20_spill] sm:$0xff] }
 0x86d   :  { %3161 = vtanh.f32 %v1734_v30  ;;  %v6729_v23 = vld [vmem:[#allocation19_spill] sm:$0xff]  ;;  %v6732_v30 = vld [vmem:[#allocation26_spill] sm:$0xff] }
 0x86e   :  { %3163 = vpow2.f32 %v2821_v31  ;;  %v6733_v31 = vld [vmem:[#allocation22_spill] sm:$0xff] }
 0x875   :  { %v3158_v32 = vpop.eup %3157 }
 0x876   :  { %v1747_v35 = vadd.f32 1.0, %v3158_v32  ;;  %v3160_v36 = vpop.eup %3159  ;;  %v6734_v32 = vld [vmem:[#allocation28_spill] sm:$0xff] }
 0x877   :  { %v1748_v38 = vadd.f32 1.0, %v3160_v36  ;;  %v3162_v39 = vpop.eup %3161  ;;  %v6736_v36 = vld [vmem:[#allocation30_spill] sm:$0xff] }
 0x878   :  { %3165 = vrcp.f32 %v1747_v35  ;;  %v3164_v44 = vpop.eup %3163  ;;  %v6735_v35 = vld [vmem:[#allocation24_spill] sm:$0xff] }
 0x879   :  { %3167 = vrcp.f32 %v1748_v38  ;;  %v1749_v57 = vadd.f32 1.0, %v3164_v44  ;;  %v6737_v38 = vld [vmem:[#allocation27_spill] sm:$0xff]  ;;  %v6739_v44 = vld [vmem:[#allocation29_spill] sm:$0xff] }
 0x87b   :  { %3169 = vrcp.f32 %v1749_v57  ;;  %v6743_v57 = vld [vmem:[#allocation31_spill] sm:$0xff] }
 0x882   :  { %v3166_v45 = vpop.eup %3165 }
 0x883   :  { %v1758_v48 = vmul.f32 %v3166_v45, %v3162_v39  ;;  %v3168_v54 = vpop.eup %3167  ;;  %v6738_v39 = vld [vmem:[#allocation32_spill] sm:$0xff]  ;;  %v6740_v45 = vld [vmem:[#allocation34_spill] sm:$0xff] }
 0x884   :  { %v1757_v59 = vmul.f32 %v3168_v54, %v4694_v46  ;;  %v6707_v46 = vld [vmem:[#allocation81_spill] sm:$0xff]  ;;  %v6742_v54 = vld [vmem:[#allocation96_spill] sm:$0xff] }
 0x885   :  { %v3170_v60 = vpop.eup %3169 }
 0x886   :  { %v4948_v51 = vadd.f32 %v1758_v48, %v1757_v59  ;;  %v6741_v48 = vld [vmem:[#allocation95_spill] sm:$0xff]  ;;  %v6744_v59 = vld [vmem:[#allocation36_spill] sm:$0xff] }
 0x888   :  { %3171 = vtanh.f32 %v4948_v51 }
 0x892   :  { %v3172_v43 = vpop.eup %3171 }
 0x893   :  { %v1761_v6 = vmul.f32 %v3172_v43, %v3170_v60  ;;  %v6745_v60 = vld [vmem:[#allocation33_spill] sm:$0xff]  ;;  %v6746_v43 = vld [vmem:[#allocation38_spill] sm:$0xff] }
 0x895   :  { %v1762_v33 = vpack.c.bf16 %v1761_v6, %v1761_v6  ;;  %v2625_v34 = vrot.slane %v1761_v6, 5  ;;  %v6747_v6 = vld [vmem:[#allocation14_spill] sm:$0xff] }
 0x897   :  { %1796 = vmatmul.mubr.bf16.vlgmr.msra.gmra.mrb[32].mxu0 %v1762_v33  ;;  %1837 = vmatmul.mubr.bf16.vlgmr.msra.gmra.mrb[32].mxu1 %v1762_v33  ;;  %v4952_v62 = vsel %vm2643_vm2, %v4699_v1, %v2625_v34  ;;  %v6709_v1 = vld [vmem:[#allocation83_spill] sm:$0xff]  ;;  %v6749_v34 = vld [vmem:[#allocation98_spill] sm:$0xff] }
 0x898   :  { %1902 = vmatprep.mubr.bf16.mxu0 %v1762_v33  ;;  %1943 = vmatprep.mubr.bf16.mxu1 %v1762_v33  ;;  %v6748_v33 = vld [vmem:[#allocation97_spill] sm:$0xff] }
 0x899   :  { %1871 = vmatpush1.bf16.msra.mxu0 %v4531_v2  ;;  %1912 = vmatpush1.bf16.msra.mxu1 %v4534_v49  ;;  %v6702_v2 = vld [vmem:[#allocation77_spill] sm:$0xff]  ;;  %v6703_v49 = vld [vmem:[#allocation74_spill] sm:$0xff] }
 0x89a   :  { %1872 = vmatprep.subr.bf16.mxu0 %v4537_v20  ;;  %1913 = vmatprep.subr.bf16.mxu1 %v4540_v22  ;;  %v6704_v20 = vld [vmem:[#allocation78_spill] sm:$0xff]  ;;  %v6705_v22 = vld [vmem:[#allocation79_spill] sm:$0xff] }
 0x89d   :  { %1873 = vmatpush1.bf16.msra.mxu0 %v4543_v11  ;;  %1914 = vmatpush1.bf16.msra.mxu1 %v4706_v9  ;;  %v6706_v11 = vld [vmem:[#allocation80_spill] sm:$0xff] }
 0x89e   :  { %1874 = vmatprep.subr.bf16.mxu0 %v4547_v3  ;;  %1915 = vmatprep.subr.bf16.mxu1 %v4710_v58  ;;  %v6708_v3 = vld [vmem:[#allocation82_spill] sm:$0xff] }
 0x8a1   :  { %1875 = vmatpush1.bf16.msra.mxu0 %v4551_v52  ;;  %1916 = vmatpush1.bf16.msra.mxu1 %v4714_v14  ;;  %v6710_v52 = vld [vmem:[#allocation84_spill] sm:$0xff] }
 0x8a2   :  { %1876 = vmatprep.subr.bf16.mxu0 %v4555_v56  ;;  %1917 = vmatprep.subr.bf16.mxu1 %v6702_v2  ;;  %v6712_v56 = vld [vmem:[#allocation86_spill] sm:$0xff] }
 0x8a5   :  { %1877 = vmatpush1.bf16.msra.mxu0 %v6703_v49  ;;  %1918 = vmatpush1.bf16.msra.mxu1 %v6704_v20  ;;  %v6750_v49 = vld [vmem:[#allocation99_spill] sm:$0xff] }
 0x8a6   :  { %1878 = vmatprep.subr.bf16.mxu0 %v6705_v22  ;;  %1919 = vmatprep.subr.bf16.mxu1 %v6706_v11 }
 0x8a9   :  { %1879 = vmatpush1.bf16.msra.mxu0 %v6707_v46  ;;  %1920 = vmatpush1.bf16.msra.mxu1 %v6708_v3 }
 0x8aa   :  { %1880 = vmatprep.subr.bf16.mxu0 %v6709_v1  ;;  %1921 = vmatprep.subr.bf16.mxu1 %v6710_v52 }
 0x8ad   :  { %1881 = vmatpush1.bf16.msra.mxu0 %v6711_v50  ;;  %1922 = vmatpush1.bf16.msra.mxu1 %v6712_v56 }
 0x8ae   :  { %1882 = vmatprep.subr.bf16.mxu0 %v6713_v41  ;;  %1923 = vmatprep.subr.bf16.mxu1 %v6714_v15 }
 0x8b1   :  { %1883 = vmatpush1.bf16.msra.mxu0 %v6715_v8  ;;  %1924 = vmatpush1.bf16.msra.mxu1 %v6716_v61 }
 0x8b2   :  { %1884 = vmatprep.subr.bf16.mxu0 %v6717_v16  ;;  %1925 = vmatprep.subr.bf16.mxu1 %v6718_v53 }
 0x8b5   :  { %1885 = vmatpush1.bf16.msra.mxu0 %v6719_v0  ;;  %1926 = vmatpush1.bf16.msra.mxu1 %v6720_v17 }
 0x8b6   :  { %1886 = vmatprep.subr.bf16.mxu0 %v6721_v55  ;;  %1927 = vmatprep.subr.bf16.mxu1 %v6722_v63 }
 0x8b9   :  { %1887 = vmatpush1.bf16.msra.mxu0 %v6723_v4  ;;  %1928 = vmatpush1.bf16.msra.mxu1 %v6724_v12 }
 0x8ba   :  { %1888 = vmatprep.subr.bf16.mxu0 %v6725_v18  ;;  %1929 = vmatprep.subr.bf16.mxu1 %v6726_v5 }
 0x8bd   :  { %1889 = vmatpush1.bf16.msra.mxu0 %v6727_v19  ;;  %1930 = vmatpush1.bf16.msra.mxu1 %v6728_v21 }
 0x8be   :  { %1890 = vmatprep.subr.bf16.mxu0 %v6729_v23  ;;  %1931 = vmatprep.subr.bf16.mxu1 %v6730_v28 }
 0x8c1   :  { %1891 = vmatpush1.bf16.msra.mxu0 %v6731_v29  ;;  %1932 = vmatpush1.bf16.msra.mxu1 %v6732_v30 }
 0x8c2   :  { %1892 = vmatprep.subr.bf16.mxu0 %v6733_v31  ;;  %1933 = vmatprep.subr.bf16.mxu1 %v6734_v32 }
 0x8c5   :  { %1893 = vmatpush1.bf16.msra.mxu0 %v6735_v35  ;;  %1934 = vmatpush1.bf16.msra.mxu1 %v6736_v36 }
 0x8c6   :  { %1894 = vmatprep.subr.bf16.mxu0 %v6737_v38  ;;  %1935 = vmatprep.subr.bf16.mxu1 %v6738_v39 }
 0x8c9   :  { %1895 = vmatpush1.bf16.msra.mxu0 %v6739_v44  ;;  %1936 = vmatpush1.bf16.msra.mxu1 %v6740_v45  ;;  %v6751_v45 = vld [vmem:[#allocation100_spill] sm:$0xff] }
 0x8ca   :  { %1896 = vmatprep.subr.bf16.mxu0 %v6741_v48  ;;  %1937 = vmatprep.subr.bf16.mxu1 %v6742_v54  ;;  %v6752_v48 = vld [vmem:[#allocation101_spill] sm:$0xff] }
 0x8cb   :  { %v5016_v54 = vld [vmem:[#allocation5 + $0x4] ss:$16 sps:$4 sm:$0xff]  }
 0x8cc   :  { %6753 = vst [vmem:[#allocation35_spill] sm:$0xff] %v5016_v54 }
 0x8cd   :  { %1897 = vmatpush1.bf16.msra.mxu0 %v6743_v57  ;;  %1938 = vmatpush1.bf16.msra.mxu1 %v6744_v59  ;;  %v5019_v59 = vld [vmem:[#allocation5 + $0xc] ss:$16 sps:$4 sm:$0xff]  }
 0x8ce   :  { %1898 = vmatprep.subr.bf16.mxu0 %v6745_v60  ;;  %1939 = vmatprep.subr.bf16.mxu1 %v6746_v43  ;;  %6754 = vst [vmem:[#allocation40_spill] sm:$0xff] %v5019_v59 }
 0x8d1   :  { %1899 = vmatpush1.bf16.msra.mxu0 %v6747_v6  ;;  %1940 = vmatpush1.bf16.msra.mxu1 %v6748_v33 }
 0x8d2   :  { %1900 = vmatprep.subr.bf16.mxu0 %v6749_v34  ;;  %1941 = vmatprep.subr.bf16.mxu1 %v6750_v49 }
 0x8d5   :  { %1901 = vmatpush1.bf16.msra.mxu0 %v6751_v45  ;;  %1942 = vmatpush1.bf16.msra.mxu1 %v6752_v48 }
 0x8d6   :  { %1977 = vmatprep.subr.bf16.mxu0 %v5016_v54  ;;  %2018 = vmatprep.subr.bf16.mxu1 %v5019_v59 }
 0x96a   :  { %v1797_v43 = vpop.f32.mrb[32].mxu0  ;;  %v1838_v6 = vpop.f32.mrb[32].mxu1 }
 0x96b   :  { %v1798_v33 = vadd.f32 %v1797_v43, %v6549_v37  ;;  %v1799_v60 = vpop.f32.mrb[33].mxu0  ;;  %v1840_v34 = vpop.f32.mrb[33].mxu1  ;;  %v1839_v54 = vadd.f32 %v1838_v6, %v4320_v24 }
 0x96c   :  { %v1800_v49 = vadd.f32 %v1799_v60, %v4315_v13  ;;  %v1801_v57 = vpop.f32.mrb[34].mxu0  ;;  %v1842_v45 = vpop.f32.mrb[34].mxu1  ;;  %v1841_v59 = vadd.f32 %v1840_v34, %v4323_v26  ;;  %v5033_v34 = vld [vmem:[#allocation5 + $0x8] ss:$16 sps:$4 sm:$0xff]  }
 0x96d   :  { %v2822_v44 = vmul.f32 -1.442695, %v1798_v33  ;;  %v1802_v48 = vpop.f32.mrb[35].mxu0  ;;  %v1843_v39 = vpop.f32.mrb[35].mxu1  ;;  %v2824_v36 = vmul.f32 -1.442695, %v1839_v54 }
 0x96e   :  { %v2823_v38 = vmul.f32 -1.442695, %v1800_v49  ;;  %v5039_v49 = vld [vmem:[#allocation5 + $0x2c] ss:$16 sps:$4 sm:$0xff]  }
 0x96f   :  { %3173 = vpow2.f32 %v2822_v44  ;;  %6756 = vst [vmem:[#allocation42_spill] sm:$0xff] %v5039_v49 }
 0x970   :  { %3175 = vpow2.f32 %v2823_v38 }
 0x971   :  { %3177 = vtanh.f32 %v1841_v59 }
 0x972   :  { %3179 = vpow2.f32 %v2824_v36 }
 0x979   :  { %v3174_v35 = vpop.eup %3173 }
 0x97a   :  { %v1854_v32 = vadd.f32 1.0, %v3174_v35  ;;  %v3176_v43 = vpop.eup %3175 }
 0x97b   :  { %v1855_v60 = vadd.f32 1.0, %v3176_v43  ;;  %v3178_v45 = vpop.eup %3177  ;;  %v5042_v43 = vld [vmem:[#allocation5 + $0x20] ss:$16 sps:$4 sm:$0xff]  }
 0x97c   :  { %3181 = vrcp.f32 %v1854_v32  ;;  %v3180_v57 = vpop.eup %3179  ;;  %v5030_v32 = vld [vmem:[#allocation5] ss:$16 sps:$4 sm:$0xff]   ;;  %6757 = vst [vmem:[#allocation39_spill] sm:$0xff] %v5042_v43 }
 0x97d   :  { %3183 = vrcp.f32 %v1855_v60  ;;  %v1856_v44 = vadd.f32 1.0, %v3180_v57  ;;  %v5045_v60 = vld [vmem:[#allocation5 + $0x28] ss:$16 sps:$4 sm:$0xff]   ;;  %v5051_v57 = vld [vmem:[#allocation5 + $0x4c] ss:$16 sps:$4 sm:$0xff]  }
 0x97e   :  { %6758 = vst [vmem:[#allocation44_spill] sm:$0xff] %v5045_v60  ;;  %6760 = vst [vmem:[#allocation45_spill] sm:$0xff] %v5051_v57 }
 0x97f   :  { %3185 = vrcp.f32 %v1856_v44  ;;  %v5063_v44 = vld [vmem:[#allocation5 + $0x6c] ss:$16 sps:$4 sm:$0xff]  }
 0x980   :  { %6764 = vst [vmem:[#allocation48_spill] sm:$0xff] %v5063_v44 }
 0x986   :  { %v3182_v48 = vpop.eup %3181 }
 0x987   :  { %v1865_v39 = vmul.f32 %v3182_v48, %v3178_v45  ;;  %v3184_v33 = vpop.eup %3183  ;;  %v5048_v45 = vld [vmem:[#allocation5 + $0x44] ss:$16 sps:$4 sm:$0xff]   ;;  %v5054_v48 = vld [vmem:[#allocation5 + $0x40] ss:$16 sps:$4 sm:$0xff]  }
 0x988   :  { %v1864_v38 = vmul.f32 %v3184_v33, %v4876_v47  ;;  %v5036_v47 = vld [vmem:[#allocation5 + $0x24] ss:$16 sps:$4 sm:$0xff]   ;;  %6759 = vst [vmem:[#allocation41_spill] sm:$0xff] %v5048_v45  ;;  %6761 = vst [vmem:[#allocation43_spill] sm:$0xff] %v5054_v48 }
 0x989   :  { %v3186_v35 = vpop.eup %3185  ;;  %6755 = vst [vmem:[#allocation37_spill] sm:$0xff] %v5036_v47  ;;  %v5060_v33 = vld [vmem:[#allocation5 + $0x64] ss:$16 sps:$4 sm:$0xff]  }
 0x98a   :  { %v5027_v6 = vadd.f32 %v1865_v39, %v1864_v38  ;;  %v5057_v39 = vld [vmem:[#allocation5 + $0x48] ss:$16 sps:$4 sm:$0xff]   ;;  %6763 = vst [vmem:[#allocation47_spill] sm:$0xff] %v5060_v33  ;;  %v5066_v38 = vld [vmem:[#allocation5 + $0x60] ss:$16 sps:$4 sm:$0xff]  }
 0x98b   :  { %6762 = vst [vmem:[#allocation46_spill] sm:$0xff] %v5057_v39  ;;  %6765 = vst [vmem:[#allocation49_spill] sm:$0xff] %v5066_v38 }
 0x98c   :  { %3187 = vtanh.f32 %v5027_v6 }
 0x996   :  { %v3188_v54 = vpop.eup %3187 }
 0x997   :  { %v1868_v59 = vmul.f32 %v3188_v54, %v3186_v35  ;;  %v5069_v35 = vld [vmem:[#allocation5 + $0x68] ss:$16 sps:$4 sm:$0xff]   ;;  %v5072_v54 = vld [vmem:[#allocation5 + $0x84] ss:$16 sps:$4 sm:$0xff]  }
 0x998   :  { %6766 = vst [vmem:[#allocation50_spill] sm:$0xff] %v5069_v35  ;;  %6767 = vst [vmem:[#allocation51_spill] sm:$0xff] %v5072_v54 }
 0x999   :  { %v1869_v36 = vpack.c.bf16 %v1868_v59, %v1868_v59  ;;  %v5075_v59 = vld [vmem:[#allocation5 + $0x8c] ss:$16 sps:$4 sm:$0xff]  }
 0x99a   :  { %6768 = vst [vmem:[#allocation52_spill] sm:$0xff] %v5075_v59 }
 0x99b   :  { %1903 = vmatmul.mubr.bf16.vlgmr.msra.gmra.mrb[36].mxu0 %v1869_v36  ;;  %1944 = vmatmul.mubr.bf16.vlgmr.msra.gmra.mrb[36].mxu1 %v1869_v36 }
 0x99c   :  { %2009 = vmatprep.mubr.bf16.mxu0 %v1869_v36  ;;  %2050 = vmatprep.mubr.bf16.mxu1 %v1869_v36  ;;  %v5078_v36 = vld [vmem:[#allocation5 + $0x80] ss:$16 sps:$4 sm:$0xff]  }
 0x99d   :  { %1978 = vmatpush1.bf16.msra.mxu0 %v5030_v32  ;;  %2019 = vmatpush1.bf16.msra.mxu1 %v5033_v34  ;;  %6769 = vst [vmem:[#allocation53_spill] sm:$0xff] %v5078_v36 }
 0x99e   :  { %1979 = vmatprep.subr.bf16.mxu0 %v5036_v47  ;;  %2020 = vmatprep.subr.bf16.mxu1 %v5039_v49 }
 0x9a1   :  { %1980 = vmatpush1.bf16.msra.mxu0 %v5042_v43  ;;  %2021 = vmatpush1.bf16.msra.mxu1 %v5045_v60 }
 0x9a2   :  { %1981 = vmatprep.subr.bf16.mxu0 %v5048_v45  ;;  %2022 = vmatprep.subr.bf16.mxu1 %v5051_v57 }
 0x9a5   :  { %1982 = vmatpush1.bf16.msra.mxu0 %v5054_v48  ;;  %2023 = vmatpush1.bf16.msra.mxu1 %v5057_v39 }
 0x9a6   :  { %1983 = vmatprep.subr.bf16.mxu0 %v5060_v33  ;;  %2024 = vmatprep.subr.bf16.mxu1 %v5063_v44  ;;  %v5081_v44 = vld [vmem:[#allocation5 + $0x88] ss:$16 sps:$4 sm:$0xff]  }
 0x9a7   :  { %6770 = vst [vmem:[#allocation54_spill] sm:$0xff] %v5081_v44 }
 0x9a9   :  { %1984 = vmatpush1.bf16.msra.mxu0 %v5066_v38  ;;  %2025 = vmatpush1.bf16.msra.mxu1 %v5069_v35  ;;  %v5084_v38 = vld [vmem:[#allocation5 + $0xa4] ss:$16 sps:$4 sm:$0xff]   ;;  %v5087_v35 = vld [vmem:[#allocation5 + $0xac] ss:$16 sps:$4 sm:$0xff]  }
 0x9aa   :  { %1985 = vmatprep.subr.bf16.mxu0 %v5072_v54  ;;  %2026 = vmatprep.subr.bf16.mxu1 %v5075_v59  ;;  %6771 = vst [vmem:[#allocation55_spill] sm:$0xff] %v5084_v38  ;;  %6772 = vst [vmem:[#allocation56_spill] sm:$0xff] %v5087_v35  ;;  %v5090_v54 = vld [vmem:[#allocation5 + $0xa0] ss:$16 sps:$4 sm:$0xff]   ;;  %v5093_v59 = vld [vmem:[#allocation5 + $0xa8] ss:$16 sps:$4 sm:$0xff]  }
 0x9ab   :  { %6773 = vst [vmem:[#allocation57_spill] sm:$0xff] %v5090_v54  ;;  %6774 = vst [vmem:[#allocation58_spill] sm:$0xff] %v5093_v59 }
 0x9ad   :  { %1986 = vmatpush1.bf16.msra.mxu0 %v5078_v36  ;;  %2027 = vmatpush1.bf16.msra.mxu1 %v5081_v44  ;;  %v5096_v36 = vld [vmem:[#allocation5 + $0xc4] ss:$16 sps:$4 sm:$0xff]   ;;  %v5099_v44 = vld [vmem:[#allocation5 + $0xcc] ss:$16 sps:$4 sm:$0xff]  }
 0x9ae   :  { %1987 = vmatprep.subr.bf16.mxu0 %v5084_v38  ;;  %2028 = vmatprep.subr.bf16.mxu1 %v5087_v35  ;;  %6775 = vst [vmem:[#allocation59_spill] sm:$0xff] %v5096_v36  ;;  %6776 = vst [vmem:[#allocation60_spill] sm:$0xff] %v5099_v44  ;;  %v5102_v38 = vld [vmem:[#allocation5 + $0xc0] ss:$16 sps:$4 sm:$0xff]   ;;  %v5105_v35 = vld [vmem:[#allocation5 + $0xc8] ss:$16 sps:$4 sm:$0xff]  }
 0x9af   :  { %6777 = vst [vmem:[#allocation61_spill] sm:$0xff] %v5102_v38  ;;  %6778 = vst [vmem:[#allocation62_spill] sm:$0xff] %v5105_v35 }
 0x9b1   :  { %1988 = vmatpush1.bf16.msra.mxu0 %v5090_v54  ;;  %2029 = vmatpush1.bf16.msra.mxu1 %v5093_v59  ;;  %v5108_v54 = vld [vmem:[#allocation5 + $0xe4] ss:$16 sps:$4 sm:$0xff]   ;;  %v5111_v59 = vld [vmem:[#allocation5 + $0xec] ss:$16 sps:$4 sm:$0xff]  }
 0x9b2   :  { %1989 = vmatprep.subr.bf16.mxu0 %v5096_v36  ;;  %2030 = vmatprep.subr.bf16.mxu1 %v5099_v44  ;;  %6779 = vst [vmem:[#allocation63_spill] sm:$0xff] %v5108_v54  ;;  %6780 = vst [vmem:[#allocation64_spill] sm:$0xff] %v5111_v59  ;;  %v5114_v36 = vld [vmem:[#allocation5 + $0xe0] ss:$16 sps:$4 sm:$0xff]   ;;  %v5117_v44 = vld [vmem:[#allocation5 + $0xe8] ss:$16 sps:$4 sm:$0xff]  }
 0x9b3   :  { %6781 = vst [vmem:[#allocation65_spill] sm:$0xff] %v5114_v36  ;;  %6782 = vst [vmem:[#allocation66_spill] sm:$0xff] %v5117_v44 }
 0x9b5   :  { %1990 = vmatpush1.bf16.msra.mxu0 %v5102_v38  ;;  %2031 = vmatpush1.bf16.msra.mxu1 %v5105_v35  ;;  %v5120_v38 = vld [vmem:[#allocation5 + $0x104] ss:$16 sps:$4 sm:$0xff]   ;;  %v5123_v35 = vld [vmem:[#allocation5 + $0x10c] ss:$16 sps:$4 sm:$0xff]  }
 0x9b6   :  { %1991 = vmatprep.subr.bf16.mxu0 %v5108_v54  ;;  %2032 = vmatprep.subr.bf16.mxu1 %v5111_v59  ;;  %6783 = vst [vmem:[#allocation67_spill] sm:$0xff] %v5120_v38  ;;  %6784 = vst [vmem:[#allocation68_spill] sm:$0xff] %v5123_v35  ;;  %v5126_v54 = vld [vmem:[#allocation5 + $0x100] ss:$16 sps:$4 sm:$0xff]   ;;  %v5129_v59 = vld [vmem:[#allocation5 + $0x108] ss:$16 sps:$4 sm:$0xff]  }
 0x9b7   :  { %6785 = vst [vmem:[#allocation69_spill] sm:$0xff] %v5126_v54  ;;  %6786 = vst [vmem:[#allocation70_spill] sm:$0xff] %v5129_v59 }
 0x9b9   :  { %1992 = vmatpush1.bf16.msra.mxu0 %v5114_v36  ;;  %2033 = vmatpush1.bf16.msra.mxu1 %v5117_v44  ;;  %v5132_v36 = vld [vmem:[#allocation5 + $0x124] ss:$16 sps:$4 sm:$0xff]   ;;  %v5135_v44 = vld [vmem:[#allocation5 + $0x12c] ss:$16 sps:$4 sm:$0xff]  }
 0x9ba   :  { %1993 = vmatprep.subr.bf16.mxu0 %v5120_v38  ;;  %2034 = vmatprep.subr.bf16.mxu1 %v5123_v35  ;;  %6787 = vst [vmem:[#allocation71_spill] sm:$0xff] %v5132_v36  ;;  %6788 = vst [vmem:[#allocation72_spill] sm:$0xff] %v5135_v44  ;;  %v5138_v38 = vld [vmem:[#allocation5 + $0x120] ss:$16 sps:$4 sm:$0xff]   ;;  %v5141_v35 = vld [vmem:[#allocation5 + $0x128] ss:$16 sps:$4 sm:$0xff]  }
 0x9bb   :  { %6789 = vst [vmem:[#allocation75_spill] sm:$0xff] %v5138_v38  ;;  %6790 = vst [vmem:[#allocation73_spill] sm:$0xff] %v5141_v35 }
 0x9bd   :  { %1994 = vmatpush1.bf16.msra.mxu0 %v5126_v54  ;;  %2035 = vmatpush1.bf16.msra.mxu1 %v5129_v59  ;;  %v5144_v54 = vld [vmem:[#allocation5 + $0x144] ss:$16 sps:$4 sm:$0xff]   ;;  %v5147_v59 = vld [vmem:[#allocation5 + $0x14c] ss:$16 sps:$4 sm:$0xff]  }
 0x9be   :  { %1995 = vmatprep.subr.bf16.mxu0 %v5132_v36  ;;  %2036 = vmatprep.subr.bf16.mxu1 %v5135_v44  ;;  %6791 = vst [vmem:[#allocation76_spill] sm:$0xff] %v5144_v54  ;;  %6792 = vst [vmem:[#allocation77_spill] sm:$0xff] %v5147_v59  ;;  %v5150_v36 = vld [vmem:[#allocation5 + $0x140] ss:$16 sps:$4 sm:$0xff]   ;;  %v5153_v44 = vld [vmem:[#allocation5 + $0x148] ss:$16 sps:$4 sm:$0xff]  }
 0x9bf   :  { %6793 = vst [vmem:[#allocation74_spill] sm:$0xff] %v5150_v36  ;;  %6794 = vst [vmem:[#allocation78_spill] sm:$0xff] %v5153_v44 }
 0x9c1   :  { %1996 = vmatpush1.bf16.msra.mxu0 %v5138_v38  ;;  %2037 = vmatpush1.bf16.msra.mxu1 %v5141_v35  ;;  %v5156_v38 = vld [vmem:[#allocation5 + $0x164] ss:$16 sps:$4 sm:$0xff]   ;;  %v5159_v35 = vld [vmem:[#allocation5 + $0x16c] ss:$16 sps:$4 sm:$0xff]  }
 0x9c2   :  { %1997 = vmatprep.subr.bf16.mxu0 %v5144_v54  ;;  %2038 = vmatprep.subr.bf16.mxu1 %v5147_v59  ;;  %6795 = vst [vmem:[#allocation79_spill] sm:$0xff] %v5156_v38  ;;  %6796 = vst [vmem:[#allocation80_spill] sm:$0xff] %v5159_v35  ;;  %v5162_v54 = vld [vmem:[#allocation5 + $0x160] ss:$16 sps:$4 sm:$0xff]   ;;  %v5165_v59 = vld [vmem:[#allocation5 + $0x168] ss:$16 sps:$4 sm:$0xff]  }
 0x9c3   :  { %6797 = vst [vmem:[#allocation81_spill] sm:$0xff] %v5162_v54  ;;  %6798 = vst [vmem:[#allocation82_spill] sm:$0xff] %v5165_v59 }
 0x9c5   :  { %1998 = vmatpush1.bf16.msra.mxu0 %v5150_v36  ;;  %2039 = vmatpush1.bf16.msra.mxu1 %v5153_v44  ;;  %v5168_v36 = vld [vmem:[#allocation5 + $0x184] ss:$16 sps:$4 sm:$0xff]   ;;  %v5171_v44 = vld [vmem:[#allocation5 + $0x18c] ss:$16 sps:$4 sm:$0xff]  }
 0x9c6   :  { %1999 = vmatprep.subr.bf16.mxu0 %v5156_v38  ;;  %2040 = vmatprep.subr.bf16.mxu1 %v5159_v35  ;;  %6799 = vst [vmem:[#allocation83_spill] sm:$0xff] %v5168_v36  ;;  %6800 = vst [vmem:[#allocation84_spill] sm:$0xff] %v5171_v44  ;;  %v5174_v38 = vld [vmem:[#allocation5 + $0x180] ss:$16 sps:$4 sm:$0xff]   ;;  %v5177_v35 = vld [vmem:[#allocation5 + $0x188] ss:$16 sps:$4 sm:$0xff]  }
 0x9c7   :  { %6801 = vst [vmem:[#allocation85_spill] sm:$0xff] %v5174_v38  ;;  %6802 = vst [vmem:[#allocation86_spill] sm:$0xff] %v5177_v35 }
 0x9c9   :  { %2000 = vmatpush1.bf16.msra.mxu0 %v5162_v54  ;;  %2041 = vmatpush1.bf16.msra.mxu1 %v5165_v59  ;;  %v5180_v54 = vld [vmem:[#allocation5 + $0x1a4] ss:$16 sps:$4 sm:$0xff]   ;;  %v5183_v59 = vld [vmem:[#allocation5 + $0x1ac] ss:$16 sps:$4 sm:$0xff]  }
 0x9ca   :  { %2001 = vmatprep.subr.bf16.mxu0 %v5168_v36  ;;  %2042 = vmatprep.subr.bf16.mxu1 %v5171_v44  ;;  %6803 = vst [vmem:[#allocation87_spill] sm:$0xff] %v5180_v54  ;;  %6804 = vst [vmem:[#allocation88_spill] sm:$0xff] %v5183_v59  ;;  %v5186_v36 = vld [vmem:[#allocation5 + $0x1a0] ss:$16 sps:$4 sm:$0xff]   ;;  %v5189_v44 = vld [vmem:[#allocation5 + $0x1a8] ss:$16 sps:$4 sm:$0xff]  }
 0x9cb   :  { %6805 = vst [vmem:[#allocation89_spill] sm:$0xff] %v5186_v36  ;;  %6806 = vst [vmem:[#allocation90_spill] sm:$0xff] %v5189_v44 }
 0x9cd   :  { %2002 = vmatpush1.bf16.msra.mxu0 %v5174_v38  ;;  %2043 = vmatpush1.bf16.msra.mxu1 %v5177_v35  ;;  %v5192_v38 = vld [vmem:[#allocation5 + $0x1c4] ss:$16 sps:$4 sm:$0xff]   ;;  %v5195_v35 = vld [vmem:[#allocation5 + $0x1cc] ss:$16 sps:$4 sm:$0xff]  }
 0x9ce   :  { %2003 = vmatprep.subr.bf16.mxu0 %v5180_v54  ;;  %2044 = vmatprep.subr.bf16.mxu1 %v5183_v59  ;;  %6807 = vst [vmem:[#allocation91_spill] sm:$0xff] %v5192_v38  ;;  %6808 = vst [vmem:[#allocation92_spill] sm:$0xff] %v5195_v35  ;;  %v5198_v54 = vld [vmem:[#allocation5 + $0x1c0] ss:$16 sps:$4 sm:$0xff]   ;;  %v5201_v59 = vld [vmem:[#allocation5 + $0x1c8] ss:$16 sps:$4 sm:$0xff]  }
 0x9cf   :  { %6809 = vst [vmem:[#allocation93_spill] sm:$0xff] %v5198_v54  ;;  %6810 = vst [vmem:[#allocation94_spill] sm:$0xff] %v5201_v59 }
 0x9d1   :  { %2004 = vmatpush1.bf16.msra.mxu0 %v5186_v36  ;;  %2045 = vmatpush1.bf16.msra.mxu1 %v5189_v44  ;;  %v5204_v36 = vld [vmem:[#allocation5 + $0x1e4] ss:$16 sps:$4 sm:$0xff]   ;;  %v5207_v44 = vld [vmem:[#allocation5 + $0x1ec] ss:$16 sps:$4 sm:$0xff]  }
 0x9d2   :  { %2005 = vmatprep.subr.bf16.mxu0 %v5192_v38  ;;  %2046 = vmatprep.subr.bf16.mxu1 %v5195_v35  ;;  %6811 = vst [vmem:[#allocation12_spill] sm:$0xff] %v5204_v36  ;;  %6812 = vst [vmem:[#allocation17_spill] sm:$0xff] %v5207_v44  ;;  %v5210_v38 = vld [vmem:[#allocation5 + $0x1e0] ss:$16 sps:$4 sm:$0xff]   ;;  %v5214_v35 = vld [vmem:[#allocation7 + $0x4] ss:$16 sps:$4 sm:$0xff]  }
 0x9d3   :  { %6813 = vst [vmem:[#allocation13_spill] sm:$0xff] %v5210_v38  ;;  %6814 = vst [vmem:[#allocation18_spill] sm:$0xff] %v5214_v35 }
 0x9d5   :  { %2006 = vmatpush1.bf16.msra.mxu0 %v5198_v54  ;;  %2047 = vmatpush1.bf16.msra.mxu1 %v5201_v59 }
 0x9d6   :  { %2007 = vmatprep.subr.bf16.mxu0 %v5204_v36  ;;  %2048 = vmatprep.subr.bf16.mxu1 %v5207_v44 }
 0x9d9   :  { %2008 = vmatpush1.bf16.msra.mxu0 %v5210_v38  ;;  %2049 = vmatpush1.bf16.msra.mxu1 %v6699_v10 }
 0x9da   :  { %2084 = vmatprep.subr.bf16.mxu0 %v5214_v35  ;;  %2125 = vmatprep.subr.bf16.mxu1 %v6701_v7 }
 0xa6e   :  { %v1904_v59 = vpop.f32.mrb[36].mxu0  ;;  %v1945_v54 = vpop.f32.mrb[36].mxu1 }
 0xa6f   :  { %v1905_v36 = vadd.f32 %v1904_v59, %v4215_v25  ;;  %v1906_v33 = vpop.f32.mrb[37].mxu0  ;;  %v1947_v39 = vpop.f32.mrb[37].mxu1  ;;  %v1946_v35 = vadd.f32 %v1945_v54, %v4223_v40 }
 0xa70   :  { %v1907_v44 = vadd.f32 %v1906_v33, %v4218_v27  ;;  %v1908_v48 = vpop.f32.mrb[38].mxu0  ;;  %v1949_v57 = vpop.f32.mrb[38].mxu1  ;;  %v1948_v7 = vadd.f32 %v1947_v39, %v4226_v42 }
 0xa71   :  { %v2825_v45 = vmul.f32 -1.442695, %v1905_v36  ;;  %v1909_v38 = vpop.f32.mrb[39].mxu0  ;;  %v1950_v60 = vpop.f32.mrb[39].mxu1  ;;  %v2827_v43 = vmul.f32 -1.442695, %v1946_v35 }
 0xa72   :  { %v2826_v10 = vmul.f32 -1.442695, %v1907_v44 }
 0xa73   :  { %3189 = vpow2.f32 %v2825_v45 }
 0xa74   :  { %3191 = vpow2.f32 %v2826_v10 }
 0xa75   :  { %3193 = vtanh.f32 %v1948_v7  ;;  %v5229_v7 = vld [vmem:[#allocation7] ss:$16 sps:$4 sm:$0xff]  }
 0xa76   :  { %3195 = vpow2.f32 %v2827_v43 }
 0xa7d   :  { %v3190_v49 = vpop.eup %3189 }
 0xa7e   :  { %v1961_v47 = vadd.f32 1.0, %v3190_v49  ;;  %v3192_v59 = vpop.eup %3191 }
 0xa7f   :  { %v1962_v33 = vadd.f32 1.0, %v3192_v59  ;;  %v3194_v57 = vpop.eup %3193  ;;  %v5235_v59 = vld [vmem:[#allocation7 + $0x24] ss:$16 sps:$4 sm:$0xff]  }
 0xa80   :  { %3197 = vrcp.f32 %v1961_v47  ;;  %v3196_v48 = vpop.eup %3195 }
 0xa81   :  { %3199 = vrcp.f32 %v1962_v33  ;;  %v1963_v45 = vadd.f32 1.0, %v3196_v48  ;;  %v5238_v33 = vld [vmem:[#allocation7 + $0x2c] ss:$16 sps:$4 sm:$0xff]   ;;  %v5249_v48 = vld [vmem:[#allocation7 + $0x40] ss:$16 sps:$4 sm:$0xff]  }
 0xa83   :  { %3201 = vrcp.f32 %v1963_v45 }
 0xa8a   :  { %v3198_v38 = vpop.eup %3197 }
 0xa8b   :  { %v1972_v60 = vmul.f32 %v3198_v38, %v3194_v57  ;;  %v3200_v44 = vpop.eup %3199  ;;  %v5245_v57 = vld [vmem:[#allocation7 + $0x44] ss:$16 sps:$4 sm:$0xff]  }
 0xa8c   :  { %v1971_v36 = vmul.f32 %v3200_v44, %v4948_v51  ;;  %v5232_v51 = vld [vmem:[#allocation7 + $0x8] ss:$16 sps:$4 sm:$0xff]   ;;  %v5253_v38 = vld [vmem:[#allocation7 + $0x64] ss:$16 sps:$4 sm:$0xff]  }
 0xa8d   :  { %v3202_v49 = vpop.eup %3201 }
 0xa8e   :  { %v5223_v54 = vadd.f32 %v1972_v60, %v1971_v36  ;;  %v5257_v60 = vld [vmem:[#allocation7 + $0x60] ss:$16 sps:$4 sm:$0xff]  }
 0xa8f   :  { %6815 = vst [vmem:[#allocation15_spill] sm:$0xff] %v5257_v60 }
 0xa90   :  { %3203 = vtanh.f32 %v5223_v54 }
 0xa9a   :  { %v3204_v39 = vpop.eup %3203 }
 0xa9b   :  { %v1975_v35 = vmul.f32 %v3204_v39, %v3202_v49 }
 0xa9d   :  { %v1976_v47 = vpack.c.bf16 %v1975_v35, %v1975_v35  ;;  %v2628_v43 = vrot.slane %v1975_v35, 4 }
 0xa9f   :  { %2010 = vmatmul.mubr.bf16.vlgmr.msra.gmra.mrb[40].mxu0 %v1976_v47  ;;  %2051 = vmatmul.mubr.bf16.vlgmr.msra.gmra.mrb[40].mxu1 %v1976_v47  ;;  %v5227_v10 = vsel %vm2645_vm3, %v4952_v62, %v2628_v43  ;;  %v5241_v62 = vld [vmem:[#allocation7 + $0x20] ss:$16 sps:$4 sm:$0xff]  }
 0xaa0   :  { %2116 = vmatprep.mubr.bf16.mxu0 %v1976_v47  ;;  %2157 = vmatprep.mubr.bf16.mxu1 %v1976_v47 }
 0xaa1   :  { %2085 = vmatpush1.bf16.msra.mxu0 %v5229_v7  ;;  %2126 = vmatpush1.bf16.msra.mxu1 %v5232_v51 }
 0xaa2   :  { %2086 = vmatprep.subr.bf16.mxu0 %v5235_v59  ;;  %2127 = vmatprep.subr.bf16.mxu1 %v5238_v33 }
 0xaa5   :  { %2087 = vmatpush1.bf16.msra.mxu0 %v5241_v62  ;;  %2128 = vmatpush1.bf16.msra.mxu1 %v4706_v9  ;;  %v6816_v9 = vld [vmem:[#allocation28_spill] sm:$0xff] }
 0xaa6   :  { %2088 = vmatprep.subr.bf16.mxu0 %v5245_v57  ;;  %2129 = vmatprep.subr.bf16.mxu1 %v4710_v58  ;;  %v6817_v58 = vld [vmem:[#allocation24_spill] sm:$0xff] }
 0xaa9   :  { %2089 = vmatpush1.bf16.msra.mxu0 %v5249_v48  ;;  %2130 = vmatpush1.bf16.msra.mxu1 %v4714_v14  ;;  %v6818_v14 = vld [vmem:[#allocation30_spill] sm:$0xff] }
 0xaaa   :  { %2090 = vmatprep.subr.bf16.mxu0 %v5253_v38  ;;  %2131 = vmatprep.subr.bf16.mxu1 %v6702_v2  ;;  %v6819_v2 = vld [vmem:[#allocation27_spill] sm:$0xff] }
 0xaad   :  { %2091 = vmatpush1.bf16.msra.mxu0 %v5257_v60  ;;  %2132 = vmatpush1.bf16.msra.mxu1 %v6704_v20  ;;  %v6820_v20 = vld [vmem:[#allocation32_spill] sm:$0xff] }
 0xaae   :  { %2092 = vmatprep.subr.bf16.mxu0 %v6705_v22  ;;  %2133 = vmatprep.subr.bf16.mxu1 %v6706_v11  ;;  %v6821_v22 = vld [vmem:[#allocation29_spill] sm:$0xff]  ;;  %v6822_v11 = vld [vmem:[#allocation34_spill] sm:$0xff] }
 0xab1   :  { %2093 = vmatpush1.bf16.msra.mxu0 %v6707_v46  ;;  %2134 = vmatpush1.bf16.msra.mxu1 %v6708_v3  ;;  %v6823_v46 = vld [vmem:[#allocation95_spill] sm:$0xff]  ;;  %v6824_v3 = vld [vmem:[#allocation96_spill] sm:$0xff] }
 0xab2   :  { %2094 = vmatprep.subr.bf16.mxu0 %v6709_v1  ;;  %2135 = vmatprep.subr.bf16.mxu1 %v6710_v52  ;;  %v6825_v1 = vld [vmem:[#allocation31_spill] sm:$0xff]  ;;  %v6826_v52 = vld [vmem:[#allocation36_spill] sm:$0xff] }
 0xab5   :  { %2095 = vmatpush1.bf16.msra.mxu0 %v6711_v50  ;;  %2136 = vmatpush1.bf16.msra.mxu1 %v6712_v56  ;;  %v6827_v50 = vld [vmem:[#allocation33_spill] sm:$0xff]  ;;  %v6828_v56 = vld [vmem:[#allocation38_spill] sm:$0xff] }
 0xab6   :  { %2096 = vmatprep.subr.bf16.mxu0 %v6713_v41  ;;  %2137 = vmatprep.subr.bf16.mxu1 %v6714_v15  ;;  %v6829_v41 = vld [vmem:[#allocation14_spill] sm:$0xff]  ;;  %v6830_v15 = vld [vmem:[#allocation97_spill] sm:$0xff] }
 0xab9   :  { %2097 = vmatpush1.bf16.msra.mxu0 %v6715_v8  ;;  %2138 = vmatpush1.bf16.msra.mxu1 %v6716_v61  ;;  %v6831_v8 = vld [vmem:[#allocation98_spill] sm:$0xff]  ;;  %v6832_v61 = vld [vmem:[#allocation99_spill] sm:$0xff] }
 0xaba   :  { %2098 = vmatprep.subr.bf16.mxu0 %v6717_v16  ;;  %2139 = vmatprep.subr.bf16.mxu1 %v6718_v53  ;;  %v6833_v16 = vld [vmem:[#allocation100_spill] sm:$0xff]  ;;  %v6834_v53 = vld [vmem:[#allocation101_spill] sm:$0xff] }
 0xabd   :  { %2099 = vmatpush1.bf16.msra.mxu0 %v6719_v0  ;;  %2140 = vmatpush1.bf16.msra.mxu1 %v6720_v17  ;;  %v6835_v0 = vld [vmem:[#allocation35_spill] sm:$0xff]  ;;  %v6836_v17 = vld [vmem:[#allocation40_spill] sm:$0xff] }
 0xabe   :  { %2100 = vmatprep.subr.bf16.mxu0 %v6721_v55  ;;  %2141 = vmatprep.subr.bf16.mxu1 %v6722_v63 }
 0xac1   :  { %2101 = vmatpush1.bf16.msra.mxu0 %v6723_v4  ;;  %2142 = vmatpush1.bf16.msra.mxu1 %v6724_v12 }
 0xac2   :  { %2102 = vmatprep.subr.bf16.mxu0 %v6725_v18  ;;  %2143 = vmatprep.subr.bf16.mxu1 %v6726_v5 }
 0xac5   :  { %2103 = vmatpush1.bf16.msra.mxu0 %v6727_v19  ;;  %2144 = vmatpush1.bf16.msra.mxu1 %v6728_v21 }
 0xac6   :  { %2104 = vmatprep.subr.bf16.mxu0 %v6729_v23  ;;  %2145 = vmatprep.subr.bf16.mxu1 %v6730_v28 }
 0xac9   :  { %2105 = vmatpush1.bf16.msra.mxu0 %v6731_v29  ;;  %2146 = vmatpush1.bf16.msra.mxu1 %v6732_v30 }
 0xaca   :  { %2106 = vmatprep.subr.bf16.mxu0 %v6733_v31  ;;  %2147 = vmatprep.subr.bf16.mxu1 %v6816_v9 }
 0xacd   :  { %2107 = vmatpush1.bf16.msra.mxu0 %v6817_v58  ;;  %2148 = vmatpush1.bf16.msra.mxu1 %v6818_v14 }
 0xace   :  { %2108 = vmatprep.subr.bf16.mxu0 %v6819_v2  ;;  %2149 = vmatprep.subr.bf16.mxu1 %v6820_v20 }
 0xad1   :  { %2109 = vmatpush1.bf16.msra.mxu0 %v6821_v22  ;;  %2150 = vmatpush1.bf16.msra.mxu1 %v6822_v11 }
 0xad2   :  { %2110 = vmatprep.subr.bf16.mxu0 %v6823_v46  ;;  %2151 = vmatprep.subr.bf16.mxu1 %v6824_v3 }
 0xad5   :  { %2111 = vmatpush1.bf16.msra.mxu0 %v6825_v1  ;;  %2152 = vmatpush1.bf16.msra.mxu1 %v6826_v52  ;;  %v6837_v52 = vld [vmem:[#allocation37_spill] sm:$0xff] }
 0xad6   :  { %2112 = vmatprep.subr.bf16.mxu0 %v6827_v50  ;;  %2153 = vmatprep.subr.bf16.mxu1 %v6828_v56  ;;  %v6839_v50 = vld [vmem:[#allocation39_spill] sm:$0xff]  ;;  %v6840_v56 = vld [vmem:[#allocation44_spill] sm:$0xff] }
 0xad9   :  { %2113 = vmatpush1.bf16.msra.mxu0 %v6829_v41  ;;  %2154 = vmatpush1.bf16.msra.mxu1 %v6830_v15  ;;  %v6841_v41 = vld [vmem:[#allocation41_spill] sm:$0xff] }
 0xada   :  { %2114 = vmatprep.subr.bf16.mxu0 %v6831_v8  ;;  %2155 = vmatprep.subr.bf16.mxu1 %v6832_v61  ;;  %v6842_v15 = vld [vmem:[#allocation45_spill] sm:$0xff]  ;;  %v6843_v8 = vld [vmem:[#allocation43_spill] sm:$0xff]  ;;  %v6844_v61 = vld [vmem:[#allocation46_spill] sm:$0xff] }
 0xadd   :  { %2115 = vmatpush1.bf16.msra.mxu0 %v6833_v16  ;;  %2156 = vmatpush1.bf16.msra.mxu1 %v6834_v53  ;;  %v6845_v16 = vld [vmem:[#allocation47_spill] sm:$0xff]  ;;  %v6846_v53 = vld [vmem:[#allocation48_spill] sm:$0xff] }
 0xade   :  { %2191 = vmatprep.subr.bf16.mxu0 %v6835_v0  ;;  %2232 = vmatprep.subr.bf16.mxu1 %v6836_v17 }
 0xb72   :  { %v2011_v55 = vpop.f32.mrb[40].mxu0  ;;  %v2052_v63 = vpop.f32.mrb[40].mxu1 }
 0xb73   :  { %v2012_v4 = vadd.f32 %v2011_v55, %v6549_v37  ;;  %v2013_v12 = vpop.f32.mrb[41].mxu0  ;;  %v2054_v18 = vpop.f32.mrb[41].mxu1  ;;  %v2053_v31 = vadd.f32 %v2052_v63, %v4320_v24  ;;  %v6847_v55 = vld [vmem:[#allocation49_spill] sm:$0xff]  ;;  %v6848_v63 = vld [vmem:[#allocation50_spill] sm:$0xff] }
 0xb74   :  { %v2014_v5 = vadd.f32 %v2013_v12, %v4315_v13  ;;  %v2015_v19 = vpop.f32.mrb[42].mxu0  ;;  %v2056_v21 = vpop.f32.mrb[42].mxu1  ;;  %v2055_v44 = vadd.f32 %v2054_v18, %v4323_v26  ;;  %v6850_v12 = vld [vmem:[#allocation52_spill] sm:$0xff]  ;;  %v6851_v18 = vld [vmem:[#allocation53_spill] sm:$0xff] }
 0xb75   :  { %v2828_v23 = vmul.f32 -1.442695, %v2012_v4  ;;  %v2016_v28 = vpop.f32.mrb[43].mxu0  ;;  %v2057_v29 = vpop.f32.mrb[43].mxu1  ;;  %v2830_v45 = vmul.f32 -1.442695, %v2053_v31 }
 0xb76   :  { %v2829_v30 = vmul.f32 -1.442695, %v2014_v5  ;;  %v6849_v4 = vld [vmem:[#allocation51_spill] sm:$0xff]  ;;  %v6852_v5 = vld [vmem:[#allocation54_spill] sm:$0xff]  ;;  %v6854_v21 = vld [vmem:[#allocation56_spill] sm:$0xff] }
 0xb77   :  { %3205 = vpow2.f32 %v2828_v23  ;;  %v6853_v19 = vld [vmem:[#allocation55_spill] sm:$0xff]  ;;  %v6855_v23 = vld [vmem:[#allocation57_spill] sm:$0xff]  ;;  %v6856_v28 = vld [vmem:[#allocation58_spill] sm:$0xff] }
 0xb78   :  { %3207 = vpow2.f32 %v2829_v30  ;;  %v6857_v29 = vld [vmem:[#allocation59_spill] sm:$0xff]  ;;  %v6858_v30 = vld [vmem:[#allocation60_spill] sm:$0xff]  ;;  %v6859_v31 = vld [vmem:[#allocation61_spill] sm:$0xff] }
 0xb79   :  { %3209 = vtanh.f32 %v2055_v44  ;;  %v6860_v44 = vld [vmem:[#allocation62_spill] sm:$0xff] }
 0xb7a   :  { %3211 = vpow2.f32 %v2830_v45  ;;  %v6861_v45 = vld [vmem:[#allocation63_spill] sm:$0xff] }
 0xb81   :  { %v3206_v36 = vpop.eup %3205 }
 0xb82   :  { %v2068_v49 = vadd.f32 1.0, %v3206_v36  ;;  %v3208_v39 = vpop.eup %3207  ;;  %v6862_v36 = vld [vmem:[#allocation64_spill] sm:$0xff] }
 0xb83   :  { %v2069_v35 = vadd.f32 1.0, %v3208_v39  ;;  %v3210_v47 = vpop.eup %3209  ;;  %v6864_v39 = vld [vmem:[#allocation66_spill] sm:$0xff] }
 0xb84   :  { %3213 = vrcp.f32 %v2068_v49  ;;  %v3212_v43 = vpop.eup %3211  ;;  %v6863_v49 = vld [vmem:[#allocation65_spill] sm:$0xff] }
 0xb85   :  { %3215 = vrcp.f32 %v2069_v35  ;;  %v2070_v2 = vadd.f32 1.0, %v3212_v43  ;;  %v6865_v35 = vld [vmem:[#allocation67_spill] sm:$0xff]  ;;  %v6867_v43 = vld [vmem:[#allocation69_spill] sm:$0xff] }
 0xb87   :  { %3217 = vrcp.f32 %v2070_v2  ;;  %v6871_v2 = vld [vmem:[#allocation75_spill] sm:$0xff] }
 0xb8e   :  { %v3214_v9 = vpop.eup %3213 }
 0xb8f   :  { %v2079_v58 = vmul.f32 %v3214_v9, %v3210_v47  ;;  %v3216_v14 = vpop.eup %3215  ;;  %v6866_v47 = vld [vmem:[#allocation68_spill] sm:$0xff]  ;;  %v6868_v9 = vld [vmem:[#allocation70_spill] sm:$0xff] }
 0xb90   :  { %v2078_v20 = vmul.f32 %v3216_v14, %v5027_v6  ;;  %v6838_v6 = vld [vmem:[#allocation42_spill] sm:$0xff]  ;;  %v6870_v14 = vld [vmem:[#allocation72_spill] sm:$0xff] }
 0xb91   :  { %v3218_v11 = vpop.eup %3217 }
 0xb92   :  { %v5316_v22 = vadd.f32 %v2079_v58, %v2078_v20  ;;  %v6869_v58 = vld [vmem:[#allocation71_spill] sm:$0xff]  ;;  %v6872_v20 = vld [vmem:[#allocation73_spill] sm:$0xff] }
 0xb94   :  { %3219 = vtanh.f32 %v5316_v22 }
 0xb9e   :  { %v3220_v46 = vpop.eup %3219 }
 0xb9f   :  { %v2082_v3 = vmul.f32 %v3220_v46, %v3218_v11  ;;  %v6873_v11 = vld [vmem:[#allocation76_spill] sm:$0xff]  ;;  %v6874_v46 = vld [vmem:[#allocation77_spill] sm:$0xff] }
 0xba1   :  { %v2083_v1 = vpack.c.bf16 %v2082_v3, %v2082_v3  ;;  %v6875_v3 = vld [vmem:[#allocation74_spill] sm:$0xff] }
 0xba3   :  { %2117 = vmatmul.mubr.bf16.vlgmr.msra.gmra.mrb[44].mxu0 %v2083_v1  ;;  %2158 = vmatmul.mubr.bf16.vlgmr.msra.gmra.mrb[44].mxu1 %v2083_v1 }
 0xba4   :  { %2223 = vmatprep.mubr.bf16.mxu0 %v2083_v1  ;;  %2264 = vmatprep.mubr.bf16.mxu1 %v2083_v1  ;;  %v6876_v1 = vld [vmem:[#allocation78_spill] sm:$0xff] }
 0xba5   :  { %2192 = vmatpush1.bf16.msra.mxu0 %v5030_v32  ;;  %2233 = vmatpush1.bf16.msra.mxu1 %v5033_v34 }
 0xba6   :  { %2193 = vmatprep.subr.bf16.mxu0 %v6837_v52  ;;  %2234 = vmatprep.subr.bf16.mxu1 %v6838_v6 }
 0xba9   :  { %2194 = vmatpush1.bf16.msra.mxu0 %v6839_v50  ;;  %2235 = vmatpush1.bf16.msra.mxu1 %v6840_v56 }
 0xbaa   :  { %2195 = vmatprep.subr.bf16.mxu0 %v6841_v41  ;;  %2236 = vmatprep.subr.bf16.mxu1 %v6842_v15 }
 0xbad   :  { %2196 = vmatpush1.bf16.msra.mxu0 %v6843_v8  ;;  %2237 = vmatpush1.bf16.msra.mxu1 %v6844_v61 }
 0xbae   :  { %2197 = vmatprep.subr.bf16.mxu0 %v6845_v16  ;;  %2238 = vmatprep.subr.bf16.mxu1 %v6846_v53 }
 0xbb1   :  { %2198 = vmatpush1.bf16.msra.mxu0 %v6847_v55  ;;  %2239 = vmatpush1.bf16.msra.mxu1 %v6848_v63 }
 0xbb2   :  { %2199 = vmatprep.subr.bf16.mxu0 %v6849_v4  ;;  %2240 = vmatprep.subr.bf16.mxu1 %v6850_v12 }
 0xbb5   :  { %2200 = vmatpush1.bf16.msra.mxu0 %v6851_v18  ;;  %2241 = vmatpush1.bf16.msra.mxu1 %v6852_v5 }
 0xbb6   :  { %2201 = vmatprep.subr.bf16.mxu0 %v6853_v19  ;;  %2242 = vmatprep.subr.bf16.mxu1 %v6854_v21 }
 0xbb9   :  { %2202 = vmatpush1.bf16.msra.mxu0 %v6855_v23  ;;  %2243 = vmatpush1.bf16.msra.mxu1 %v6856_v28 }
 0xbba   :  { %2203 = vmatprep.subr.bf16.mxu0 %v6857_v29  ;;  %2244 = vmatprep.subr.bf16.mxu1 %v6858_v30 }
 0xbbd   :  { %2204 = vmatpush1.bf16.msra.mxu0 %v6859_v31  ;;  %2245 = vmatpush1.bf16.msra.mxu1 %v6860_v44 }
 0xbbe   :  { %2205 = vmatprep.subr.bf16.mxu0 %v6861_v45  ;;  %2246 = vmatprep.subr.bf16.mxu1 %v6862_v36 }
 0xbc1   :  { %2206 = vmatpush1.bf16.msra.mxu0 %v6863_v49  ;;  %2247 = vmatpush1.bf16.msra.mxu1 %v6864_v39 }
 0xbc2   :  { %2207 = vmatprep.subr.bf16.mxu0 %v6865_v35  ;;  %2248 = vmatprep.subr.bf16.mxu1 %v6866_v47  ;;  %v6877_v47 = vld [vmem:[#allocation79_spill] sm:$0xff] }
 0xbc5   :  { %2208 = vmatpush1.bf16.msra.mxu0 %v6867_v43  ;;  %2249 = vmatpush1.bf16.msra.mxu1 %v6868_v9  ;;  %v6878_v43 = vld [vmem:[#allocation80_spill] sm:$0xff]  ;;  %v6879_v9 = vld [vmem:[#allocation81_spill] sm:$0xff] }
 0xbc6   :  { %2209 = vmatprep.subr.bf16.mxu0 %v6869_v58  ;;  %2250 = vmatprep.subr.bf16.mxu1 %v6870_v14  ;;  %v6880_v58 = vld [vmem:[#allocation82_spill] sm:$0xff]  ;;  %v6881_v14 = vld [vmem:[#allocation83_spill] sm:$0xff] }
 0xbc9   :  { %2210 = vmatpush1.bf16.msra.mxu0 %v6871_v2  ;;  %2251 = vmatpush1.bf16.msra.mxu1 %v6872_v20  ;;  %v6882_v2 = vld [vmem:[#allocation84_spill] sm:$0xff]  ;;  %v6883_v20 = vld [vmem:[#allocation85_spill] sm:$0xff] }
 0xbca   :  { %2211 = vmatprep.subr.bf16.mxu0 %v6873_v11  ;;  %2252 = vmatprep.subr.bf16.mxu1 %v6874_v46  ;;  %v6884_v11 = vld [vmem:[#allocation86_spill] sm:$0xff]  ;;  %v6885_v46 = vld [vmem:[#allocation87_spill] sm:$0xff] }
 0xbcd   :  { %2212 = vmatpush1.bf16.msra.mxu0 %v6875_v3  ;;  %2253 = vmatpush1.bf16.msra.mxu1 %v6876_v1  ;;  %v6886_v3 = vld [vmem:[#allocation88_spill] sm:$0xff]  ;;  %v6887_v1 = vld [vmem:[#allocation89_spill] sm:$0xff] }
 0xbce   :  { %2213 = vmatprep.subr.bf16.mxu0 %v6877_v47  ;;  %2254 = vmatprep.subr.bf16.mxu1 %v6878_v43  ;;  %v6888_v47 = vld [vmem:[#allocation90_spill] sm:$0xff]  ;;  %v6889_v43 = vld [vmem:[#allocation91_spill] sm:$0xff] }
 0xbd1   :  { %2214 = vmatpush1.bf16.msra.mxu0 %v6879_v9  ;;  %2255 = vmatpush1.bf16.msra.mxu1 %v6880_v58  ;;  %v6890_v9 = vld [vmem:[#allocation92_spill] sm:$0xff]  ;;  %v6891_v58 = vld [vmem:[#allocation93_spill] sm:$0xff] }
 0xbd2   :  { %2215 = vmatprep.subr.bf16.mxu0 %v6881_v14  ;;  %2256 = vmatprep.subr.bf16.mxu1 %v6882_v2  ;;  %v6892_v14 = vld [vmem:[#allocation94_spill] sm:$0xff]  ;;  %v6893_v2 = vld [vmem:[#allocation12_spill] sm:$0xff] }
 0xbd5   :  { %2216 = vmatpush1.bf16.msra.mxu0 %v6883_v20  ;;  %2257 = vmatpush1.bf16.msra.mxu1 %v6884_v11  ;;  %v6894_v20 = vld [vmem:[#allocation17_spill] sm:$0xff] }
 0xbd6   :  { %2217 = vmatprep.subr.bf16.mxu0 %v6885_v46  ;;  %2258 = vmatprep.subr.bf16.mxu1 %v6886_v3  ;;  %v6895_v11 = vld [vmem:[#allocation13_spill] sm:$0xff]  ;;  %v5380_v46 = vld [vmem:[#allocation5 + $0x1e8] ss:$16 sps:$4 sm:$0xff]  }
 0xbd7   :  { %6896 = vst [vmem:[#allocation21_spill] sm:$0xff] %v5380_v46 }
 0xbd9   :  { %2218 = vmatpush1.bf16.msra.mxu0 %v6887_v1  ;;  %2259 = vmatpush1.bf16.msra.mxu1 %v6888_v47  ;;  %v6897_v1 = vld [vmem:[#allocation18_spill] sm:$0xff] }
 0xbda   :  { %2219 = vmatprep.subr.bf16.mxu0 %v6889_v43  ;;  %2260 = vmatprep.subr.bf16.mxu1 %v6890_v9  ;;  %v5384_v47 = vld [vmem:[#allocation7 + $0xc] ss:$16 sps:$4 sm:$0xff]  }
 0xbdb   :  { %6898 = vst [vmem:[#allocation16_spill] sm:$0xff] %v5384_v47 }
 0xbdd   :  { %2220 = vmatpush1.bf16.msra.mxu0 %v6891_v58  ;;  %2261 = vmatpush1.bf16.msra.mxu1 %v6892_v14 }
 0xbde   :  { %2221 = vmatprep.subr.bf16.mxu0 %v6893_v2  ;;  %2262 = vmatprep.subr.bf16.mxu1 %v6894_v20 }
 0xbe1   :  { %2222 = vmatpush1.bf16.msra.mxu0 %v6895_v11  ;;  %2263 = vmatpush1.bf16.msra.mxu1 %v5380_v46 }
 0xbe2   :  { %2298 = vmatprep.subr.bf16.mxu0 %v6897_v1  ;;  %2339 = vmatprep.subr.bf16.mxu1 %v5384_v47 }
 0xc76   :  { %v2118_v9 = vpop.f32.mrb[44].mxu0  ;;  %v2159_v58 = vpop.f32.mrb[44].mxu1 }
 0xc77   :  { %v2119_v14 = vadd.f32 %v2118_v9, %v4215_v25  ;;  %v2120_v43 = vpop.f32.mrb[45].mxu0  ;;  %v2161_v2 = vpop.f32.mrb[45].mxu1  ;;  %v2160_v1 = vadd.f32 %v2159_v58, %v4223_v40 }
 0xc78   :  { %v2121_v20 = vadd.f32 %v2120_v43, %v4218_v27  ;;  %v2122_v3 = vpop.f32.mrb[46].mxu0  ;;  %v2163_v11 = vpop.f32.mrb[46].mxu1  ;;  %v2162_v47 = vadd.f32 %v2161_v2, %v4226_v42 }
 0xc79   :  { %v2831_v35 = vmul.f32 -1.442695, %v2119_v14  ;;  %v2123_v39 = vpop.f32.mrb[47].mxu0  ;;  %v2164_v49 = vpop.f32.mrb[47].mxu1  ;;  %v2833_v36 = vmul.f32 -1.442695, %v2160_v1 }
 0xc7a   :  { %v2832_v46 = vmul.f32 -1.442695, %v2121_v20  ;;  %v5411_v1 = vld [vmem:[#allocation7 + $0x48] ss:$16 sps:$4 sm:$0xff]  }
 0xc7b   :  { %3221 = vpow2.f32 %v2831_v35 }
 0xc7c   :  { %3223 = vpow2.f32 %v2832_v46 }
 0xc7d   :  { %3225 = vtanh.f32 %v2162_v47 }
 0xc7e   :  { %3227 = vpow2.f32 %v2833_v36 }
 0xc85   :  { %v3222_v45 = vpop.eup %3221 }
 0xc86   :  { %v2175_v44 = vadd.f32 1.0, %v3222_v45  ;;  %v3224_v9 = vpop.eup %3223 }
 0xc87   :  { %v2176_v43 = vadd.f32 1.0, %v3224_v9  ;;  %v3226_v11 = vpop.eup %3225  ;;  %v5415_v9 = vld [vmem:[#allocation7 + $0x6c] ss:$16 sps:$4 sm:$0xff]  }
 0xc88   :  { %3229 = vrcp.f32 %v2175_v44  ;;  %v3228_v14 = vpop.eup %3227  ;;  %6899 = vst [vmem:[#allocation23_spill] sm:$0xff] %v5415_v9 }
 0xc89   :  { %3231 = vrcp.f32 %v2176_v43  ;;  %v2177_v35 = vadd.f32 1.0, %v3228_v14  ;;  %v5419_v43 = vld [vmem:[#allocation7 + $0x68] ss:$16 sps:$4 sm:$0xff]   ;;  %v5425_v14 = vld [vmem:[#allocation7 + $0x8c] ss:$16 sps:$4 sm:$0xff]  }
 0xc8a   :  { %6900 = vst [vmem:[#allocation19_spill] sm:$0xff] %v5419_v43  ;;  %6902 = vst [vmem:[#allocation20_spill] sm:$0xff] %v5425_v14 }
 0xc8b   :  { %3233 = vrcp.f32 %v2177_v35  ;;  %v5437_v35 = vld [vmem:[#allocation7 + $0xac] ss:$16 sps:$4 sm:$0xff]  }
 0xc8c   :  { %6906 = vst [vmem:[#allocation24_spill] sm:$0xff] %v5437_v35 }
 0xc92   :  { %v3230_v39 = vpop.eup %3229 }
 0xc93   :  { %v2186_v49 = vmul.f32 %v3230_v39, %v3226_v11  ;;  %v3232_v20 = vpop.eup %3231  ;;  %v5422_v11 = vld [vmem:[#allocation7 + $0x84] ss:$16 sps:$4 sm:$0xff]   ;;  %v5428_v39 = vld [vmem:[#allocation7 + $0x80] ss:$16 sps:$4 sm:$0xff]  }
 0xc94   :  { %v2185_v46 = vmul.f32 %v3232_v20, %v5223_v54  ;;  %v5403_v54 = vld [vmem:[#allocation7 + $0x28] ss:$16 sps:$4 sm:$0xff]   ;;  %6901 = vst [vmem:[#allocation25_spill] sm:$0xff] %v5422_v11  ;;  %6903 = vst [vmem:[#allocation26_spill] sm:$0xff] %v5428_v39  ;;  %v5434_v20 = vld [vmem:[#allocation7 + $0xa4] ss:$16 sps:$4 sm:$0xff]  }
 0xc95   :  { %v3234_v45 = vpop.eup %3233  ;;  %6905 = vst [vmem:[#allocation28_spill] sm:$0xff] %v5434_v20 }
 0xc96   :  { %v5392_v58 = vadd.f32 %v2186_v49, %v2185_v46  ;;  %v5431_v49 = vld [vmem:[#allocation7 + $0x88] ss:$16 sps:$4 sm:$0xff]   ;;  %v5440_v46 = vld [vmem:[#allocation7 + $0xa0] ss:$16 sps:$4 sm:$0xff]  }
 0xc97   :  { %6904 = vst [vmem:[#allocation22_spill] sm:$0xff] %v5431_v49  ;;  %6907 = vst [vmem:[#allocation30_spill] sm:$0xff] %v5440_v46 }
 0xc98   :  { %3235 = vtanh.f32 %v5392_v58 }
 0xca2   :  { %v3236_v47 = vpop.eup %3235 }
 0xca3   :  { %v2189_v2 = vmul.f32 %v3236_v47, %v3234_v45  ;;  %v5443_v45 = vld [vmem:[#allocation7 + $0xa8] ss:$16 sps:$4 sm:$0xff]   ;;  %v5446_v47 = vld [vmem:[#allocation7 + $0xc4] ss:$16 sps:$4 sm:$0xff]  }
 0xca4   :  { %6908 = vst [vmem:[#allocation27_spill] sm:$0xff] %v5443_v45  ;;  %6909 = vst [vmem:[#allocation32_spill] sm:$0xff] %v5446_v47 }
 0xca5   :  { %v2190_v44 = vpack.c.bf16 %v2189_v2, %v2189_v2  ;;  %v2631_v36 = vrot.slane %v2189_v2, 3  ;;  %v5449_v2 = vld [vmem:[#allocation7 + $0xcc] ss:$16 sps:$4 sm:$0xff]  }
 0xca6   :  { %6910 = vst [vmem:[#allocation29_spill] sm:$0xff] %v5449_v2 }
 0xca7   :  { %2224 = vmatmul.mubr.bf16.vlgmr.msra.gmra.mrb[48].mxu0 %v2190_v44  ;;  %2265 = vmatmul.mubr.bf16.vlgmr.msra.gmra.mrb[48].mxu1 %v2190_v44  ;;  %v5396_v3 = vsel %vm2647_vm4, %v5227_v10, %v2631_v36  ;;  %v5407_v10 = vld [vmem:[#allocation7 + $0x4c] ss:$16 sps:$4 sm:$0xff]   ;;  %v5455_v36 = vld [vmem:[#allocation7 + $0xc8] ss:$16 sps:$4 sm:$0xff]  }
 0xca8   :  { %2330 = vmatprep.mubr.bf16.mxu0 %v2190_v44  ;;  %2371 = vmatprep.mubr.bf16.mxu1 %v2190_v44  ;;  %v5452_v44 = vld [vmem:[#allocation7 + $0xc0] ss:$16 sps:$4 sm:$0xff]   ;;  %6912 = vst [vmem:[#allocation95_spill] sm:$0xff] %v5455_v36 }
 0xca9   :  { %2299 = vmatpush1.bf16.msra.mxu0 %v5229_v7  ;;  %2340 = vmatpush1.bf16.msra.mxu1 %v5232_v51  ;;  %6911 = vst [vmem:[#allocation34_spill] sm:$0xff] %v5452_v44 }
 0xcaa   :  { %2300 = vmatprep.subr.bf16.mxu0 %v5235_v59  ;;  %2341 = vmatprep.subr.bf16.mxu1 %v5238_v33 }
 0xcad   :  { %2301 = vmatpush1.bf16.msra.mxu0 %v5241_v62  ;;  %2342 = vmatpush1.bf16.msra.mxu1 %v5403_v54 }
 0xcae   :  { %2302 = vmatprep.subr.bf16.mxu0 %v5245_v57  ;;  %2343 = vmatprep.subr.bf16.mxu1 %v5407_v10 }
 0xcb1   :  { %2303 = vmatpush1.bf16.msra.mxu0 %v5249_v48  ;;  %2344 = vmatpush1.bf16.msra.mxu1 %v5411_v1 }
 0xcb2   :  { %2304 = vmatprep.subr.bf16.mxu0 %v5253_v38  ;;  %2345 = vmatprep.subr.bf16.mxu1 %v5415_v9 }
 0xcb5   :  { %2305 = vmatpush1.bf16.msra.mxu0 %v5257_v60  ;;  %2346 = vmatpush1.bf16.msra.mxu1 %v5419_v43 }
 0xcb6   :  { %2306 = vmatprep.subr.bf16.mxu0 %v5422_v11  ;;  %2347 = vmatprep.subr.bf16.mxu1 %v5425_v14 }
 0xcb9   :  { %2307 = vmatpush1.bf16.msra.mxu0 %v5428_v39  ;;  %2348 = vmatpush1.bf16.msra.mxu1 %v5431_v49 }
 0xcba   :  { %2308 = vmatprep.subr.bf16.mxu0 %v5434_v20  ;;  %2349 = vmatprep.subr.bf16.mxu1 %v5437_v35 }
 0xcbd   :  { %2309 = vmatpush1.bf16.msra.mxu0 %v5440_v46  ;;  %2350 = vmatpush1.bf16.msra.mxu1 %v5443_v45  ;;  %v5458_v46 = vld [vmem:[#allocation7 + $0xe4] ss:$16 sps:$4 sm:$0xff]   ;;  %v5461_v45 = vld [vmem:[#allocation7 + $0xec] ss:$16 sps:$4 sm:$0xff]  }
 0xcbe   :  { %2310 = vmatprep.subr.bf16.mxu0 %v5446_v47  ;;  %2351 = vmatprep.subr.bf16.mxu1 %v5449_v2  ;;  %6913 = vst [vmem:[#allocation96_spill] sm:$0xff] %v5458_v46  ;;  %6914 = vst [vmem:[#allocation31_spill] sm:$0xff] %v5461_v45  ;;  %v5464_v47 = vld [vmem:[#allocation7 + $0xe0] ss:$16 sps:$4 sm:$0xff]   ;;  %v5467_v2 = vld [vmem:[#allocation7 + $0xe8] ss:$16 sps:$4 sm:$0xff]  }
 0xcbf   :  { %6915 = vst [vmem:[#allocation36_spill] sm:$0xff] %v5464_v47  ;;  %6916 = vst [vmem:[#allocation33_spill] sm:$0xff] %v5467_v2 }
 0xcc1   :  { %2311 = vmatpush1.bf16.msra.mxu0 %v5452_v44  ;;  %2352 = vmatpush1.bf16.msra.mxu1 %v5455_v36  ;;  %v5470_v44 = vld [vmem:[#allocation7 + $0x104] ss:$16 sps:$4 sm:$0xff]   ;;  %v5473_v36 = vld [vmem:[#allocation7 + $0x10c] ss:$16 sps:$4 sm:$0xff]  }
 0xcc2   :  { %2312 = vmatprep.subr.bf16.mxu0 %v5458_v46  ;;  %2353 = vmatprep.subr.bf16.mxu1 %v5461_v45  ;;  %6917 = vst [vmem:[#allocation38_spill] sm:$0xff] %v5470_v44  ;;  %6918 = vst [vmem:[#allocation14_spill] sm:$0xff] %v5473_v36  ;;  %v5476_v46 = vld [vmem:[#allocation7 + $0x100] ss:$16 sps:$4 sm:$0xff]   ;;  %v5479_v45 = vld [vmem:[#allocation7 + $0x108] ss:$16 sps:$4 sm:$0xff]  }
 0xcc3   :  { %6919 = vst [vmem:[#allocation97_spill] sm:$0xff] %v5476_v46  ;;  %6920 = vst [vmem:[#allocation98_spill] sm:$0xff] %v5479_v45 }
 0xcc5   :  { %2313 = vmatpush1.bf16.msra.mxu0 %v5464_v47  ;;  %2354 = vmatpush1.bf16.msra.mxu1 %v5467_v2  ;;  %v5482_v47 = vld [vmem:[#allocation7 + $0x124] ss:$16 sps:$4 sm:$0xff]   ;;  %v5485_v2 = vld [vmem:[#allocation7 + $0x12c] ss:$16 sps:$4 sm:$0xff]  }
 0xcc6   :  { %2314 = vmatprep.subr.bf16.mxu0 %v5470_v44  ;;  %2355 = vmatprep.subr.bf16.mxu1 %v5473_v36  ;;  %6921 = vst [vmem:[#allocation99_spill] sm:$0xff] %v5482_v47  ;;  %6922 = vst [vmem:[#allocation100_spill] sm:$0xff] %v5485_v2  ;;  %v5488_v44 = vld [vmem:[#allocation7 + $0x120] ss:$16 sps:$4 sm:$0xff]   ;;  %v5491_v36 = vld [vmem:[#allocation7 + $0x128] ss:$16 sps:$4 sm:$0xff]  }
 0xcc7   :  { %6923 = vst [vmem:[#allocation101_spill] sm:$0xff] %v5488_v44  ;;  %6924 = vst [vmem:[#allocation35_spill] sm:$0xff] %v5491_v36 }
 0xcc9   :  { %2315 = vmatpush1.bf16.msra.mxu0 %v5476_v46  ;;  %2356 = vmatpush1.bf16.msra.mxu1 %v5479_v45  ;;  %v5494_v46 = vld [vmem:[#allocation7 + $0x144] ss:$16 sps:$4 sm:$0xff]   ;;  %v5497_v45 = vld [vmem:[#allocation7 + $0x14c] ss:$16 sps:$4 sm:$0xff]  }
 0xcca   :  { %2316 = vmatprep.subr.bf16.mxu0 %v5482_v47  ;;  %2357 = vmatprep.subr.bf16.mxu1 %v5485_v2  ;;  %6925 = vst [vmem:[#allocation40_spill] sm:$0xff] %v5494_v46  ;;  %6926 = vst [vmem:[#allocation37_spill] sm:$0xff] %v5497_v45  ;;  %v5500_v47 = vld [vmem:[#allocation7 + $0x140] ss:$16 sps:$4 sm:$0xff]   ;;  %v5503_v2 = vld [vmem:[#allocation7 + $0x148] ss:$16 sps:$4 sm:$0xff]  }
 0xccb   :  { %6927 = vst [vmem:[#allocation42_spill] sm:$0xff] %v5500_v47  ;;  %6928 = vst [vmem:[#allocation39_spill] sm:$0xff] %v5503_v2 }
 0xccd   :  { %2317 = vmatpush1.bf16.msra.mxu0 %v5488_v44  ;;  %2358 = vmatpush1.bf16.msra.mxu1 %v5491_v36  ;;  %v5506_v44 = vld [vmem:[#allocation7 + $0x164] ss:$16 sps:$4 sm:$0xff]   ;;  %v5509_v36 = vld [vmem:[#allocation7 + $0x16c] ss:$16 sps:$4 sm:$0xff]  }
 0xcce   :  { %2318 = vmatprep.subr.bf16.mxu0 %v5494_v46  ;;  %2359 = vmatprep.subr.bf16.mxu1 %v5497_v45  ;;  %6929 = vst [vmem:[#allocation44_spill] sm:$0xff] %v5506_v44  ;;  %6930 = vst [vmem:[#allocation41_spill] sm:$0xff] %v5509_v36  ;;  %v5512_v46 = vld [vmem:[#allocation7 + $0x160] ss:$16 sps:$4 sm:$0xff]   ;;  %v5515_v45 = vld [vmem:[#allocation7 + $0x168] ss:$16 sps:$4 sm:$0xff]  }
 0xccf   :  { %6931 = vst [vmem:[#allocation45_spill] sm:$0xff] %v5512_v46  ;;  %6932 = vst [vmem:[#allocation43_spill] sm:$0xff] %v5515_v45 }
 0xcd1   :  { %2319 = vmatpush1.bf16.msra.mxu0 %v5500_v47  ;;  %2360 = vmatpush1.bf16.msra.mxu1 %v5503_v2  ;;  %v5518_v47 = vld [vmem:[#allocation7 + $0x184] ss:$16 sps:$4 sm:$0xff]   ;;  %v5521_v2 = vld [vmem:[#allocation7 + $0x18c] ss:$16 sps:$4 sm:$0xff]  }
 0xcd2   :  { %2320 = vmatprep.subr.bf16.mxu0 %v5506_v44  ;;  %2361 = vmatprep.subr.bf16.mxu1 %v5509_v36  ;;  %6933 = vst [vmem:[#allocation46_spill] sm:$0xff] %v5518_v47  ;;  %6934 = vst [vmem:[#allocation47_spill] sm:$0xff] %v5521_v2  ;;  %v5524_v44 = vld [vmem:[#allocation7 + $0x180] ss:$16 sps:$4 sm:$0xff]   ;;  %v5527_v36 = vld [vmem:[#allocation7 + $0x188] ss:$16 sps:$4 sm:$0xff]  }
 0xcd3   :  { %6935 = vst [vmem:[#allocation48_spill] sm:$0xff] %v5524_v44  ;;  %6936 = vst [vmem:[#allocation49_spill] sm:$0xff] %v5527_v36 }
 0xcd5   :  { %2321 = vmatpush1.bf16.msra.mxu0 %v5512_v46  ;;  %2362 = vmatpush1.bf16.msra.mxu1 %v5515_v45  ;;  %v5530_v46 = vld [vmem:[#allocation7 + $0x1a4] ss:$16 sps:$4 sm:$0xff]   ;;  %v5533_v45 = vld [vmem:[#allocation7 + $0x1ac] ss:$16 sps:$4 sm:$0xff]  }
 0xcd6   :  { %2322 = vmatprep.subr.bf16.mxu0 %v5518_v47  ;;  %2363 = vmatprep.subr.bf16.mxu1 %v5521_v2  ;;  %6937 = vst [vmem:[#allocation50_spill] sm:$0xff] %v5530_v46  ;;  %6938 = vst [vmem:[#allocation51_spill] sm:$0xff] %v5533_v45  ;;  %v5536_v47 = vld [vmem:[#allocation7 + $0x1a0] ss:$16 sps:$4 sm:$0xff]   ;;  %v5539_v2 = vld [vmem:[#allocation7 + $0x1a8] ss:$16 sps:$4 sm:$0xff]  }
 0xcd7   :  { %6939 = vst [vmem:[#allocation52_spill] sm:$0xff] %v5536_v47  ;;  %6940 = vst [vmem:[#allocation53_spill] sm:$0xff] %v5539_v2 }
 0xcd9   :  { %2323 = vmatpush1.bf16.msra.mxu0 %v5524_v44  ;;  %2364 = vmatpush1.bf16.msra.mxu1 %v5527_v36  ;;  %v5542_v44 = vld [vmem:[#allocation7 + $0x1c4] ss:$16 sps:$4 sm:$0xff]   ;;  %v5545_v36 = vld [vmem:[#allocation7 + $0x1cc] ss:$16 sps:$4 sm:$0xff]  }
 0xcda   :  { %2324 = vmatprep.subr.bf16.mxu0 %v5530_v46  ;;  %2365 = vmatprep.subr.bf16.mxu1 %v5533_v45  ;;  %6941 = vst [vmem:[#allocation54_spill] sm:$0xff] %v5542_v44  ;;  %6942 = vst [vmem:[#allocation55_spill] sm:$0xff] %v5545_v36  ;;  %v5548_v46 = vld [vmem:[#allocation7 + $0x1c0] ss:$16 sps:$4 sm:$0xff]   ;;  %v5551_v45 = vld [vmem:[#allocation7 + $0x1c8] ss:$16 sps:$4 sm:$0xff]  }
 0xcdb   :  { %6943 = vst [vmem:[#allocation56_spill] sm:$0xff] %v5548_v46  ;;  %6944 = vst [vmem:[#allocation57_spill] sm:$0xff] %v5551_v45 }
 0xcdd   :  { %2325 = vmatpush1.bf16.msra.mxu0 %v5536_v47  ;;  %2366 = vmatpush1.bf16.msra.mxu1 %v5539_v2  ;;  %v5554_v47 = vld [vmem:[#allocation7 + $0x1e4] ss:$16 sps:$4 sm:$0xff]   ;;  %v5557_v2 = vld [vmem:[#allocation7 + $0x1ec] ss:$16 sps:$4 sm:$0xff]  }
 0xcde   :  { %2326 = vmatprep.subr.bf16.mxu0 %v5542_v44  ;;  %2367 = vmatprep.subr.bf16.mxu1 %v5545_v36  ;;  %6945 = vst [vmem:[#allocation58_spill] sm:$0xff] %v5554_v47  ;;  %6946 = vst [vmem:[#allocation59_spill] sm:$0xff] %v5557_v2  ;;  %v5560_v44 = vld [vmem:[#allocation7 + $0x1e0] ss:$16 sps:$4 sm:$0xff]   ;;  %v5563_v36 = vld [vmem:[#allocation7 + $0x1e8] ss:$16 sps:$4 sm:$0xff]  }
 0xcdf   :  { %6947 = vst [vmem:[#allocation60_spill] sm:$0xff] %v5560_v44  ;;  %6948 = vst [vmem:[#allocation61_spill] sm:$0xff] %v5563_v36 }
 0xce1   :  { %2327 = vmatpush1.bf16.msra.mxu0 %v5548_v46  ;;  %2368 = vmatpush1.bf16.msra.mxu1 %v5551_v45 }
 0xce2   :  { %2328 = vmatprep.subr.bf16.mxu0 %v5554_v47  ;;  %2369 = vmatprep.subr.bf16.mxu1 %v5557_v2 }
 0xce5   :  { %2329 = vmatpush1.bf16.msra.mxu0 %v5560_v44  ;;  %2370 = vmatpush1.bf16.msra.mxu1 %v5563_v36 }
 0xce6   :  { %2405 = vmatprep.subr.bf16.mxu0 %v6835_v0  ;;  %2446 = vmatprep.subr.bf16.mxu1 %v6836_v17 }
 0xd7a   :  { %v2225_v45 = vpop.f32.mrb[48].mxu0  ;;  %v2266_v46 = vpop.f32.mrb[48].mxu1 }
 0xd7b   :  { %v2226_v47 = vadd.f32 %v2225_v45, %v6549_v37  ;;  %v2227_v35 = vpop.f32.mrb[49].mxu0  ;;  %v2268_v20 = vpop.f32.mrb[49].mxu1  ;;  %v2267_v0 = vadd.f32 %v2266_v46, %v4320_v24 }
 0xd7c   :  { %v2228_v2 = vadd.f32 %v2227_v35, %v4315_v13  ;;  %v2229_v49 = vpop.f32.mrb[50].mxu0  ;;  %v2270_v39 = vpop.f32.mrb[50].mxu1  ;;  %v2269_v17 = vadd.f32 %v2268_v20, %v4323_v26 }
 0xd7d   :  { %v2834_v14 = vmul.f32 -1.442695, %v2226_v47  ;;  %v2230_v44 = vpop.f32.mrb[51].mxu0  ;;  %v2271_v11 = vpop.f32.mrb[51].mxu1  ;;  %v2836_v36 = vmul.f32 -1.442695, %v2267_v0 }
 0xd7e   :  { %v2835_v43 = vmul.f32 -1.442695, %v2228_v2  ;;  %v6976_v0 = vld [vmem:[#allocation89_spill] sm:$0xff] }
 0xd7f   :  { %3237 = vpow2.f32 %v2834_v14 }
 0xd80   :  { %3239 = vpow2.f32 %v2835_v43 }
 0xd81   :  { %3241 = vtanh.f32 %v2269_v17  ;;  %v6977_v17 = vld [vmem:[#allocation90_spill] sm:$0xff] }
 0xd82   :  { %3243 = vpow2.f32 %v2836_v36 }
 0xd89   :  { %v3238_v60 = vpop.eup %3237 }
 0xd8a   :  { %v2282_v9 = vadd.f32 1.0, %v3238_v60  ;;  %v3240_v45 = vpop.eup %3239 }
 0xd8b   :  { %v2283_v35 = vadd.f32 1.0, %v3240_v45  ;;  %v3242_v39 = vpop.eup %3241  ;;  %v6978_v45 = vld [vmem:[#allocation91_spill] sm:$0xff] }
 0xd8c   :  { %3245 = vrcp.f32 %v2282_v9  ;;  %v3244_v49 = vpop.eup %3243  ;;  %v6975_v9 = vld [vmem:[#allocation88_spill] sm:$0xff] }
 0xd8d   :  { %3247 = vrcp.f32 %v2283_v35  ;;  %v2284_v14 = vadd.f32 1.0, %v3244_v49  ;;  %v6979_v35 = vld [vmem:[#allocation92_spill] sm:$0xff]  ;;  %v6981_v49 = vld [vmem:[#allocation94_spill] sm:$0xff] }
 0xd8f   :  { %3249 = vrcp.f32 %v2284_v14  ;;  %v6985_v14 = vld [vmem:[#allocation21_spill] sm:$0xff] }
 0xd96   :  { %v3246_v47 = vpop.eup %3245 }
 0xd97   :  { %v2293_v11 = vmul.f32 %v3246_v47, %v3242_v39  ;;  %v3248_v2 = vpop.eup %3247  ;;  %v6980_v39 = vld [vmem:[#allocation93_spill] sm:$0xff]  ;;  %v6982_v47 = vld [vmem:[#allocation12_spill] sm:$0xff] }
 0xd98   :  { %v2292_v43 = vmul.f32 %v3248_v2, %v5316_v22  ;;  %v6951_v22 = vld [vmem:[#allocation64_spill] sm:$0xff]  ;;  %v6984_v2 = vld [vmem:[#allocation13_spill] sm:$0xff] }
 0xd99   :  { %v3250_v60 = vpop.eup %3249 }
 0xd9a   :  { %v5573_v46 = vadd.f32 %v2293_v11, %v2292_v43  ;;  %v6983_v11 = vld [vmem:[#allocation17_spill] sm:$0xff]  ;;  %v6986_v43 = vld [vmem:[#allocation18_spill] sm:$0xff] }
 0xd9c   :  { %3251 = vtanh.f32 %v5573_v46 }
 0xda6   :  { %v3252_v20 = vpop.eup %3251 }
 0xda7   :  { %v2296_v44 = vmul.f32 %v3252_v20, %v3250_v60  ;;  %v6987_v60 = vld [vmem:[#allocation16_spill] sm:$0xff] }
 0xda9   :  { %v2297_v36 = vpack.c.bf16 %v2296_v44, %v2296_v44 }
 0xdab   :  { %2331 = vmatmul.mubr.bf16.vlgmr.msra.gmra.mrb[52].mxu0 %v2297_v36  ;;  %2372 = vmatmul.mubr.bf16.vlgmr.msra.gmra.mrb[52].mxu1 %v2297_v36 }
 0xdac   :  { %2437 = vmatprep.mubr.bf16.mxu0 %v2297_v36  ;;  %2478 = vmatprep.mubr.bf16.mxu1 %v2297_v36 }
 0xdad   :  { %2406 = vmatpush1.bf16.msra.mxu0 %v5030_v32  ;;  %2447 = vmatpush1.bf16.msra.mxu1 %v5033_v34  ;;  %v6949_v32 = vld [vmem:[#allocation62_spill] sm:$0xff]  ;;  %v6950_v34 = vld [vmem:[#allocation63_spill] sm:$0xff] }
 0xdae   :  { %2407 = vmatprep.subr.bf16.mxu0 %v6837_v52  ;;  %2448 = vmatprep.subr.bf16.mxu1 %v6838_v6  ;;  %v6952_v52 = vld [vmem:[#allocation65_spill] sm:$0xff]  ;;  %v6953_v6 = vld [vmem:[#allocation66_spill] sm:$0xff] }
 0xdb1   :  { %2408 = vmatpush1.bf16.msra.mxu0 %v6839_v50  ;;  %2449 = vmatpush1.bf16.msra.mxu1 %v6840_v56  ;;  %v6954_v50 = vld [vmem:[#allocation67_spill] sm:$0xff]  ;;  %v6955_v56 = vld [vmem:[#allocation68_spill] sm:$0xff] }
 0xdb2   :  { %2409 = vmatprep.subr.bf16.mxu0 %v6841_v41  ;;  %2450 = vmatprep.subr.bf16.mxu1 %v6842_v15  ;;  %v6956_v41 = vld [vmem:[#allocation69_spill] sm:$0xff]  ;;  %v6957_v15 = vld [vmem:[#allocation70_spill] sm:$0xff] }
 0xdb5   :  { %2410 = vmatpush1.bf16.msra.mxu0 %v6843_v8  ;;  %2451 = vmatpush1.bf16.msra.mxu1 %v6844_v61  ;;  %v6958_v8 = vld [vmem:[#allocation71_spill] sm:$0xff]  ;;  %v6959_v61 = vld [vmem:[#allocation72_spill] sm:$0xff] }
 0xdb6   :  { %2411 = vmatprep.subr.bf16.mxu0 %v6845_v16  ;;  %2452 = vmatprep.subr.bf16.mxu1 %v6846_v53  ;;  %v6960_v16 = vld [vmem:[#allocation75_spill] sm:$0xff]  ;;  %v6961_v53 = vld [vmem:[#allocation73_spill] sm:$0xff] }
 0xdb9   :  { %2412 = vmatpush1.bf16.msra.mxu0 %v6847_v55  ;;  %2453 = vmatpush1.bf16.msra.mxu1 %v6848_v63  ;;  %v6962_v55 = vld [vmem:[#allocation76_spill] sm:$0xff]  ;;  %v6963_v63 = vld [vmem:[#allocation77_spill] sm:$0xff] }
 0xdba   :  { %2413 = vmatprep.subr.bf16.mxu0 %v6849_v4  ;;  %2454 = vmatprep.subr.bf16.mxu1 %v6850_v12  ;;  %v6964_v4 = vld [vmem:[#allocation74_spill] sm:$0xff] }
 0xdbb   :  { %v6965_v12 = vld [vmem:[#allocation78_spill] sm:$0xff] }
 0xdbd   :  { %2414 = vmatpush1.bf16.msra.mxu0 %v6851_v18  ;;  %2455 = vmatpush1.bf16.msra.mxu1 %v6852_v5  ;;  %v6966_v18 = vld [vmem:[#allocation79_spill] sm:$0xff]  ;;  %v6967_v5 = vld [vmem:[#allocation80_spill] sm:$0xff] }
 0xdbe   :  { %2415 = vmatprep.subr.bf16.mxu0 %v6853_v19  ;;  %2456 = vmatprep.subr.bf16.mxu1 %v6854_v21  ;;  %v6968_v19 = vld [vmem:[#allocation81_spill] sm:$0xff]  ;;  %v6969_v21 = vld [vmem:[#allocation82_spill] sm:$0xff] }
 0xdc1   :  { %2416 = vmatpush1.bf16.msra.mxu0 %v6855_v23  ;;  %2457 = vmatpush1.bf16.msra.mxu1 %v6856_v28  ;;  %v6970_v23 = vld [vmem:[#allocation83_spill] sm:$0xff]  ;;  %v6971_v28 = vld [vmem:[#allocation84_spill] sm:$0xff] }
 0xdc2   :  { %2417 = vmatprep.subr.bf16.mxu0 %v6857_v29  ;;  %2458 = vmatprep.subr.bf16.mxu1 %v6858_v30  ;;  %v6972_v29 = vld [vmem:[#allocation85_spill] sm:$0xff]  ;;  %v6973_v30 = vld [vmem:[#allocation86_spill] sm:$0xff] }
 0xdc5   :  { %2418 = vmatpush1.bf16.msra.mxu0 %v6859_v31  ;;  %2459 = vmatpush1.bf16.msra.mxu1 %v6949_v32  ;;  %v6974_v31 = vld [vmem:[#allocation87_spill] sm:$0xff] }
 0xdc6   :  { %2419 = vmatprep.subr.bf16.mxu0 %v6950_v34  ;;  %2460 = vmatprep.subr.bf16.mxu1 %v6951_v22 }
 0xdc9   :  { %2420 = vmatpush1.bf16.msra.mxu0 %v6952_v52  ;;  %2461 = vmatpush1.bf16.msra.mxu1 %v6953_v6 }
 0xdca   :  { %2421 = vmatprep.subr.bf16.mxu0 %v6954_v50  ;;  %2462 = vmatprep.subr.bf16.mxu1 %v6955_v56 }
 0xdcd   :  { %2422 = vmatpush1.bf16.msra.mxu0 %v6956_v41  ;;  %2463 = vmatpush1.bf16.msra.mxu1 %v6957_v15 }
 0xdce   :  { %2423 = vmatprep.subr.bf16.mxu0 %v6958_v8  ;;  %2464 = vmatprep.subr.bf16.mxu1 %v6959_v61 }
 0xdd1   :  { %2424 = vmatpush1.bf16.msra.mxu0 %v6960_v16  ;;  %2465 = vmatpush1.bf16.msra.mxu1 %v6961_v53 }
 0xdd2   :  { %2425 = vmatprep.subr.bf16.mxu0 %v6962_v55  ;;  %2466 = vmatprep.subr.bf16.mxu1 %v6963_v63 }
 0xdd5   :  { %2426 = vmatpush1.bf16.msra.mxu0 %v6964_v4  ;;  %2467 = vmatpush1.bf16.msra.mxu1 %v6965_v12 }
 0xdd6   :  { %2427 = vmatprep.subr.bf16.mxu0 %v6966_v18  ;;  %2468 = vmatprep.subr.bf16.mxu1 %v6967_v5 }
 0xdd9   :  { %2428 = vmatpush1.bf16.msra.mxu0 %v6968_v19  ;;  %2469 = vmatpush1.bf16.msra.mxu1 %v6969_v21 }
 0xdda   :  { %2429 = vmatprep.subr.bf16.mxu0 %v6970_v23  ;;  %2470 = vmatprep.subr.bf16.mxu1 %v6971_v28 }
 0xddd   :  { %2430 = vmatpush1.bf16.msra.mxu0 %v6972_v29  ;;  %2471 = vmatpush1.bf16.msra.mxu1 %v6973_v30 }
 0xdde   :  { %2431 = vmatprep.subr.bf16.mxu0 %v6974_v31  ;;  %2472 = vmatprep.subr.bf16.mxu1 %v6975_v9 }
 0xde1   :  { %2432 = vmatpush1.bf16.msra.mxu0 %v6976_v0  ;;  %2473 = vmatpush1.bf16.msra.mxu1 %v6977_v17 }
 0xde2   :  { %2433 = vmatprep.subr.bf16.mxu0 %v6978_v45  ;;  %2474 = vmatprep.subr.bf16.mxu1 %v6979_v35  ;;  %v7001_v35 = vld [vmem:[#allocation34_spill] sm:$0xff] }
 0xde5   :  { %2434 = vmatpush1.bf16.msra.mxu0 %v6980_v39  ;;  %2475 = vmatpush1.bf16.msra.mxu1 %v6981_v49  ;;  %v7002_v39 = vld [vmem:[#allocation95_spill] sm:$0xff]  ;;  %v7003_v49 = vld [vmem:[#allocation96_spill] sm:$0xff] }
 0xde6   :  { %2435 = vmatprep.subr.bf16.mxu0 %v6982_v47  ;;  %2476 = vmatprep.subr.bf16.mxu1 %v6983_v11  ;;  %v7004_v47 = vld [vmem:[#allocation31_spill] sm:$0xff]  ;;  %v7005_v11 = vld [vmem:[#allocation36_spill] sm:$0xff] }
 0xde9   :  { %2436 = vmatpush1.bf16.msra.mxu0 %v6984_v2  ;;  %2477 = vmatpush1.bf16.msra.mxu1 %v6985_v14  ;;  %v7006_v2 = vld [vmem:[#allocation33_spill] sm:$0xff]  ;;  %v7007_v14 = vld [vmem:[#allocation38_spill] sm:$0xff] }
 0xdea   :  { %2512 = vmatprep.subr.bf16.mxu0 %v6986_v43  ;;  %2553 = vmatprep.subr.bf16.mxu1 %v6987_v60  ;;  %v7008_v43 = vld [vmem:[#allocation14_spill] sm:$0xff]  ;;  %v7009_v60 = vld [vmem:[#allocation97_spill] sm:$0xff] }
 0xe7e   :  { %v2332_v20 = vpop.f32.mrb[52].mxu0  ;;  %v2373_v44 = vpop.f32.mrb[52].mxu1 }
 0xe7f   :  { %v2333_v36 = vadd.f32 %v2332_v20, %v4215_v25  ;;  %v2334_v32 = vpop.f32.mrb[53].mxu0  ;;  %v2375_v34 = vpop.f32.mrb[53].mxu1  ;;  %v2374_v8 = vadd.f32 %v2373_v44, %v4223_v40  ;;  %v7010_v20 = vld [vmem:[#allocation98_spill] sm:$0xff]  ;;  %v7011_v44 = vld [vmem:[#allocation99_spill] sm:$0xff] }
 0xe80   :  { %v2335_v22 = vadd.f32 %v2334_v32, %v4218_v27  ;;  %v2336_v52 = vpop.f32.mrb[54].mxu0  ;;  %v2377_v6 = vpop.f32.mrb[54].mxu1  ;;  %v2376_v61 = vadd.f32 %v2375_v34, %v4226_v42  ;;  %v7013_v32 = vld [vmem:[#allocation101_spill] sm:$0xff]  ;;  %v7014_v34 = vld [vmem:[#allocation35_spill] sm:$0xff] }
 0xe81   :  { %v2837_v50 = vmul.f32 -1.442695, %v2333_v36  ;;  %v2337_v56 = vpop.f32.mrb[55].mxu0  ;;  %v2378_v41 = vpop.f32.mrb[55].mxu1  ;;  %v2839_v16 = vmul.f32 -1.442695, %v2374_v8 }
 0xe82   :  { %v2838_v15 = vmul.f32 -1.442695, %v2335_v22  ;;  %v7012_v36 = vld [vmem:[#allocation100_spill] sm:$0xff]  ;;  %v7016_v52 = vld [vmem:[#allocation37_spill] sm:$0xff]  ;;  %v7017_v6 = vld [vmem:[#allocation42_spill] sm:$0xff] }
 0xe83   :  { %3253 = vpow2.f32 %v2837_v50  ;;  %v7015_v22 = vld [vmem:[#allocation40_spill] sm:$0xff]  ;;  %v7018_v50 = vld [vmem:[#allocation39_spill] sm:$0xff]  ;;  %v7020_v41 = vld [vmem:[#allocation41_spill] sm:$0xff] }
 0xe84   :  { %3255 = vpow2.f32 %v2838_v15  ;;  %v7019_v56 = vld [vmem:[#allocation44_spill] sm:$0xff]  ;;  %v7021_v15 = vld [vmem:[#allocation45_spill] sm:$0xff]  ;;  %v7022_v8 = vld [vmem:[#allocation43_spill] sm:$0xff] }
 0xe85   :  { %3257 = vtanh.f32 %v2376_v61  ;;  %v7023_v61 = vld [vmem:[#allocation46_spill] sm:$0xff] }
 0xe86   :  { %3259 = vpow2.f32 %v2839_v16  ;;  %v7024_v16 = vld [vmem:[#allocation47_spill] sm:$0xff] }
 0xe8d   :  { %v3254_v53 = vpop.eup %3253 }
 0xe8e   :  { %v2389_v55 = vadd.f32 1.0, %v3254_v53  ;;  %v3256_v63 = vpop.eup %3255  ;;  %v7025_v53 = vld [vmem:[#allocation48_spill] sm:$0xff] }
 0xe8f   :  { %v2390_v4 = vadd.f32 1.0, %v3256_v63  ;;  %v3258_v12 = vpop.eup %3257  ;;  %v7027_v63 = vld [vmem:[#allocation50_spill] sm:$0xff] }
 0xe90   :  { %3261 = vrcp.f32 %v2389_v55  ;;  %v3260_v18 = vpop.eup %3259  ;;  %v7026_v55 = vld [vmem:[#allocation49_spill] sm:$0xff] }
 0xe91   :  { %3263 = vrcp.f32 %v2390_v4  ;;  %v2391_v23 = vadd.f32 1.0, %v3260_v18  ;;  %v7028_v4 = vld [vmem:[#allocation51_spill] sm:$0xff]  ;;  %v7030_v18 = vld [vmem:[#allocation53_spill] sm:$0xff] }
 0xe93   :  { %3265 = vrcp.f32 %v2391_v23  ;;  %v7034_v23 = vld [vmem:[#allocation57_spill] sm:$0xff] }
 0xe9a   :  { %v3262_v5 = vpop.eup %3261 }
 0xe9b   :  { %v2400_v19 = vmul.f32 %v3262_v5, %v3258_v12  ;;  %v3264_v21 = vpop.eup %3263  ;;  %v7029_v12 = vld [vmem:[#allocation52_spill] sm:$0xff]  ;;  %v7031_v5 = vld [vmem:[#allocation54_spill] sm:$0xff] }
 0xe9c   :  { %v2399_v28 = vmul.f32 %v3264_v21, %v5392_v58  ;;  %v6993_v58 = vld [vmem:[#allocation26_spill] sm:$0xff]  ;;  %v7033_v21 = vld [vmem:[#allocation56_spill] sm:$0xff] }
 0xe9d   :  { %v3266_v30 = vpop.eup %3265 }
 0xe9e   :  { %v5645_v29 = vadd.f32 %v2400_v19, %v2399_v28  ;;  %v7032_v19 = vld [vmem:[#allocation55_spill] sm:$0xff]  ;;  %v7035_v28 = vld [vmem:[#allocation58_spill] sm:$0xff] }
 0xea0   :  { %3267 = vtanh.f32 %v5645_v29 }
 0xeaa   :  { %v3268_v31 = vpop.eup %3267 }
 0xeab   :  { %v2403_v9 = vmul.f32 %v3268_v31, %v3266_v30  ;;  %v7036_v30 = vld [vmem:[#allocation59_spill] sm:$0xff]  ;;  %v7037_v31 = vld [vmem:[#allocation60_spill] sm:$0xff] }
 0xead   :  { %v2404_v0 = vpack.c.bf16 %v2403_v9, %v2403_v9  ;;  %v2634_v17 = vrot.slane %v2403_v9, 2  ;;  %v7038_v9 = vld [vmem:[#allocation61_spill] sm:$0xff] }
 0xeaf   :  { %2438 = vmatmul.mubr.bf16.vlgmr.msra.gmra.mrb[56].mxu0 %v2404_v0  ;;  %2479 = vmatmul.mubr.bf16.vlgmr.msra.gmra.mrb[56].mxu1 %v2404_v0  ;;  %v5649_v45 = vsel %vm2649_vm5, %v5396_v3, %v2634_v17  ;;  %v6995_v3 = vld [vmem:[#allocation28_spill] sm:$0xff] }
 0xeb0   :  { %2544 = vmatprep.mubr.bf16.mxu0 %v2404_v0  ;;  %2585 = vmatprep.mubr.bf16.mxu1 %v2404_v0 }
 0xeb1   :  { %2513 = vmatpush1.bf16.msra.mxu0 %v5229_v7  ;;  %2554 = vmatpush1.bf16.msra.mxu1 %v5232_v51  ;;  %v6988_v7 = vld [vmem:[#allocation23_spill] sm:$0xff] }
 0xeb2   :  { %2514 = vmatprep.subr.bf16.mxu0 %v5235_v59  ;;  %2555 = vmatprep.subr.bf16.mxu1 %v5238_v33  ;;  %v6989_v51 = vld [vmem:[#allocation15_spill] sm:$0xff]  ;;  %v6991_v33 = vld [vmem:[#allocation25_spill] sm:$0xff] }
 0xeb3   :  { %v6990_v59 = vld [vmem:[#allocation19_spill] sm:$0xff] }
 0xeb5   :  { %2515 = vmatpush1.bf16.msra.mxu0 %v5241_v62  ;;  %2556 = vmatpush1.bf16.msra.mxu1 %v5403_v54  ;;  %v6992_v62 = vld [vmem:[#allocation20_spill] sm:$0xff]  ;;  %v6997_v54 = vld [vmem:[#allocation30_spill] sm:$0xff] }
 0xeb6   :  { %2516 = vmatprep.subr.bf16.mxu0 %v5245_v57  ;;  %2557 = vmatprep.subr.bf16.mxu1 %v5407_v10  ;;  %v6994_v57 = vld [vmem:[#allocation22_spill] sm:$0xff]  ;;  %v6999_v10 = vld [vmem:[#allocation32_spill] sm:$0xff] }
 0xeb9   :  { %2517 = vmatpush1.bf16.msra.mxu0 %v5249_v48  ;;  %2558 = vmatpush1.bf16.msra.mxu1 %v5411_v1  ;;  %v6996_v48 = vld [vmem:[#allocation24_spill] sm:$0xff]  ;;  %v7000_v1 = vld [vmem:[#allocation29_spill] sm:$0xff] }
 0xeba   :  { %2518 = vmatprep.subr.bf16.mxu0 %v5253_v38  ;;  %2559 = vmatprep.subr.bf16.mxu1 %v6988_v7  ;;  %v6998_v38 = vld [vmem:[#allocation27_spill] sm:$0xff] }
 0xebd   :  { %2519 = vmatpush1.bf16.msra.mxu0 %v6989_v51  ;;  %2560 = vmatpush1.bf16.msra.mxu1 %v6990_v59 }
 0xebe   :  { %2520 = vmatprep.subr.bf16.mxu0 %v6991_v33  ;;  %2561 = vmatprep.subr.bf16.mxu1 %v6992_v62 }
 0xec1   :  { %2521 = vmatpush1.bf16.msra.mxu0 %v6993_v58  ;;  %2562 = vmatpush1.bf16.msra.mxu1 %v6994_v57 }
 0xec2   :  { %2522 = vmatprep.subr.bf16.mxu0 %v6995_v3  ;;  %2563 = vmatprep.subr.bf16.mxu1 %v6996_v48 }
 0xec5   :  { %2523 = vmatpush1.bf16.msra.mxu0 %v6997_v54  ;;  %2564 = vmatpush1.bf16.msra.mxu1 %v6998_v38 }
 0xec6   :  { %2524 = vmatprep.subr.bf16.mxu0 %v6999_v10  ;;  %2565 = vmatprep.subr.bf16.mxu1 %v7000_v1 }
 0xec9   :  { %2525 = vmatpush1.bf16.msra.mxu0 %v7001_v35  ;;  %2566 = vmatpush1.bf16.msra.mxu1 %v7002_v39 }
 0xeca   :  { %2526 = vmatprep.subr.bf16.mxu0 %v7003_v49  ;;  %2567 = vmatprep.subr.bf16.mxu1 %v7004_v47 }
 0xecd   :  { %2527 = vmatpush1.bf16.msra.mxu0 %v7005_v11  ;;  %2568 = vmatpush1.bf16.msra.mxu1 %v7006_v2 }
 0xece   :  { %2528 = vmatprep.subr.bf16.mxu0 %v7007_v14  ;;  %2569 = vmatprep.subr.bf16.mxu1 %v7008_v43 }
 0xed1   :  { %2529 = vmatpush1.bf16.msra.mxu0 %v7009_v60  ;;  %2570 = vmatpush1.bf16.msra.mxu1 %v7010_v20 }
 0xed2   :  { %2530 = vmatprep.subr.bf16.mxu0 %v7011_v44  ;;  %2571 = vmatprep.subr.bf16.mxu1 %v7012_v36 }
 0xed5   :  { %2531 = vmatpush1.bf16.msra.mxu0 %v7013_v32  ;;  %2572 = vmatpush1.bf16.msra.mxu1 %v7014_v34 }
 0xed6   :  { %2532 = vmatprep.subr.bf16.mxu0 %v7015_v22  ;;  %2573 = vmatprep.subr.bf16.mxu1 %v7016_v52 }
 0xed9   :  { %2533 = vmatpush1.bf16.msra.mxu0 %v7017_v6  ;;  %2574 = vmatpush1.bf16.msra.mxu1 %v7018_v50 }
 0xeda   :  { %2534 = vmatprep.subr.bf16.mxu0 %v7019_v56  ;;  %2575 = vmatprep.subr.bf16.mxu1 %v7020_v41 }
 0xedd   :  { %2535 = vmatpush1.bf16.msra.mxu0 %v7021_v15  ;;  %2576 = vmatpush1.bf16.msra.mxu1 %v7022_v8 }
 0xede   :  { %2536 = vmatprep.subr.bf16.mxu0 %v7023_v61  ;;  %2577 = vmatprep.subr.bf16.mxu1 %v7024_v16 }
 0xee1   :  { %2537 = vmatpush1.bf16.msra.mxu0 %v7025_v53  ;;  %2578 = vmatpush1.bf16.msra.mxu1 %v7026_v55 }
 0xee2   :  { %2538 = vmatprep.subr.bf16.mxu0 %v7027_v63  ;;  %2579 = vmatprep.subr.bf16.mxu1 %v7028_v4 }
 0xee5   :  { %2539 = vmatpush1.bf16.msra.mxu0 %v7029_v12  ;;  %2580 = vmatpush1.bf16.msra.mxu1 %v7030_v18 }
 0xee6   :  { %2540 = vmatprep.subr.bf16.mxu0 %v7031_v5  ;;  %2581 = vmatprep.subr.bf16.mxu1 %v7032_v19 }
 0xee9   :  { %2541 = vmatpush1.bf16.msra.mxu0 %v7033_v21  ;;  %2582 = vmatpush1.bf16.msra.mxu1 %v7034_v23 }
 0xeea   :  { %2542 = vmatprep.subr.bf16.mxu0 %v7035_v28  ;;  %2583 = vmatprep.subr.bf16.mxu1 %v7036_v30 }
 0xeed   :  { %2543 = vmatpush1.bf16.msra.mxu0 %v7037_v31  ;;  %2584 = vmatpush1.bf16.msra.mxu1 %v7038_v9 }
 0xf82   :  { %v2439_v0 = vpop.f32.mrb[56].mxu0  ;;  %v2480_v17 = vpop.f32.mrb[56].mxu1 }
 0xf83   :  { %v2440_v7 = vadd.f32 %v2439_v0, %v6549_v37  ;;  %v2441_v51 = vpop.f32.mrb[57].mxu0  ;;  %v2482_v59 = vpop.f32.mrb[57].mxu1  ;;  %v2481_v38 = vadd.f32 %v2480_v17, %v4320_v24 }
 0xf84   :  { %v2442_v33 = vadd.f32 %v2441_v51, %v4315_v13  ;;  %v2443_v62 = vpop.f32.mrb[58].mxu0  ;;  %v2484_v58 = vpop.f32.mrb[58].mxu1  ;;  %v2483_v10 = vadd.f32 %v2482_v59, %v4323_v26 }
 0xf85   :  { %v2840_v57 = vmul.f32 -1.442695, %v2440_v7  ;;  %v2444_v3 = vpop.f32.mrb[59].mxu0  ;;  %v2485_v48 = vpop.f32.mrb[59].mxu1  ;;  %v2842_v1 = vmul.f32 -1.442695, %v2481_v38 }
 0xf86   :  { %v2841_v54 = vmul.f32 -1.442695, %v2442_v33 }
 0xf87   :  { %3269 = vpow2.f32 %v2840_v57 }
 0xf88   :  { %3271 = vpow2.f32 %v2841_v54 }
 0xf89   :  { %3273 = vtanh.f32 %v2483_v10 }
 0xf8a   :  { %3275 = vpow2.f32 %v2842_v1 }
 0xf91   :  { %v3270_v35 = vpop.eup %3269 }
 0xf92   :  { %v2496_v39 = vadd.f32 1.0, %v3270_v35  ;;  %v3272_v37 = vpop.eup %3271 }
 0xf93   :  { %v2497_v13 = vadd.f32 1.0, %v3272_v37  ;;  %v3274_v49 = vpop.eup %3273 }
 0xf94   :  { %3277 = vrcp.f32 %v2496_v39  ;;  %v3276_v47 = vpop.eup %3275 }
 0xf95   :  { %3279 = vrcp.f32 %v2497_v13  ;;  %v2498_v43 = vadd.f32 1.0, %v3276_v47 }
 0xf97   :  { %3281 = vrcp.f32 %v2498_v43 }
 0xf9e   :  { %v3278_v11 = vpop.eup %3277 }
 0xf9f   :  { %v2507_v2 = vmul.f32 %v3278_v11, %v3274_v49  ;;  %v3280_v14 = vpop.eup %3279 }
 0xfa0   :  { %v2506_v60 = vmul.f32 %v3280_v14, %v5573_v46 }
 0xfa1   :  { %v3282_v26 = vpop.eup %3281 }
 0xfa2   :  { %v2508_v24 = vadd.f32 %v2507_v2, %v2506_v60 }
 0xfa4   :  { %3283 = vtanh.f32 %v2508_v24 }
 0xfae   :  { %v3284_v20 = vpop.eup %3283 }
 0xfaf   :  { %v2510_v44 = vmul.f32 %v3284_v20, %v3282_v26 }
 0xfb1   :  { %v2511_v36 = vpack.c.bf16 %v2510_v44, %v2510_v44 }
 0xfb3   :  { %2545 = vmatmul.mubr.bf16.vlgmr.msra.gmra.mrb[60].mxu0 %v2511_v36  ;;  %2586 = vmatmul.mubr.bf16.vlgmr.msra.gmra.mrb[60].mxu1 %v2511_v36 }
0x1086   :  { %v2546_v32 = vpop.f32.mrb[60].mxu0  ;;  %v2587_v34 = vpop.f32.mrb[60].mxu1 }
0x1087   :  { %v2547_v22 = vadd.f32 %v2546_v32, %v4215_v25  ;;  %v2548_v52 = vpop.f32.mrb[61].mxu0  ;;  %v2589_v6 = vpop.f32.mrb[61].mxu1  ;;  %v2588_v16 = vadd.f32 %v2587_v34, %v4223_v40 }
0x1088   :  { %v2549_v50 = vadd.f32 %v2548_v52, %v4218_v27  ;;  %v2550_v56 = vpop.f32.mrb[62].mxu0  ;;  %v2591_v41 = vpop.f32.mrb[62].mxu1  ;;  %v2590_v53 = vadd.f32 %v2589_v6, %v4226_v42 }
0x1089   :  { %v2843_v46 = vmul.f32 -1.442695, %v2547_v22  ;;  %v2551_v15 = vpop.f32.mrb[63].mxu0  ;;  %v2592_v8 = vpop.f32.mrb[63].mxu1  ;;  %v2845_v55 = vmul.f32 -1.442695, %v2588_v16 }
0x108a   :  { %v2844_v61 = vmul.f32 -1.442695, %v2549_v50 }
0x108b   :  { %3285 = vpow2.f32 %v2843_v46 }
0x108c   :  { %3287 = vpow2.f32 %v2844_v61 }
0x108d   :  { %3289 = vtanh.f32 %v2590_v53 }
0x108e   :  { %3291 = vpow2.f32 %v2845_v55 }
0x1095   :  { %v3286_v63 = vpop.eup %3285 }
0x1096   :  { %v2603_v4 = vadd.f32 1.0, %v3286_v63  ;;  %v3288_v25 = vpop.eup %3287 }
0x1097   :  { %v2604_v27 = vadd.f32 1.0, %v3288_v25  ;;  %v3290_v12 = vpop.eup %3289 }
0x1098   :  { %3293 = vrcp.f32 %v2603_v4  ;;  %v3292_v18 = vpop.eup %3291 }
0x1099   :  { %3295 = vrcp.f32 %v2604_v27  ;;  %v2605_v23 = vadd.f32 1.0, %v3292_v18 }
0x109b   :  { %3297 = vrcp.f32 %v2605_v23 }
0x10a2   :  { %v3294_v5 = vpop.eup %3293 }
0x10a3   :  { %v2614_v19 = vmul.f32 %v3294_v5, %v3290_v12  ;;  %v3296_v21 = vpop.eup %3295 }
0x10a4   :  { %v2613_v28 = vmul.f32 %v3296_v21, %v5645_v29 }
0x10a5   :  { %v3298_v42 = vpop.eup %3297 }
0x10a6   :  { %v2615_v40 = vadd.f32 %v2614_v19, %v2613_v28 }
0x10a8   :  { %3299 = vtanh.f32 %v2615_v40 }
0x10b2   :  { %v3300_v30 = vpop.eup %3299 }
0x10b3   :  { %v2617_v31 = vmul.f32 %v3300_v30, %v3298_v42 }
0x10b5   :  { %v2637_v9 = vrot.slane %v2617_v31, 1 }
0x10b7   :  { %v2652_v0 = vsel %vm2651_vm6, %v5649_v45, %v2637_v9 }
0x10b8   :  { %2653 = vst [vmem:[#allocation8] sm:$0xff] %v2652_v0 }
0x10b9   :  { %3634 = shalt.err (!%p3631_p0)
}
0x10ba   :  { %s3635_s24 = scalar_lea.hbm %s5743_s7, 128 }
0x10bb   :  { %p3636_p1 = scmp.ne.s32.totalorder %s5743_s7, %s3635_s24  ;;  %p3639_p2 = scmp.lt.u32.totalorder %s3635_s24, %s5743_s7 }
0x10bd   :  { %p3641_p3 = pnand %p3639_p2, %p3636_p1 }
0x10bf   :  { %3644 = shalt.err (!%p3641_p3)
}
0x10c0   :  { %2663 = dma.vmem_to_hbm [thread:$0]  %s2661_s20, 128, %s5743_s7, [#allocation4]  }
0x10c1   :  { %3649 = dma.done.wait [#allocation4], 128  }
0x10c2   :  { %3650 = vsyncadd [#allocation4], 4294967168 }
0x10c3   :  { %2667 = vsyncpa [#allocation3], 1 }
0x10c4   :  { %2668 = vsyncpa [#allocation6], 1 }
0x10c5   :  { %2669 = vsyncpa [#allocation4], 1 }

</bundles_post_ra>
